<compile_context>
chip_gen: v7x
topology: tpu7x:2x2x1
jax: 0.10.0
libtpu: 0.0.40
codegen_flags: <defaults>
</compile_context>

<pallas_src>
import jax
import jax.numpy as jnp
import numpy as np
from jax import lax
from jax.experimental import pallas as pl
from jax.experimental.pallas import tpu as pltpu

# MXU operand dtype (accumulation is always f32).  Set to jnp.float32 for
# strict ~1e-4 parity with the reference; bf16 gives ~2-4x MXU throughput and
# halves weight/scratch bytes on v5e/v6e/v7x (tolerance loosened accordingly).
_MXU_DTYPE = jnp.bfloat16


def _round_up(x, m):
    return (x + m - 1) // m * m


def _basic_block_kernel(H, W, Cp, Wp):
    """Fused BasicBlock body.  Wp >= W+2 is the sublane-padded scratch width."""
    taps = [(dy, dx) for dy in range(3) for dx in range(3)]

    def conv3x3(pad_ref, w_ref):
        # pad_ref: (H+2, Wp, Cp) zero-border padded activation (VMEM, _MXU_DTYPE).
        # w_ref  : (9, Cp, Cp) BN-folded weights, tap-major (dy, dx).
        # Nine shifted-window matmuls accumulated in f32 (MRB accumulates in
        # place on v7x); no im2col operand is ever materialized.
        acc = jnp.zeros((H * W, Cp), jnp.float32)
        for t, (dy, dx) in enumerate(taps):
            win = pad_ref[dy:dy + H, dx:dx + W, :].reshape(H * W, Cp)
            acc = acc + jnp.dot(win, w_ref[t], preferred_element_type=jnp.float32)
        return acc

    def zero_border(pad_ref):
        # The interior [1:H+1, 1:W+1] is fully overwritten every step and
        # columns >= W+2 are never read, so only the border strips need zeros.
        zrow = jnp.zeros((Wp, Cp), pad_ref.dtype)
        pad_ref[0] = zrow
        pad_ref[H + 1] = zrow
        zcol = jnp.zeros((H, 1, Cp), pad_ref.dtype)
        pad_ref[1:H + 1, 0:1, :] = zcol
        pad_ref[1:H + 1, W + 1:W + 2, :] = zcol

    def kernel(x_ref, w1_ref, b1_ref, w2_ref, b2_ref, o_ref, xpad_ref, mid_ref):
        zero_border(xpad_ref)
        zero_border(mid_ref)

        # Pad + cast the input tile once; it never leaves VMEM after this.
        xpad_ref[1:H + 1, 1:W + 1, :] = x_ref[0].astype(xpad_ref.dtype)

        # conv1 + folded-bn1 + relu
        h1 = jnp.maximum(conv3x3(xpad_ref, w1_ref) + b1_ref[...], 0.0)
        mid_ref[1:H + 1, 1:W + 1, :] = h1.reshape(H, W, Cp).astype(mid_ref.dtype)

        # conv2 + folded-bn2 + residual + relu
        h2 = conv3x3(mid_ref, w2_ref) + b2_ref[...]
        y = h2 + x_ref[0].reshape(H * W, Cp)      # residual re-read (f32) at epilogue
        o_ref[0] = jnp.maximum(y, 0.0).reshape(H, W, Cp).astype(o_ref.dtype)

    return kernel


def basic_block_pallas(x_nhwc_p, w1, b1, w2, b2):
    """x_nhwc_p: (N, H, W, Cp) channel-padded NHWC f32.
       w1, w2: (9, Cp, Cp) tap-major BN-folded weights (bf16); b1, b2: (1, Cp) f32."""
    N, H, W, Cp = x_nhwc_p.shape
    Wp = _round_up(W + 2, 16)    # sublane-aligned scratch width (bf16 packs 16 rows)

    return pl.pallas_call(
        _basic_block_kernel(H, W, Cp, Wp),
        out_shape=jax.ShapeDtypeStruct((N, H, W, Cp), jnp.float32),
        grid_spec=pltpu.PrefetchScalarGridSpec(
            num_scalar_prefetch=0,
            grid=(N,),
            in_specs=[
                pl.BlockSpec((1, H, W, Cp), lambda n: (n, 0, 0, 0)),   # x
                pl.BlockSpec((9, Cp, Cp), lambda n: (0, 0, 0)),        # w1 (scale-folded)
                pl.BlockSpec((1, Cp), lambda n: (0, 0)),               # b1
                pl.BlockSpec((9, Cp, Cp), lambda n: (0, 0, 0)),        # w2 (scale-folded)
                pl.BlockSpec((1, Cp), lambda n: (0, 0)),               # b2
            ],
            out_specs=pl.BlockSpec((1, H, W, Cp), lambda n: (n, 0, 0, 0)),
            scratch_shapes=[
                pltpu.VMEM((H + 2, Wp, Cp), _MXU_DTYPE),   # padded input
                pltpu.VMEM((H + 2, Wp, Cp), _MXU_DTYPE),   # padded mid activation
            ],
        ),
        compiler_params=pltpu.CompilerParams(
            dimension_semantics=("parallel",)),
    )(x_nhwc_p, w1, b1, w2, b2)


def fold_bn(gamma, beta, mean, var, eps=1e-5):
    scale = gamma / jnp.sqrt(var + eps)
    bias = beta - mean * scale
    return scale, bias


def prepare_block_params(w1_oihw, w2_oihw,
                         g1, be1, m1, v1, g2, be2, m2, v2, eps=1e-5):
    """Fold BN scale into the conv weights, pad channels only to a multiple of
    8 (NOT 128; real ResNet widths are >= 64 so this costs <= 2x while keeping
    the toy case from doing 16x zero work), reshape to tap-major (9, Cp, Cp)."""
    Cout1, Cin1 = w1_oihw.shape[0], w1_oihw.shape[1]
    Cout2, Cin2 = w2_oihw.shape[0], w2_oihw.shape[1]
    Cp = _round_up(max(Cin1, Cout1, Cin2, Cout2), 8)

    def prep(w_oihw, gamma, beta, mean, var):
        scale, bias = fold_bn(gamma, beta, mean, var, eps)
        w = jnp.transpose(w_oihw, (2, 3, 1, 0)) * scale      # (3,3,Cin,Cout), BN folded
        Cin, Cout = w.shape[2], w.shape[3]
        w = jnp.pad(w, ((0, 0), (0, 0), (0, Cp - Cin), (0, Cp - Cout)))
        b = jnp.pad(bias, (0, Cp - Cout)).reshape(1, Cp)
        # Cast AFTER zero-padding so padded lanes are exactly 0 in bf16 too.
        return (w.reshape(9, Cp, Cp).astype(_MXU_DTYPE), b.astype(jnp.float32))

    w1, b1 = prep(w1_oihw, g1, be1, m1, v1)
    w2, b2 = prep(w2_oihw, g2, be2, m2, v2)
    return w1, b1, w2, b2, Cp


@jax.jit
def basic_block_forward(x_nchw, w1, b1, w2, b2):
    """BasicBlock forward, NCHW in/out.  In a full network, keep activations in
    channel-padded NHWC across blocks and hoist these transposes/pads to the
    network entry/exit (they are per-block HBM glue passes otherwise)."""
    N, C, H, W = x_nchw.shape
    Cp = w1.shape[1]
    x = jnp.transpose(x_nchw, (0, 2, 3, 1))                    # -> NHWC
    if Cp != C:
        x = jnp.pad(x, ((0, 0), (0, 0), (0, 0), (0, Cp - C)))
    out = basic_block_pallas(x, w1, b1, w2, b2)
    out = out[..., :C]
    return jnp.transpose(out, (0, 3, 1, 2))                    # -> NCHW


def reference_forward(x_nchw, w1_oihw, w2_oihw, s1, b1, s2, b2):
    """Pure-JAX NCHW f32 reference for validation."""
    def conv(x, w):
        return lax.conv_general_dilated(
            x, w, window_strides=(1, 1), padding=((1, 1), (1, 1)),
            dimension_numbers=("NCHW", "OIHW", "NCHW"))

    def bn(x, s, b):
        return x * s[None, :, None, None] + b[None, :, None, None]

    out = jax.nn.relu(bn(conv(x_nchw, w1_oihw), s1, b1))
    out = bn(conv(out, w2_oihw), s2, b2) + x_nchw
    return jax.nn.relu(out)


if __name__ == "__main__":
    # inplanes = planes = 64 (smallest real BasicBlock width), stride = 1
    # (no downsample), 16x16 spatial, batch 2.
    N, C, H, W = 2, 64, 16, 16
    P = C  # planes == inplanes so the residual add is valid without downsample

    key = jax.random.PRNGKey(0)
    ks = jax.random.split(key, 9)

    x = jax.random.normal(ks[0], (N, C, H, W), jnp.float32)

    # Conv weights in PyTorch layout (O, I, 3, 3), no bias.
    w1_oihw = jax.random.normal(ks[1], (P, C, 3, 3), jnp.float32) * 0.05
    w2_oihw = jax.random.normal(ks[2], (P, P, 3, 3), jnp.float32) * 0.05

    # BatchNorm (eval mode) parameters.
    g1 = 1.0 + 0.1 * jax.random.normal(ks[3], (P,), jnp.float32)
    be1 = 0.1 * jax.random.normal(ks[4], (P,), jnp.float32)
    m1 = 0.1 * jax.random.normal(ks[5], (P,), jnp.float32)
    v1 = jnp.abs(jax.random.normal(ks[6], (P,), jnp.float32)) + 0.5
    g2 = 1.0 + 0.1 * jax.random.normal(ks[7], (P,), jnp.float32)
    be2 = 0.1 * jax.random.normal(ks[8], (P,), jnp.float32)
    m2 = jnp.zeros((P,), jnp.float32)
    v2 = jnp.ones((P,), jnp.float32)

    w1, b1, w2, b2, _ = prepare_block_params(
        w1_oihw, w2_oihw, g1, be1, m1, v1, g2, be2, m2, v2)

    out = jax.block_until_ready(basic_block_forward(x, w1, b1, w2, b2))

    s1, bb1 = fold_bn(g1, be1, m1, v1)
    s2, bb2 = fold_bn(g2, be2, m2, v2)
    ref = jax.block_until_ready(
        reference_forward(x, w1_oihw, w2_oihw, s1, bb1, s2, bb2))

    # bf16 MXU operands with f32 accumulation: tolerance loosened vs the f32
    # reference (set _MXU_DTYPE = jnp.float32 above for ~1e-4 parity).
    np.testing.assert_allclose(np.asarray(out), np.asarray(ref),
                               rtol=5e-2, atol=5e-2)
    print("KERNEL_OK")
</pallas_src>

<mosaic_0001>
module attributes {stable_mosaic.version = 11 : i64} {
  func.func @kernel(%arg0: i32, %arg1: memref<1x16x16x64xf32, #tpu.memory_space<vmem>>, %arg2: memref<9x64x64xbf16, #tpu.memory_space<vmem>>, %arg3: memref<1x64xf32, #tpu.memory_space<vmem>>, %arg4: memref<9x64x64xbf16, #tpu.memory_space<vmem>>, %arg5: memref<1x64xf32, #tpu.memory_space<vmem>>, %arg6: memref<1x16x16x64xf32, #tpu.memory_space<vmem>>, %arg7: memref<18x32x64xbf16, #tpu.memory_space<vmem>>, %arg8: memref<18x32x64xbf16, #tpu.memory_space<vmem>>) attributes {dimension_semantics = [#tpu.dimension_semantics<parallel>], iteration_bounds = array<i64: 2>, scalar_prefetch = 0 : i64, scratch_operands = 2 : i64, tpu.core_type = #tpu.core_type<tc>, window_params = [{transform_indices = @transform_0, window_bounds = array<i64: 1, 16, 16, 64>}, {pipeline_mode = #tpu.pipeline_mode<synchronous>, transform_indices = @transform_1, window_bounds = array<i64: 9, 64, 64>}, {pipeline_mode = #tpu.pipeline_mode<synchronous>, transform_indices = @transform_2, window_bounds = array<i64: 1, 64>}, {pipeline_mode = #tpu.pipeline_mode<synchronous>, transform_indices = @transform_3, window_bounds = array<i64: 9, 64, 64>}, {pipeline_mode = #tpu.pipeline_mode<synchronous>, transform_indices = @transform_4, window_bounds = array<i64: 1, 64>}, {transform_indices = @transform_5, window_bounds = array<i64: 1, 16, 16, 64>}]} {
    %cst = arith.constant 0.000000e+00 : bf16
    %0 = vector.broadcast %cst : bf16 to vector<32x64xbf16>
    %c0 = arith.constant 0 : index
    %c0_0 = arith.constant 0 : index
    %c0_1 = arith.constant 0 : index
    %1 = vector.load %arg7[%c0, %c0_0, %c0_1] : memref<18x32x64xbf16, #tpu.memory_space<vmem>>, vector<1x32x64xbf16>
    %2 = vector.shape_cast %1 : vector<1x32x64xbf16> to vector<32x64xbf16>
    %3 = vector.shape_cast %0 : vector<32x64xbf16> to vector<1x32x64xbf16>
    tpu.vector_store %arg7[%c0, %c0_0, %c0_1], %3 {strides = array<i32>} : memref<18x32x64xbf16, #tpu.memory_space<vmem>>, vector<1x32x64xbf16>,
    %c17 = arith.constant 17 : index
    %c0_2 = arith.constant 0 : index
    %c0_3 = arith.constant 0 : index
    %4 = vector.load %arg7[%c17, %c0_2, %c0_3] : memref<18x32x64xbf16, #tpu.memory_space<vmem>>, vector<1x32x64xbf16>
    %5 = vector.shape_cast %4 : vector<1x32x64xbf16> to vector<32x64xbf16>
    %6 = vector.shape_cast %0 : vector<32x64xbf16> to vector<1x32x64xbf16>
    tpu.vector_store %arg7[%c17, %c0_2, %c0_3], %6 {strides = array<i32>} : memref<18x32x64xbf16, #tpu.memory_space<vmem>>, vector<1x32x64xbf16>,
    %cst_4 = arith.constant 0.000000e+00 : bf16
    %7 = vector.broadcast %cst_4 : bf16 to vector<16x1x64xbf16>
    %c1 = arith.constant 1 : index
    %c0_5 = arith.constant 0 : index
    %c0_6 = arith.constant 0 : index
    %8 = vector.load %arg7[%c1, %c0_5, %c0_6] : memref<18x32x64xbf16, #tpu.memory_space<vmem>>, vector<16x1x64xbf16>
    tpu.vector_store %arg7[%c1, %c0_5, %c0_6], %7 {strides = array<i32>} : memref<18x32x64xbf16, #tpu.memory_space<vmem>>, vector<16x1x64xbf16>,
    %c1_7 = arith.constant 1 : index
    %c17_8 = arith.constant 17 : index
    %c0_9 = arith.constant 0 : index
    %9 = vector.load %arg7[%c1_7, %c17_8, %c0_9] : memref<18x32x64xbf16, #tpu.memory_space<vmem>>, vector<16x1x64xbf16>
    tpu.vector_store %arg7[%c1_7, %c17_8, %c0_9], %7 {strides = array<i32>} : memref<18x32x64xbf16, #tpu.memory_space<vmem>>, vector<16x1x64xbf16>,
    %cst_10 = arith.constant 0.000000e+00 : bf16
    %10 = vector.broadcast %cst_10 : bf16 to vector<32x64xbf16>
    %c0_11 = arith.constant 0 : index
    %c0_12 = arith.constant 0 : index
    %c0_13 = arith.constant 0 : index
    %11 = vector.load %arg8[%c0_11, %c0_12, %c0_13] : memref<18x32x64xbf16, #tpu.memory_space<vmem>>, vector<1x32x64xbf16>
    %12 = vector.shape_cast %11 : vector<1x32x64xbf16> to vector<32x64xbf16>
    %13 = vector.shape_cast %10 : vector<32x64xbf16> to vector<1x32x64xbf16>
    tpu.vector_store %arg8[%c0_11, %c0_12, %c0_13], %13 {strides = array<i32>} : memref<18x32x64xbf16, #tpu.memory_space<vmem>>, vector<1x32x64xbf16>,
    %c17_14 = arith.constant 17 : index
    %c0_15 = arith.constant 0 : index
    %c0_16 = arith.constant 0 : index
    %14 = vector.load %arg8[%c17_14, %c0_15, %c0_16] : memref<18x32x64xbf16, #tpu.memory_space<vmem>>, vector<1x32x64xbf16>
    %15 = vector.shape_cast %14 : vector<1x32x64xbf16> to vector<32x64xbf16>
    %16 = vector.shape_cast %10 : vector<32x64xbf16> to vector<1x32x64xbf16>
    tpu.vector_store %arg8[%c17_14, %c0_15, %c0_16], %16 {strides = array<i32>} : memref<18x32x64xbf16, #tpu.memory_space<vmem>>, vector<1x32x64xbf16>,
    %cst_17 = arith.constant 0.000000e+00 : bf16
    %17 = vector.broadcast %cst_17 : bf16 to vector<16x1x64xbf16>
    %c1_18 = arith.constant 1 : index
    %c0_19 = arith.constant 0 : index
    %c0_20 = arith.constant 0 : index
    %18 = vector.load %arg8[%c1_18, %c0_19, %c0_20] : memref<18x32x64xbf16, #tpu.memory_space<vmem>>, vector<16x1x64xbf16>
    tpu.vector_store %arg8[%c1_18, %c0_19, %c0_20], %17 {strides = array<i32>} : memref<18x32x64xbf16, #tpu.memory_space<vmem>>, vector<16x1x64xbf16>,
    %c1_21 = arith.constant 1 : index
    %c17_22 = arith.constant 17 : index
    %c0_23 = arith.constant 0 : index
    %19 = vector.load %arg8[%c1_21, %c17_22, %c0_23] : memref<18x32x64xbf16, #tpu.memory_space<vmem>>, vector<16x1x64xbf16>
    tpu.vector_store %arg8[%c1_21, %c17_22, %c0_23], %17 {strides = array<i32>} : memref<18x32x64xbf16, #tpu.memory_space<vmem>>, vector<16x1x64xbf16>,
    %c0_24 = arith.constant 0 : index
    %c0_25 = arith.constant 0 : index
    %c0_26 = arith.constant 0 : index
    %c0_27 = arith.constant 0 : index
    %20 = vector.load %arg1[%c0_24, %c0_25, %c0_26, %c0_27] : memref<1x16x16x64xf32, #tpu.memory_space<vmem>>, vector<1x16x16x64xf32>
    %21 = vector.shape_cast %20 : vector<1x16x16x64xf32> to vector<16x16x64xf32>
    %22 = arith.truncf %21 : vector<16x16x64xf32> to vector<16x16x64xbf16>
    %c1_28 = arith.constant 1 : index
    %c1_29 = arith.constant 1 : index
    %c0_30 = arith.constant 0 : index
    %23 = vector.load %arg7[%c1_28, %c1_29, %c0_30] : memref<18x32x64xbf16, #tpu.memory_space<vmem>>, vector<16x16x64xbf16>
    tpu.vector_store %arg7[%c1_28, %c1_29, %c0_30], %22 {strides = array<i32>} : memref<18x32x64xbf16, #tpu.memory_space<vmem>>, vector<16x16x64xbf16>,
    %cst_31 = arith.constant 0.000000e+00 : f32
    %24 = vector.broadcast %cst_31 : f32 to vector<256x64xf32>
    %c0_32 = arith.constant 0 : index
    %c0_33 = arith.constant 0 : index
    %c0_34 = arith.constant 0 : index
    %25 = vector.load %arg7[%c0_32, %c0_33, %c0_34] : memref<18x32x64xbf16, #tpu.memory_space<vmem>>, vector<16x16x64xbf16>
    %26 = vector.shape_cast %25 : vector<16x16x64xbf16> to vector<256x64xbf16>
    %c0_35 = arith.constant 0 : index
    %c0_36 = arith.constant 0 : index
    %c0_37 = arith.constant 0 : index
    %27 = vector.load %arg2[%c0_35, %c0_36, %c0_37] : memref<9x64x64xbf16, #tpu.memory_space<vmem>>, vector<1x64x64xbf16>
    %28 = vector.shape_cast %27 : vector<1x64x64xbf16> to vector<64x64xbf16>
    %cst_38 = arith.constant dense<0.000000e+00> : vector<256x64xf32>
    %29 = tpu.matmul %26, %28, %cst_38 {dimension_numbers = #tpu.dot_dimension_numbers<[1], [0], [0], [1], [0, 0, 1, 1], [], []>} : vector<256x64xbf16>, vector<64x64xbf16>, vector<256x64xf32> -> vector<256x64xf32>
    %30 = arith.addf %24, %29 : vector<256x64xf32>
    %c0_39 = arith.constant 0 : index
    %c1_40 = arith.constant 1 : index
    %c0_41 = arith.constant 0 : index
    %31 = vector.load %arg7[%c0_39, %c1_40, %c0_41] : memref<18x32x64xbf16, #tpu.memory_space<vmem>>, vector<16x16x64xbf16>
    %32 = vector.shape_cast %31 : vector<16x16x64xbf16> to vector<256x64xbf16>
    %c1_42 = arith.constant 1 : index
    %c0_43 = arith.constant 0 : index
    %c0_44 = arith.constant 0 : index
    %33 = vector.load %arg2[%c1_42, %c0_43, %c0_44] : memref<9x64x64xbf16, #tpu.memory_space<vmem>>, vector<1x64x64xbf16>
    %34 = vector.shape_cast %33 : vector<1x64x64xbf16> to vector<64x64xbf16>
    %cst_45 = arith.constant dense<0.000000e+00> : vector<256x64xf32>
    %35 = tpu.matmul %32, %34, %cst_45 {dimension_numbers = #tpu.dot_dimension_numbers<[1], [0], [0], [1], [0, 0, 1, 1], [], []>} : vector<256x64xbf16>, vector<64x64xbf16>, vector<256x64xf32> -> vector<256x64xf32>
    %36 = arith.addf %30, %35 : vector<256x64xf32>
    %c0_46 = arith.constant 0 : index
    %c2 = arith.constant 2 : index
    %c0_47 = arith.constant 0 : index
    %37 = vector.load %arg7[%c0_46, %c2, %c0_47] : memref<18x32x64xbf16, #tpu.memory_space<vmem>>, vector<16x16x64xbf16>
    %38 = vector.shape_cast %37 : vector<16x16x64xbf16> to vector<256x64xbf16>
    %c2_48 = arith.constant 2 : index
    %c0_49 = arith.constant 0 : index
    %c0_50 = arith.constant 0 : index
    %39 = vector.load %arg2[%c2_48, %c0_49, %c0_50] : memref<9x64x64xbf16, #tpu.memory_space<vmem>>, vector<1x64x64xbf16>
    %40 = vector.shape_cast %39 : vector<1x64x64xbf16> to vector<64x64xbf16>
    %cst_51 = arith.constant dense<0.000000e+00> : vector<256x64xf32>
    %41 = tpu.matmul %38, %40, %cst_51 {dimension_numbers = #tpu.dot_dimension_numbers<[1], [0], [0], [1], [0, 0, 1, 1], [], []>} : vector<256x64xbf16>, vector<64x64xbf16>, vector<256x64xf32> -> vector<256x64xf32>
    %42 = arith.addf %36, %41 : vector<256x64xf32>
    %c1_52 = arith.constant 1 : index
    %c0_53 = arith.constant 0 : index
    %c0_54 = arith.constant 0 : index
    %43 = vector.load %arg7[%c1_52, %c0_53, %c0_54] : memref<18x32x64xbf16, #tpu.memory_space<vmem>>, vector<16x16x64xbf16>
    %44 = vector.shape_cast %43 : vector<16x16x64xbf16> to vector<256x64xbf16>
    %c3 = arith.constant 3 : index
    %c0_55 = arith.constant 0 : index
    %c0_56 = arith.constant 0 : index
    %45 = vector.load %arg2[%c3, %c0_55, %c0_56] : memref<9x64x64xbf16, #tpu.memory_space<vmem>>, vector<1x64x64xbf16>
    %46 = vector.shape_cast %45 : vector<1x64x64xbf16> to vector<64x64xbf16>
    %cst_57 = arith.constant dense<0.000000e+00> : vector<256x64xf32>
    %47 = tpu.matmul %44, %46, %cst_57 {dimension_numbers = #tpu.dot_dimension_numbers<[1], [0], [0], [1], [0, 0, 1, 1], [], []>} : vector<256x64xbf16>, vector<64x64xbf16>, vector<256x64xf32> -> vector<256x64xf32>
    %48 = arith.addf %42, %47 : vector<256x64xf32>
    %c1_58 = arith.constant 1 : index
    %c1_59 = arith.constant 1 : index
    %c0_60 = arith.constant 0 : index
    %49 = vector.load %arg7[%c1_58, %c1_59, %c0_60] : memref<18x32x64xbf16, #tpu.memory_space<vmem>>, vector<16x16x64xbf16>
    %50 = vector.shape_cast %49 : vector<16x16x64xbf16> to vector<256x64xbf16>
    %c4 = arith.constant 4 : index
    %c0_61 = arith.constant 0 : index
    %c0_62 = arith.constant 0 : index
    %51 = vector.load %arg2[%c4, %c0_61, %c0_62] : memref<9x64x64xbf16, #tpu.memory_space<vmem>>, vector<1x64x64xbf16>
    %52 = vector.shape_cast %51 : vector<1x64x64xbf16> to vector<64x64xbf16>
    %cst_63 = arith.constant dense<0.000000e+00> : vector<256x64xf32>
    %53 = tpu.matmul %50, %52, %cst_63 {dimension_numbers = #tpu.dot_dimension_numbers<[1], [0], [0], [1], [0, 0, 1, 1], [], []>} : vector<256x64xbf16>, vector<64x64xbf16>, vector<256x64xf32> -> vector<256x64xf32>
    %54 = arith.addf %48, %53 : vector<256x64xf32>
    %c1_64 = arith.constant 1 : index
    %c2_65 = arith.constant 2 : index
    %c0_66 = arith.constant 0 : index
    %55 = vector.load %arg7[%c1_64, %c2_65, %c0_66] : memref<18x32x64xbf16, #tpu.memory_space<vmem>>, vector<16x16x64xbf16>
    %56 = vector.shape_cast %55 : vector<16x16x64xbf16> to vector<256x64xbf16>
    %c5 = arith.constant 5 : index
    %c0_67 = arith.constant 0 : index
    %c0_68 = arith.constant 0 : index
    %57 = vector.load %arg2[%c5, %c0_67, %c0_68] : memref<9x64x64xbf16, #tpu.memory_space<vmem>>, vector<1x64x64xbf16>
    %58 = vector.shape_cast %57 : vector<1x64x64xbf16> to vector<64x64xbf16>
    %cst_69 = arith.constant dense<0.000000e+00> : vector<256x64xf32>
    %59 = tpu.matmul %56, %58, %cst_69 {dimension_numbers = #tpu.dot_dimension_numbers<[1], [0], [0], [1], [0, 0, 1, 1], [], []>} : vector<256x64xbf16>, vector<64x64xbf16>, vector<256x64xf32> -> vector<256x64xf32>
    %60 = arith.addf %54, %59 : vector<256x64xf32>
    %c2_70 = arith.constant 2 : index
    %c0_71 = arith.constant 0 : index
    %c0_72 = arith.constant 0 : index
    %61 = vector.load %arg7[%c2_70, %c0_71, %c0_72] : memref<18x32x64xbf16, #tpu.memory_space<vmem>>, vector<16x16x64xbf16>
    %62 = vector.shape_cast %61 : vector<16x16x64xbf16> to vector<256x64xbf16>
    %c6 = arith.constant 6 : index
    %c0_73 = arith.constant 0 : index
    %c0_74 = arith.constant 0 : index
    %63 = vector.load %arg2[%c6, %c0_73, %c0_74] : memref<9x64x64xbf16, #tpu.memory_space<vmem>>, vector<1x64x64xbf16>
    %64 = vector.shape_cast %63 : vector<1x64x64xbf16> to vector<64x64xbf16>
    %cst_75 = arith.constant dense<0.000000e+00> : vector<256x64xf32>
    %65 = tpu.matmul %62, %64, %cst_75 {dimension_numbers = #tpu.dot_dimension_numbers<[1], [0], [0], [1], [0, 0, 1, 1], [], []>} : vector<256x64xbf16>, vector<64x64xbf16>, vector<256x64xf32> -> vector<256x64xf32>
    %66 = arith.addf %60, %65 : vector<256x64xf32>
    %c2_76 = arith.constant 2 : index
    %c1_77 = arith.constant 1 : index
    %c0_78 = arith.constant 0 : index
    %67 = vector.load %arg7[%c2_76, %c1_77, %c0_78] : memref<18x32x64xbf16, #tpu.memory_space<vmem>>, vector<16x16x64xbf16>
    %68 = vector.shape_cast %67 : vector<16x16x64xbf16> to vector<256x64xbf16>
    %c7 = arith.constant 7 : index
    %c0_79 = arith.constant 0 : index
    %c0_80 = arith.constant 0 : index
    %69 = vector.load %arg2[%c7, %c0_79, %c0_80] : memref<9x64x64xbf16, #tpu.memory_space<vmem>>, vector<1x64x64xbf16>
    %70 = vector.shape_cast %69 : vector<1x64x64xbf16> to vector<64x64xbf16>
    %cst_81 = arith.constant dense<0.000000e+00> : vector<256x64xf32>
    %71 = tpu.matmul %68, %70, %cst_81 {dimension_numbers = #tpu.dot_dimension_numbers<[1], [0], [0], [1], [0, 0, 1, 1], [], []>} : vector<256x64xbf16>, vector<64x64xbf16>, vector<256x64xf32> -> vector<256x64xf32>
    %72 = arith.addf %66, %71 : vector<256x64xf32>
    %c2_82 = arith.constant 2 : index
    %c2_83 = arith.constant 2 : index
    %c0_84 = arith.constant 0 : index
    %73 = vector.load %arg7[%c2_82, %c2_83, %c0_84] : memref<18x32x64xbf16, #tpu.memory_space<vmem>>, vector<16x16x64xbf16>
    %74 = vector.shape_cast %73 : vector<16x16x64xbf16> to vector<256x64xbf16>
    %c8 = arith.constant 8 : index
    %c0_85 = arith.constant 0 : index
    %c0_86 = arith.constant 0 : index
    %75 = vector.load %arg2[%c8, %c0_85, %c0_86] : memref<9x64x64xbf16, #tpu.memory_space<vmem>>, vector<1x64x64xbf16>
    %76 = vector.shape_cast %75 : vector<1x64x64xbf16> to vector<64x64xbf16>
    %cst_87 = arith.constant dense<0.000000e+00> : vector<256x64xf32>
    %77 = tpu.matmul %74, %76, %cst_87 {dimension_numbers = #tpu.dot_dimension_numbers<[1], [0], [0], [1], [0, 0, 1, 1], [], []>} : vector<256x64xbf16>, vector<64x64xbf16>, vector<256x64xf32> -> vector<256x64xf32>
    %78 = arith.addf %72, %77 : vector<256x64xf32>
    %c0_88 = arith.constant 0 : index
    %c0_89 = arith.constant 0 : index
    %79 = vector.load %arg3[%c0_88, %c0_89] : memref<1x64xf32, #tpu.memory_space<vmem>>, vector<1x64xf32>
    %80 = vector.broadcast %79 : vector<1x64xf32> to vector<256x64xf32>
    %81 = arith.addf %78, %80 : vector<256x64xf32>
    %cst_90 = arith.constant 0.000000e+00 : f32
    %82 = vector.broadcast %cst_90 : f32 to vector<256x64xf32>
    %83 = arith.maximumf %81, %82 : vector<256x64xf32>
    %84 = vector.shape_cast %83 : vector<256x64xf32> to vector<16x16x64xf32>
    %85 = arith.truncf %84 : vector<16x16x64xf32> to vector<16x16x64xbf16>
    %c1_91 = arith.constant 1 : index
    %c1_92 = arith.constant 1 : index
    %c0_93 = arith.constant 0 : index
    %86 = vector.load %arg8[%c1_91, %c1_92, %c0_93] : memref<18x32x64xbf16, #tpu.memory_space<vmem>>, vector<16x16x64xbf16>
    tpu.vector_store %arg8[%c1_91, %c1_92, %c0_93], %85 {strides = array<i32>} : memref<18x32x64xbf16, #tpu.memory_space<vmem>>, vector<16x16x64xbf16>,
    %cst_94 = arith.constant 0.000000e+00 : f32
    %87 = vector.broadcast %cst_94 : f32 to vector<256x64xf32>
    %c0_95 = arith.constant 0 : index
    %c0_96 = arith.constant 0 : index
    %c0_97 = arith.constant 0 : index
    %88 = vector.load %arg8[%c0_95, %c0_96, %c0_97] : memref<18x32x64xbf16, #tpu.memory_space<vmem>>, vector<16x16x64xbf16>
    %89 = vector.shape_cast %88 : vector<16x16x64xbf16> to vector<256x64xbf16>
    %c0_98 = arith.constant 0 : index
    %c0_99 = arith.constant 0 : index
    %c0_100 = arith.constant 0 : index
    %90 = vector.load %arg4[%c0_98, %c0_99, %c0_100] : memref<9x64x64xbf16, #tpu.memory_space<vmem>>, vector<1x64x64xbf16>
    %91 = vector.shape_cast %90 : vector<1x64x64xbf16> to vector<64x64xbf16>
    %cst_101 = arith.constant dense<0.000000e+00> : vector<256x64xf32>
    %92 = tpu.matmul %89, %91, %cst_101 {dimension_numbers = #tpu.dot_dimension_numbers<[1], [0], [0], [1], [0, 0, 1, 1], [], []>} : vector<256x64xbf16>, vector<64x64xbf16>, vector<256x64xf32> -> vector<256x64xf32>
    %93 = arith.addf %87, %92 : vector<256x64xf32>
    %c0_102 = arith.constant 0 : index
    %c1_103 = arith.constant 1 : index
    %c0_104 = arith.constant 0 : index
    %94 = vector.load %arg8[%c0_102, %c1_103, %c0_104] : memref<18x32x64xbf16, #tpu.memory_space<vmem>>, vector<16x16x64xbf16>
    %95 = vector.shape_cast %94 : vector<16x16x64xbf16> to vector<256x64xbf16>
    %c1_105 = arith.constant 1 : index
    %c0_106 = arith.constant 0 : index
    %c0_107 = arith.constant 0 : index
    %96 = vector.load %arg4[%c1_105, %c0_106, %c0_107] : memref<9x64x64xbf16, #tpu.memory_space<vmem>>, vector<1x64x64xbf16>
    %97 = vector.shape_cast %96 : vector<1x64x64xbf16> to vector<64x64xbf16>
    %cst_108 = arith.constant dense<0.000000e+00> : vector<256x64xf32>
    %98 = tpu.matmul %95, %97, %cst_108 {dimension_numbers = #tpu.dot_dimension_numbers<[1], [0], [0], [1], [0, 0, 1, 1], [], []>} : vector<256x64xbf16>, vector<64x64xbf16>, vector<256x64xf32> -> vector<256x64xf32>
    %99 = arith.addf %93, %98 : vector<256x64xf32>
    %c0_109 = arith.constant 0 : index
    %c2_110 = arith.constant 2 : index
    %c0_111 = arith.constant 0 : index
    %100 = vector.load %arg8[%c0_109, %c2_110, %c0_111] : memref<18x32x64xbf16, #tpu.memory_space<vmem>>, vector<16x16x64xbf16>
    %101 = vector.shape_cast %100 : vector<16x16x64xbf16> to vector<256x64xbf16>
    %c2_112 = arith.constant 2 : index
    %c0_113 = arith.constant 0 : index
    %c0_114 = arith.constant 0 : index
    %102 = vector.load %arg4[%c2_112, %c0_113, %c0_114] : memref<9x64x64xbf16, #tpu.memory_space<vmem>>, vector<1x64x64xbf16>
    %103 = vector.shape_cast %102 : vector<1x64x64xbf16> to vector<64x64xbf16>
    %cst_115 = arith.constant dense<0.000000e+00> : vector<256x64xf32>
    %104 = tpu.matmul %101, %103, %cst_115 {dimension_numbers = #tpu.dot_dimension_numbers<[1], [0], [0], [1], [0, 0, 1, 1], [], []>} : vector<256x64xbf16>, vector<64x64xbf16>, vector<256x64xf32> -> vector<256x64xf32>
    %105 = arith.addf %99, %104 : vector<256x64xf32>
    %c1_116 = arith.constant 1 : index
    %c0_117 = arith.constant 0 : index
    %c0_118 = arith.constant 0 : index
    %106 = vector.load %arg8[%c1_116, %c0_117, %c0_118] : memref<18x32x64xbf16, #tpu.memory_space<vmem>>, vector<16x16x64xbf16>
    %107 = vector.shape_cast %106 : vector<16x16x64xbf16> to vector<256x64xbf16>
    %c3_119 = arith.constant 3 : index
    %c0_120 = arith.constant 0 : index
    %c0_121 = arith.constant 0 : index
    %108 = vector.load %arg4[%c3_119, %c0_120, %c0_121] : memref<9x64x64xbf16, #tpu.memory_space<vmem>>, vector<1x64x64xbf16>
    %109 = vector.shape_cast %108 : vector<1x64x64xbf16> to vector<64x64xbf16>
    %cst_122 = arith.constant dense<0.000000e+00> : vector<256x64xf32>
    %110 = tpu.matmul %107, %109, %cst_122 {dimension_numbers = #tpu.dot_dimension_numbers<[1], [0], [0], [1], [0, 0, 1, 1], [], []>} : vector<256x64xbf16>, vector<64x64xbf16>, vector<256x64xf32> -> vector<256x64xf32>
    %111 = arith.addf %105, %110 : vector<256x64xf32>
    %c1_123 = arith.constant 1 : index
    %c1_124 = arith.constant 1 : index
    %c0_125 = arith.constant 0 : index
    %112 = vector.load %arg8[%c1_123, %c1_124, %c0_125] : memref<18x32x64xbf16, #tpu.memory_space<vmem>>, vector<16x16x64xbf16>
    %113 = vector.shape_cast %112 : vector<16x16x64xbf16> to vector<256x64xbf16>
    %c4_126 = arith.constant 4 : index
    %c0_127 = arith.constant 0 : index
    %c0_128 = arith.constant 0 : index
    %114 = vector.load %arg4[%c4_126, %c0_127, %c0_128] : memref<9x64x64xbf16, #tpu.memory_space<vmem>>, vector<1x64x64xbf16>
    %115 = vector.shape_cast %114 : vector<1x64x64xbf16> to vector<64x64xbf16>
    %cst_129 = arith.constant dense<0.000000e+00> : vector<256x64xf32>
    %116 = tpu.matmul %113, %115, %cst_129 {dimension_numbers = #tpu.dot_dimension_numbers<[1], [0], [0], [1], [0, 0, 1, 1], [], []>} : vector<256x64xbf16>, vector<64x64xbf16>, vector<256x64xf32> -> vector<256x64xf32>
    %117 = arith.addf %111, %116 : vector<256x64xf32>
    %c1_130 = arith.constant 1 : index
    %c2_131 = arith.constant 2 : index
    %c0_132 = arith.constant 0 : index
    %118 = vector.load %arg8[%c1_130, %c2_131, %c0_132] : memref<18x32x64xbf16, #tpu.memory_space<vmem>>, vector<16x16x64xbf16>
    %119 = vector.shape_cast %118 : vector<16x16x64xbf16> to vector<256x64xbf16>
    %c5_133 = arith.constant 5 : index
    %c0_134 = arith.constant 0 : index
    %c0_135 = arith.constant 0 : index
    %120 = vector.load %arg4[%c5_133, %c0_134, %c0_135] : memref<9x64x64xbf16, #tpu.memory_space<vmem>>, vector<1x64x64xbf16>
    %121 = vector.shape_cast %120 : vector<1x64x64xbf16> to vector<64x64xbf16>
    %cst_136 = arith.constant dense<0.000000e+00> : vector<256x64xf32>
    %122 = tpu.matmul %119, %121, %cst_136 {dimension_numbers = #tpu.dot_dimension_numbers<[1], [0], [0], [1], [0, 0, 1, 1], [], []>} : vector<256x64xbf16>, vector<64x64xbf16>, vector<256x64xf32> -> vector<256x64xf32>
    %123 = arith.addf %117, %122 : vector<256x64xf32>
    %c2_137 = arith.constant 2 : index
    %c0_138 = arith.constant 0 : index
    %c0_139 = arith.constant 0 : index
    %124 = vector.load %arg8[%c2_137, %c0_138, %c0_139] : memref<18x32x64xbf16, #tpu.memory_space<vmem>>, vector<16x16x64xbf16>
    %125 = vector.shape_cast %124 : vector<16x16x64xbf16> to vector<256x64xbf16>
    %c6_140 = arith.constant 6 : index
    %c0_141 = arith.constant 0 : index
    %c0_142 = arith.constant 0 : index
    %126 = vector.load %arg4[%c6_140, %c0_141, %c0_142] : memref<9x64x64xbf16, #tpu.memory_space<vmem>>, vector<1x64x64xbf16>
    %127 = vector.shape_cast %126 : vector<1x64x64xbf16> to vector<64x64xbf16>
    %cst_143 = arith.constant dense<0.000000e+00> : vector<256x64xf32>
    %128 = tpu.matmul %125, %127, %cst_143 {dimension_numbers = #tpu.dot_dimension_numbers<[1], [0], [0], [1], [0, 0, 1, 1], [], []>} : vector<256x64xbf16>, vector<64x64xbf16>, vector<256x64xf32> -> vector<256x64xf32>
    %129 = arith.addf %123, %128 : vector<256x64xf32>
    %c2_144 = arith.constant 2 : index
    %c1_145 = arith.constant 1 : index
    %c0_146 = arith.constant 0 : index
    %130 = vector.load %arg8[%c2_144, %c1_145, %c0_146] : memref<18x32x64xbf16, #tpu.memory_space<vmem>>, vector<16x16x64xbf16>
    %131 = vector.shape_cast %130 : vector<16x16x64xbf16> to vector<256x64xbf16>
    %c7_147 = arith.constant 7 : index
    %c0_148 = arith.constant 0 : index
    %c0_149 = arith.constant 0 : index
    %132 = vector.load %arg4[%c7_147, %c0_148, %c0_149] : memref<9x64x64xbf16, #tpu.memory_space<vmem>>, vector<1x64x64xbf16>
    %133 = vector.shape_cast %132 : vector<1x64x64xbf16> to vector<64x64xbf16>
    %cst_150 = arith.constant dense<0.000000e+00> : vector<256x64xf32>
    %134 = tpu.matmul %131, %133, %cst_150 {dimension_numbers = #tpu.dot_dimension_numbers<[1], [0], [0], [1], [0, 0, 1, 1], [], []>} : vector<256x64xbf16>, vector<64x64xbf16>, vector<256x64xf32> -> vector<256x64xf32>
    %135 = arith.addf %129, %134 : vector<256x64xf32>
    %c2_151 = arith.constant 2 : index
    %c2_152 = arith.constant 2 : index
    %c0_153 = arith.constant 0 : index
    %136 = vector.load %arg8[%c2_151, %c2_152, %c0_153] : memref<18x32x64xbf16, #tpu.memory_space<vmem>>, vector<16x16x64xbf16>
    %137 = vector.shape_cast %136 : vector<16x16x64xbf16> to vector<256x64xbf16>
    %c8_154 = arith.constant 8 : index
    %c0_155 = arith.constant 0 : index
    %c0_156 = arith.constant 0 : index
    %138 = vector.load %arg4[%c8_154, %c0_155, %c0_156] : memref<9x64x64xbf16, #tpu.memory_space<vmem>>, vector<1x64x64xbf16>
    %139 = vector.shape_cast %138 : vector<1x64x64xbf16> to vector<64x64xbf16>
    %cst_157 = arith.constant dense<0.000000e+00> : vector<256x64xf32>
    %140 = tpu.matmul %137, %139, %cst_157 {dimension_numbers = #tpu.dot_dimension_numbers<[1], [0], [0], [1], [0, 0, 1, 1], [], []>} : vector<256x64xbf16>, vector<64x64xbf16>, vector<256x64xf32> -> vector<256x64xf32>
    %141 = arith.addf %135, %140 : vector<256x64xf32>
    %c0_158 = arith.constant 0 : index
    %c0_159 = arith.constant 0 : index
    %142 = vector.load %arg5[%c0_158, %c0_159] : memref<1x64xf32, #tpu.memory_space<vmem>>, vector<1x64xf32>
    %143 = vector.broadcast %142 : vector<1x64xf32> to vector<256x64xf32>
    %144 = arith.addf %141, %143 : vector<256x64xf32>
    %c0_160 = arith.constant 0 : index
    %c0_161 = arith.constant 0 : index
    %c0_162 = arith.constant 0 : index
    %c0_163 = arith.constant 0 : index
    %145 = vector.load %arg1[%c0_160, %c0_161, %c0_162, %c0_163] : memref<1x16x16x64xf32, #tpu.memory_space<vmem>>, vector<1x16x16x64xf32>
    %146 = vector.shape_cast %145 : vector<1x16x16x64xf32> to vector<16x16x64xf32>
    %147 = vector.shape_cast %146 : vector<16x16x64xf32> to vector<256x64xf32>
    %148 = arith.addf %144, %147 : vector<256x64xf32>
    %cst_164 = arith.constant 0.000000e+00 : f32
    %149 = vector.broadcast %cst_164 : f32 to vector<256x64xf32>
    %150 = arith.maximumf %148, %149 : vector<256x64xf32>
    %151 = vector.shape_cast %150 : vector<256x64xf32> to vector<16x16x64xf32>
    %c0_165 = arith.constant 0 : index
    %c0_166 = arith.constant 0 : index
    %c0_167 = arith.constant 0 : index
    %c0_168 = arith.constant 0 : index
    %152 = vector.load %arg6[%c0_165, %c0_166, %c0_167, %c0_168] : memref<1x16x16x64xf32, #tpu.memory_space<vmem>>, vector<1x16x16x64xf32>
    %153 = vector.shape_cast %152 : vector<1x16x16x64xf32> to vector<16x16x64xf32>
    %154 = vector.shape_cast %151 : vector<16x16x64xf32> to vector<1x16x16x64xf32>
    tpu.vector_store %arg6[%c0_165, %c0_166, %c0_167, %c0_168], %154 {strides = array<i32>} : memref<1x16x16x64xf32, #tpu.memory_space<vmem>>, vector<1x16x16x64xf32>,
    return
  }
  func.func @transform_0(%arg0: i32) -> (i32, i32, i32, i32) {
    %c0_i32 = arith.constant 0 : i32
    %c0_i32_0 = arith.constant 0 : i32
    %c0_i32_1 = arith.constant 0 : i32
    %c0_i32_2 = arith.constant 0 : i32
    return %arg0, %c0_i32, %c0_i32_0, %c0_i32_1 : i32, i32, i32, i32
  }
  func.func @transform_1(%arg0: i32) -> (i32, i32, i32) {
    %c0_i32 = arith.constant 0 : i32
    %c0_i32_0 = arith.constant 0 : i32
    %c0_i32_1 = arith.constant 0 : i32
    %c0_i32_2 = arith.constant 0 : i32
    return %c0_i32, %c0_i32_0, %c0_i32_1 : i32, i32, i32
  }
  func.func @transform_2(%arg0: i32) -> (i32, i32) {
    %c0_i32 = arith.constant 0 : i32
    %c0_i32_0 = arith.constant 0 : i32
    %c0_i32_1 = arith.constant 0 : i32
    return %c0_i32, %c0_i32_0 : i32, i32
  }
  func.func @transform_3(%arg0: i32) -> (i32, i32, i32) {
    %c0_i32 = arith.constant 0 : i32
    %c0_i32_0 = arith.constant 0 : i32
    %c0_i32_1 = arith.constant 0 : i32
    %c0_i32_2 = arith.constant 0 : i32
    return %c0_i32, %c0_i32_0, %c0_i32_1 : i32, i32, i32
  }
  func.func @transform_4(%arg0: i32) -> (i32, i32) {
    %c0_i32 = arith.constant 0 : i32
    %c0_i32_0 = arith.constant 0 : i32
    %c0_i32_1 = arith.constant 0 : i32
    return %c0_i32, %c0_i32_0 : i32, i32
  }
  func.func @transform_5(%arg0: i32) -> (i32, i32, i32, i32) {
    %c0_i32 = arith.constant 0 : i32
    %c0_i32_0 = arith.constant 0 : i32
    %c0_i32_1 = arith.constant 0 : i32
    %c0_i32_2 = arith.constant 0 : i32
    return %arg0, %c0_i32, %c0_i32_0, %c0_i32_1 : i32, i32, i32, i32
  }
}

</mosaic_0001>

<bundles_post_ra>
// kernel: basic_block_forward.1
= control target key start
LH: loop header
LB: loop body
LE: loop exit
PB: predicated region body
PF: predicated region fallthrough
CT: control target
= control target key end

     0   :  { %10 = vsyncpa [#allocation5], 0  ;;  %s12580_s0 = inlined_call_operand.hbm [shape: f32[2,16,16,64], index: 0, kind: input, shape index: {}]   ;;  %s12581_s1 = inlined_call_operand.hbm [shape: bf16[9,64,64], index: 1, kind: input, shape index: {}]   ;;  %s12582_s2 = inlined_call_operand.vmem [shape: f32[1,64], index: 2, kind: input, shape index: {}]   ;;  %s12583_s3 = inlined_call_operand.hbm [shape: bf16[9,64,64], index: 3, kind: input, shape index: {}]   ;;  %s12584_s4 = inlined_call_operand.vmem [shape: f32[1,64], index: 4, kind: input, shape index: {}]   ;;  %s12585_s5 = inlined_call_operand.hbm [shape: f32[2,16,16,64], index: 5, kind: output, shape index: {}]  }
   0x1   :  { %12 = vsyncpa [#allocation5 + $0x1], 0 }
   0x2   :  { %13 = vsyncpa [#allocation8], 0 }
   0x3   :  { %14 = vsyncpa [#allocation6], 0 }
   0x4   :  { %16 = vsyncpa [#allocation6 + $0x1], 0  ;;  %s10456_s18 = smov 0   ;;  %s10458_s19 = smov 0  }
   0x5   :  { %s10460_s20 = smov 0   ;;  %s10462_s21 = smov 0  }
   0x6 LB: > { %s10477_s22 = sadd.s32 4294967295, %s10413_s21   ;;  %s8131_s23 = sadd.s32 4294967294, %s10413_s21   ;;  %s10413_s21 = sphi %s10462_s21, %s12611_s21   ;;  %s10409_s20 = sphi %s10460_s20, %s12610_s20   ;;  %s10405_s19 = sphi %s10458_s19, %s12609_s19   ;;  %s10401_s18 = sphi %s10456_s18, %s12608_s18  }
   0x7   : > { %p42_p0 = scmp.ne.s32.totalorder %s10405_s19, %s10401_s18  ;;  %p12586_p1 = scmp.eq.s32.totalorder %s10477_s22, 0 }
   0x8   : > { %p156_p3 = scmp.eq.s32.totalorder %s8131_s23, 1  ;;  %p8132_p5 = scmp.ge.s32.totalorder %s10413_s21, 1 }
   0x9   : > { %p10486_p4 = por %p12586_p1, %p42_p0  ;;  %p163_p7 = scmp.lt.s32.totalorder %s10413_s21, 3 }
   0xa   : > { %p10491_p6 = por %p156_p3, %p42_p0  ;;  %s10415_s27 = smov [#allocation7]  }
   0xb   : > { %s12589_s24 = scalar_select %p10486_p4, 1, 0 }
   0xc   : > { %s12590_s25 = scalar_select %p10491_p6, 1, 0 }
   0xd   : > { %p10496_p8 = pnand %p8132_p5, %p163_p7  ;;  %s175_s28 = sshll.u32 %s10415_s27, 4  ;;  %s10500_s28 = int_to_ptr.vmem [resolvable:$true] %s175_s28 }
   0xe   : > { %s10416_s30 = smov [#allocation9]   ;;  %s10257_s9 = scalar_lea.hbm %s12581_s1, 4608 }
   0xf   : > { %p10117_p9 = pneg %p10496_p8  ;;  %s191_s6 = sshll.u32 %s10416_s30, 4  ;;  %s10511_s6 = int_to_ptr.vmem [resolvable:$true] %s191_s6 }
  0x10   : > { %p10258_p12 = scmp.ne.s32.totalorder %s12581_s1, %s10257_s9  ;;  %p10264_p5 = scmp.lt.u32.totalorder %s10257_s9, %s12581_s1 }
  0x11   : > { %p10507_p11 = pnand %p10117_p9, %p12586_p1 }
  0x13   : > { %p10259_p13 = pneg %p10507_p11 }
  0x15   : > { %p10260_p0 = pnand %p10259_p13, %p10258_p12 }
  0x17   : > { %p10261_p3 = pneg %p10260_p0 }
  0x19   : > { %p10266_p7 = pnand %p10264_p5, %p10261_p3 }
  0x1b   : > { %10269 = shalt.err (!%p10266_p7)
}
  0x1c   : > { %s10270_s14 = scalar_lea.vmem %s10500_s28, 4608  ;;  %p10278_p2 = scmp.lt.s32.totalorder %s10500_s28, %s10500_s28 }
  0x1d   : > { %p10271_p9 = scmp.ne.s32.totalorder %s10500_s28, %s10270_s14  ;;  %p10279_p12 = scmp.lt.s32.totalorder %s10270_s14, %s10270_s14 }
  0x1f   : > { %p10273_p10 = pnand %p10271_p9, %p10259_p13  ;;  %p10280_p0 = por %p10279_p12, %p10278_p2 }
  0x21   : > { %p10274_p1 = pneg %p10273_p10 }
  0x23   : > { %p10281_p6 = pnand %p10280_p0, %p10274_p1 }
  0x25   : > { %10284 = shalt.err (!%p10281_p6)
}
  0x26   : > { %s10417_s15 = smov 64   ;;  %s10418_s16 = smov 4  }
  0x27   : > { %10120 = dma.hbm_to_vmem [thread:$0]  (!%p10507_p11), %s12581_s1, 4608, %s10500_s28, [#allocation8], %s10417_s15, %s10417_s15, %s10418_s16  }
  0x28   : > { %s10285_s7 = scalar_lea.hbm %s12583_s3, 4608 }
  0x29   : > { %p10286_p2 = scmp.ne.s32.totalorder %s12583_s3, %s10285_s7  ;;  %p10292_p10 = scmp.lt.u32.totalorder %s10285_s7, %s12583_s3 }
  0x2b   : > { %p10288_p1 = pnand %p10286_p2, %p10259_p13 }
  0x2d   : > { %p10289_p6 = pneg %p10288_p1 }
  0x2f   : > { %p10294_p3 = pnand %p10292_p10, %p10289_p6 }
  0x31   : > { %10297 = shalt.err (!%p10294_p3)
}
  0x32   : > { %s10298_s28 = scalar_lea.vmem %s10511_s6, 4608  ;;  %p10306_p12 = scmp.lt.s32.totalorder %s10511_s6, %s10511_s6 }
  0x33   : > { %p10299_p5 = scmp.ne.s32.totalorder %s10511_s6, %s10298_s28  ;;  %p10307_p0 = scmp.lt.s32.totalorder %s10298_s28, %s10298_s28 }
  0x35   : > { %p10301_p7 = pnand %p10299_p5, %p10259_p13  ;;  %p10308_p2 = por %p10307_p0, %p10306_p12 }
  0x37   : > { %p10302_p9 = pneg %p10301_p7 }
  0x39   : > { %p10309_p1 = pnand %p10308_p2, %p10302_p9 }
  0x3b   : > { %10312 = shalt.err (!%p10309_p1)
}
  0x3c   : > { %10123 = dma.hbm_to_vmem [thread:$0]  (!%p10507_p11), %s12583_s3, 4608, %s10511_s6, [#allocation8], %s10417_s15, %s10417_s15, %s10418_s16  }
  0x3d   : > { %s10566_s14 = sadd.s32 1, %s10413_s21   ;;  %s29_s29 = sadd.s32 1, %s10409_s20 }
  0x3e   : > { %s26_s17 = ssub.s32 %s10413_s21, %s10566_s14  ;;  %p36_p13 = scmp.ne.s32.totalorder %s10409_s20, %s10405_s19 }
  0x3f   : > { %p27_p6 = scmp.eq.s32.totalorder %s26_s17, 0  ;;  %p37_p10 = scmp.eq.s32.totalorder %s10413_s21, 0 }
  0x40   : > { %p12593_p3 = scmp.eq.s32.totalorder %s10477_s22, 1  ;;  %p10134_p7 = scmp.lt.s32.totalorder %s10413_s21, 2 }
  0x41   : > { %s10582_s27 = scalar_select %p27_p6, %s10409_s20, %s29_s29  }
  0x42   : > { %p10576_p5 = por %p12593_p3, %p36_p13  ;;  %p38_p9 = por %p37_p10, %p36_p13 }
  0x43   : > { %s208_s30 = sand.u32 1, %s10409_s20   ;;  %s8511_s6 = sshll.u32 %s10413_s21, 12 }
  0x44   : > { %s12594_s23 = scalar_select %p10576_p5, 1, 0 }
  0x45   : > { %s8136_s7 = sshll.u32 %s208_s30, 8  ;;  %s10589_s8 = scalar_lea.hbm %s12580_s0, %s8511_s6 }
  0x46   : > { %s212_s9 = scalar_lea.vmem [#allocation4], %s8136_s7  ;;  %p10593_p11 = pnand %p10134_p7, %p38_p9 }
  0x47   : > { %s219_s10 = sshll.u32 %s212_s9, 4  ;;  %s10597_s28 = scalar_lea.sflag [#allocation5], %s208_s30  ;;  %s10591_s10 = int_to_ptr.vmem [resolvable:$true] %s219_s10 }
  0x48   : > { %s10313_s12 = scalar_lea.hbm %s10589_s8, 4096  ;;  %p10315_p0 = pneg %p10593_p11 }
  0x49   : > { %p10314_p12 = scmp.ne.s32.totalorder %s10589_s8, %s10313_s12  ;;  %s10318_s17 = scalar_lea.hbm %s12580_s0, 8192 }
  0x4a   : > { %p10319_p13 = scmp.lt.u32.totalorder %s10589_s8, %s12580_s0  ;;  %p10320_p6 = scmp.lt.u32.totalorder %s10318_s17, %s10313_s12 }
  0x4b   : > { %p10316_p2 = pnand %p10315_p0, %p10314_p12  ;;  %p10322_p3 = scmp.lt.u32.totalorder %s10313_s12, %s10589_s8 }
  0x4c   : > { %p10321_p10 = por %p10320_p6, %p10319_p13 }
  0x4d   : > { %p10317_p1 = pneg %p10316_p2 }
  0x4e   : > { %p10323_p7 = por %p10322_p3, %p10321_p10 }
  0x50   : > { %p10324_p9 = pnand %p10323_p7, %p10317_p1 }
  0x52   : > { %10327 = shalt.err (!%p10324_p9)
}
  0x53   : > { %s10328_s30 = scalar_lea.vmem %s10591_s10, 4096  ;;  %s10419_s15 = smov [#allocation4]  }
  0x54   : > { %p10329_p12 = scmp.ne.s32.totalorder %s10591_s10, %s10328_s30  ;;  %s10333_s16 = sshll.u32 %s10419_s15, 4  ;;  %s10334_s16 = int_to_ptr.vmem [resolvable:$false] %s10333_s16 }
  0x55   : > { %s10335_s9 = scalar_lea.vmem %s10334_s16, 8192  ;;  %p10336_p4 = scmp.lt.s32.totalorder %s10591_s10, %s10334_s16 }
  0x56   : > { %p10331_p2 = pnand %p10329_p12, %p10315_p0  ;;  %p10337_p13 = scmp.lt.s32.totalorder %s10335_s9, %s10328_s30 }
  0x58   : > { %p10332_p5 = pneg %p10331_p2  ;;  %p10338_p6 = por %p10337_p13, %p10336_p4 }
  0x5a   : > { %p10339_p10 = pnand %p10338_p6, %p10332_p5 }
  0x5c   : > { %10342 = shalt.err (!%p10339_p10)
}
  0x5d   : > { %s10420_s12 = smov 128   ;;  %s10421_s13 = smov 8  }
  0x5e   : > { %10127 = dma.hbm_to_vmem [thread:$0]  (!%p10593_p11), %s10589_s8, 4096, %s10591_s10, %s10597_s28, %s10420_s12, %s10420_s12, %s10421_s13  }
  0x5f   : > { %231 = sbr.rel (%p10496_p8) target bundleno = 1705 (0x6a9), region = 40  ;;  %s10628_s29 = sand.u32 (!%p10496_p8), 1, %s10405_s19  }
  0x60   : > { %s8140_s17 = sshll.u32 (!%p10496_p8), %s10628_s29, 8  ;;  %s234_s7 = scalar_lea.sflag (!%p10496_p8), [#allocation5], %s10628_s29 }
  0x61   : > { %s10634_s6 = scalar_lea.vmem (!%p10496_p8), [#allocation4], %s8140_s17  ;;  %p12596_p4 = scmp.ne.s32.totalorder (!%p10496_p8), %s12589_s24, 0 }
  0x66   : > { %10388 = dma.done.wait (%p12596_p4), %s234_s7, 4096  }
  0x67   : > { %10390 = vsyncadd (%p12596_p4), %s234_s7, 4294963200  ;;  %p12597_p5 = scmp.eq.s32.totalorder %s10477_s22, 0 }
  0x69   : > { %10392 = dma.done.wait (%p12597_p5), [#allocation8], 9216   ;;  %p12598_p8 = pmov %p12597_p5 }
  0x6a   : > { %vm273_vm0 = vcmask 523264   ;;  %v10422_v0 = vmov 0   ;;  %vm281_vm1 = vsmask.f32 256  ;;  %vm280_vm2 = vcmask 516096   ;;  %v10179_v2 = vld [vmem:[#allocation7 + $0x20] sm:$0xff]  }
  0x6b   : > { %10394 = vsyncadd (%p12598_p8), [#allocation8], 4294958080  ;;  %274 = vst.msk [vmem:[#allocation2] sm:$0xff] %vm273_vm0, %v10422_v0  ;;  %vm331_vm4 = vsmask.f32 7938  ;;  %v10180_v3 = vld [vmem:[#allocation7 + $0x28] sm:$0xff]   ;;  %8873 = vmatprep.subr.bf16.mxu0 %v10179_v2 }
  0x6c   : > { %275 = vst.msk [vmem:[#allocation2 + $0x8] sm:$0xff] %vm273_vm0, %v10422_v0  ;;  %277 = vst.msk [vmem:[#allocation2 + $0x110] sm:$0xff] %vm273_vm0, %v10422_v0  ;;  %vm813_vm5 = vsmask.f32 7424  ;;  %8874 = vmatpush3.bf16.msra.mxu0 %v10179_v2  ;;  %v10181_v5 = vld [vmem:[#allocation7 + $0x30] sm:$0xff]   ;;  %v10182_v11 = vld [vmem:[#allocation7 + $0x38] sm:$0xff]  }
  0x6d   : > { %278 = vst.msk [vmem:[#allocation2 + $0x118] sm:$0xff] %vm273_vm0, %v10422_v0  ;;  %381 = vst.msk [vmem:[#allocation3] sm:$0xff] %vm273_vm0, %v10422_v0  ;;  %8875 = vmatprep.subr.bf16.mxu0 %v10180_v3  ;;  %v283_v12 = vld [vmem:[#allocation2 + $0x10] sm:$0x1]  ;;  %v333_v13 = vld [vmem:[#allocation2 + $0x18] sm:$0x1] }
  0x6e   : > { %382 = vst.msk [vmem:[#allocation3 + $0x8] sm:$0xff] %vm273_vm0, %v10422_v0  ;;  %384 = vst.msk [vmem:[#allocation3 + $0x110] sm:$0xff] %vm273_vm0, %v10422_v0  ;;  %v483_v18 = vld [vmem:[%s10634_s6] sm:$0xff]  ;;  %v484_v19 = vld [vmem:[%s10634_s6 + $0x8] sm:$0xff]  ;;  %vm1513_vm8 = vcmask 1046528   ;;  %s12407_s11 = scalar_lea.vmem [#allocation10], %s8140_s17 }
  0x6f   : > { %385 = vst.msk [vmem:[#allocation3 + $0x118] sm:$0xff] %vm273_vm0, %v10422_v0  ;;  %vm10652_vm3 = vmand %vm280_vm2, %vm281_vm1  ;;  %v515_v20 = vpack.c.bf16 %v484_v19, %v483_v18  ;;  %v286_v21 = vld [vmem:[#allocation2 + $0x20] sm:$0x1]  ;;  %v336_v22 = vld [vmem:[#allocation2 + $0x28] sm:$0x1]  ;;  %s8512_s28 = sshll.u32 %s10477_s22, 12 }
  0x70   : > { %vm10657_vm6 = vmand %vm280_vm2, %vm331_vm4  ;;  %8876 = vmatpush3.bf16.msra.mxu0 %v10180_v3  ;;  %v284_v16 = vsel %vm10652_vm3, 0, %v283_v12  ;;  %v485_v23 = vld [vmem:[%s10634_s6 + $0x10] sm:$0xff]  ;;  %v287_v25 = vsel %vm10652_vm3, 0, %v286_v21  ;;  %v486_v27 = vld [vmem:[%s10634_s6 + $0x18] sm:$0xff]  ;;  %s8039_s30 = sshll.u32 %s12407_s11, 4  ;;  %s12528_s9 = scalar_lea.hbm %s12585_s5, %s8512_s28  ;;  %s12530_s30 = int_to_ptr.vmem [resolvable:$true] %s8039_s30 }
  0x71   : > { %v334_v17 = vsel %vm10657_vm6, 0, %v333_v13  ;;  %8877 = vmatprep.subr.bf16.mxu0 %v10181_v5  ;;  %285 = vst [vmem:[#allocation2 + $0x10] sm:$0x1] %v284_v16  ;;  %v337_v26 = vsel %vm10657_vm6, 0, %v336_v22  ;;  %v289_v28 = vld [vmem:[#allocation2 + $0x30] sm:$0x1]  ;;  %v516_v32 = vpack.c.bf16 %v486_v27, %v485_v23  ;;  %vm10693_vm7 = vmand %vm273_vm0, %vm331_vm4 }
  0x72   : > { %v10661_v6 = vld [vmem:[#allocation2] sm:$0xff]  ;;  %335 = vst [vmem:[#allocation2 + $0x18] sm:$0x1] %v334_v17  ;;  %v532_v30 = vshrl.u32 %v515_v20, 16  ;;  %v535_v31 = vshll.u32 %v515_v20, 16  ;;  %v290_v33 = vsel %vm10652_vm3, 0, %v289_v28 }
  0x73   : > { %v797_v7 = vld [vmem:[#allocation2 + $0x8] sm:$0x1]  ;;  %v815_v8 = vshrl.u32 %v10661_v6, 16  ;;  %v817_v9 = vshll.u32 %v10661_v6, 16  ;;  %v487_v29 = vld [vmem:[%s10634_s6 + $0x20] sm:$0xff]  ;;  %v489_v41 = vld [vmem:[%s10634_s6 + $0x30] sm:$0xff] }
  0x74   : > { %v822_v10 = vshll.u32 %v797_v7, 16  ;;  %288 = vst [vmem:[#allocation2 + $0x20] sm:$0x1] %v287_v25  ;;  %338 = vst [vmem:[#allocation2 + $0x28] sm:$0x1] %v337_v26  ;;  %v488_v35 = vld [vmem:[%s10634_s6 + $0x28] sm:$0xff]  ;;  %8878 = vmatpush3.bf16.msra.mxu0 %v10181_v5 }
  0x75   : > { %v819_v14 = vrot.slane %v817_v9, 1  ;;  %v339_v34 = vld [vmem:[#allocation2 + $0x38] sm:$0x1]  ;;  %291 = vst [vmem:[#allocation2 + $0x30] sm:$0x1] %v290_v33  ;;  %v517_v38 = vpack.c.bf16 %v488_v35, %v487_v29  ;;  %8879 = vmatprep.subr.bf16.mxu0 %v10182_v11  ;;  %v10686_v42 = vld [vmem:[#allocation7] sm:$0xff]  }
  0x76   : > { %v824_v15 = vrot.slane %v822_v10, 1  ;;  %v340_v37 = vsel %vm10657_vm6, 0, %v339_v34  ;;  %v292_v39 = vld [vmem:[#allocation2 + $0x40] sm:$0x1]  ;;  %v342_v40 = vld [vmem:[#allocation2 + $0x48] sm:$0x1] }
  0x77   : > { %v820_v24 = vor.u32 %v819_v14, %v815_v8  ;;  %v534_v43 = vrot.slane %v532_v30, 7  ;;  %v539_v44 = vshrl.u32 %v516_v32, 16  ;;  %v542_v45 = vshll.u32 %v516_v32, 16  ;;  %341 = vst [vmem:[#allocation2 + $0x38] sm:$0x1] %v340_v37  ;;  %v490_v47 = vld [vmem:[%s10634_s6 + $0x38] sm:$0xff] }
  0x78   : > { %v293_v46 = vsel %vm10652_vm3, 0, %v292_v39  ;;  %v546_v49 = vshrl.u32 %v517_v38, 16  ;;  %v549_v50 = vshll.u32 %v517_v38, 16  ;;  %v343_v51 = vsel %vm10657_vm6, 0, %v342_v40  ;;  %v491_v53 = vld [vmem:[%s10634_s6 + $0x40] sm:$0xff]  ;;  %v492_v57 = vld [vmem:[%s10634_s6 + $0x48] sm:$0xff]  ;;  %8880 = vmatpush3.bf16.msra.mxu0 %v10182_v11 }
  0x79   : > { %v825_v36 = vsel %vm813_vm5, %v820_v24, %v824_v15  ;;  %294 = vst [vmem:[#allocation2 + $0x40] sm:$0x1] %v293_v46  ;;  %v518_v52 = vpack.c.bf16 %v490_v47, %v489_v41  ;;  %v537_v54 = vor.u32 %v535_v31, %v534_v43  ;;  %v541_v55 = vrot.slane %v539_v44, 7  ;;  %344 = vst [vmem:[#allocation2 + $0x48] sm:$0x1] %v343_v51  ;;  %v677_v58 = vld [vmem:[#allocation2 + $0x10] sm:$0xff] }
  0x7a   : > { %8881 = vmatprep.mubr.msk.bf16.mxu0 %vm273_vm0, %v825_v36  ;;  %v295_v56 = vld [vmem:[#allocation2 + $0x50] sm:$0x1]  ;;  %v680_v59 = vld [vmem:[#allocation2 + $0x18] sm:$0x1]  ;;  %v548_v60 = vrot.slane %v546_v49, 7  ;;  %v519_v63 = vpack.c.bf16 %v492_v57, %v491_v53  ;;  %8913 = vmatprep.subr.bf16.mxu0 %v10686_v42  ;;  %v496_v49 = vld [vmem:[%s10634_s6 + $0x68] sm:$0xff] }
  0x7b   : > { %v553_v61 = vshrl.u32 %v518_v52, 16  ;;  %v556_v62 = vshll.u32 %v518_v52, 16  ;;  %v10704_v0 = vsel %vm10693_vm7, %v537_v54, %v677_v58  ;;  %v681_v2 = vsel %vm10652_vm3, %v534_v43, %v680_v59  ;;  %v345_v7 = vld [vmem:[#allocation2 + $0x58] sm:$0x1]  ;;  %v683_v10 = vld [vmem:[#allocation2 + $0x20] sm:$0xff]  ;;  %v493_v25 = vld [vmem:[%s10634_s6 + $0x50] sm:$0xff] }
  0x7c   : > { %v544_v3 = vor.u32 %v542_v45, %v541_v55  ;;  %v296_v5 = vsel %vm10652_vm3, 0, %v295_v56  ;;  %679 = vst [vmem:[#allocation2 + $0x10] sm:$0xff] %v10704_v0  ;;  %682 = vst [vmem:[#allocation2 + $0x18] sm:$0x1] %v681_v2  ;;  %v827_v8 = vshrl.u32 %v10704_v0, 16  ;;  %v829_v9 = vshll.u32 %v10704_v0, 16 }
  0x7d   : > { %v686_v11 = vld [vmem:[#allocation2 + $0x28] sm:$0x1]  ;;  %v551_v12 = vor.u32 %v549_v50, %v548_v60  ;;  %v555_v13 = vrot.slane %v553_v61, 7  ;;  %297 = vst [vmem:[#allocation2 + $0x50] sm:$0x1] %v296_v5  ;;  %v689_v16 = vld [vmem:[#allocation2 + $0x30] sm:$0xff] }
  0x7e   : > { %v10715_v14 = vsel %vm10693_vm7, %v544_v3, %v683_v10  ;;  %v687_v15 = vsel %vm10652_vm3, %v541_v55, %v686_v11  ;;  %v346_v17 = vsel %vm10657_vm6, 0, %v345_v7  ;;  %v560_v18 = vshrl.u32 %v519_v63, 16  ;;  %v298_v19 = vld [vmem:[#allocation2 + $0x60] sm:$0x1]  ;;  %v692_v23 = vld [vmem:[#allocation2 + $0x38] sm:$0x1] }
  0x7f   : > { %v831_v20 = vrot.slane %v829_v9, 1  ;;  %685 = vst [vmem:[#allocation2 + $0x20] sm:$0xff] %v10715_v14  ;;  %688 = vst [vmem:[#allocation2 + $0x28] sm:$0x1] %v687_v15  ;;  %v841_v21 = vshll.u32 %v10715_v14, 16  ;;  %v10725_v22 = vsel %vm10693_vm7, %v551_v12, %v689_v16  ;;  %v839_v26 = vshrl.u32 %v10715_v14, 16 }
  0x80   : > { %347 = vst [vmem:[#allocation2 + $0x58] sm:$0x1] %v346_v17  ;;  %v348_v24 = vld [vmem:[#allocation2 + $0x68] sm:$0x1]  ;;  %691 = vst [vmem:[#allocation2 + $0x30] sm:$0xff] %v10725_v22  ;;  %v693_v27 = vsel %vm10652_vm3, %v548_v60, %v692_v23  ;;  %v853_v28 = vshll.u32 %v10725_v22, 16  ;;  %v558_v29 = vor.u32 %v556_v62, %v555_v13 }
  0x81   : > { %v695_v30 = vld [vmem:[#allocation2 + $0x40] sm:$0xff]  ;;  %v494_v31 = vld [vmem:[%s10634_s6 + $0x58] sm:$0xff]  ;;  %v301_v32 = vld [vmem:[#allocation2 + $0x70] sm:$0x1]  ;;  %v843_v33 = vrot.slane %v841_v21, 1  ;;  %v851_v34 = vshrl.u32 %v10725_v22, 16  ;;  %v832_v44 = vor.u32 %v831_v20, %v827_v8 }
  0x82   : > { %694 = vst [vmem:[#allocation2 + $0x38] sm:$0x1] %v693_v27  ;;  %v698_v35 = vld [vmem:[#allocation2 + $0x48] sm:$0x1]  ;;  %v562_v36 = vrot.slane %v560_v18, 7  ;;  %v563_v37 = vshll.u32 %v519_v63, 16  ;;  %v10737_v39 = vsel %vm10693_vm7, %v558_v29, %v695_v30  ;;  %v520_v55 = vpack.c.bf16 %v494_v31, %v493_v25 }
  0x83   : > { %v855_v38 = vrot.slane %v853_v28, 1  ;;  %v699_v40 = vsel %vm10652_vm3, %v555_v13, %v698_v35  ;;  %v299_v41 = vsel %vm10652_vm3, 0, %v298_v19  ;;  %v495_v43 = vld [vmem:[%s10634_s6 + $0x60] sm:$0xff]  ;;  %697 = vst [vmem:[#allocation2 + $0x40] sm:$0xff] %v10737_v39  ;;  %v865_v45 = vshll.u32 %v10737_v39, 16  ;;  %v497_v50 = vld [vmem:[%s10634_s6 + $0x70] sm:$0xff] }
  0x84   : > { %700 = vst [vmem:[#allocation2 + $0x48] sm:$0x1] %v699_v40  ;;  %v565_v46 = vor.u32 %v563_v37, %v562_v36  ;;  %300 = vst [vmem:[#allocation2 + $0x60] sm:$0x1] %v299_v41  ;;  %v351_v47 = vld [vmem:[#allocation2 + $0x78] sm:$0x1]  ;;  %v844_v52 = vor.u32 %v843_v33, %v839_v26  ;;  %v521_v9 = vpack.c.bf16 %v496_v49, %v495_v43 }
  0x85   : > { %v10748_v51 = vld [vmem:[#allocation2 + $0x18] sm:$0x1]  ;;  %v701_v53 = vld [vmem:[#allocation2 + $0x50] sm:$0xff]  ;;  %v349_v54 = vsel %vm10657_vm6, 0, %v348_v24  ;;  %v302_v56 = vsel %vm10652_vm3, 0, %v301_v32  ;;  %v863_v59 = vshrl.u32 %v10737_v39, 16  ;;  %v856_v2 = vor.u32 %v855_v38, %v851_v34 }
  0x86   : > { %v498_v57 = vld [vmem:[%s10634_s6 + $0x78] sm:$0xff]  ;;  %v834_v58 = vshll.u32 %v10748_v51, 16  ;;  %v867_v60 = vrot.slane %v865_v45, 1  ;;  %v10759_v61 = vsel %vm10693_vm7, %v565_v46, %v701_v53  ;;  %350 = vst [vmem:[#allocation2 + $0x68] sm:$0x1] %v349_v54  ;;  %v10763_v3 = vld [vmem:[#allocation7 + $0x8] sm:$0xff]  }
  0x87   : > { %303 = vst [vmem:[#allocation2 + $0x70] sm:$0x1] %v302_v56  ;;  %v304_v62 = vld [vmem:[#allocation2 + $0x80] sm:$0x1]  ;;  %v10761_v63 = vld [vmem:[#allocation2 + $0x28] sm:$0x1]  ;;  %v10771_v15 = vpack.c.bf16 %v498_v57, %v497_v50 }
  0x88   : > { %703 = vst [vmem:[#allocation2 + $0x50] sm:$0xff] %v10759_v61  ;;  %v704_v5 = vld [vmem:[#allocation2 + $0x58] sm:$0x1]  ;;  %v875_v7 = vshrl.u32 %v10759_v61, 16  ;;  %v877_v8 = vshll.u32 %v10759_v61, 16  ;;  %v836_v10 = vrot.slane %v834_v58, 1  ;;  %v868_v28 = vor.u32 %v867_v60, %v863_v59 }
  0x89   : > { %v846_v11 = vshll.u32 %v10761_v63, 16  ;;  %v705_v12 = vsel %vm10652_vm3, %v562_v36, %v704_v5  ;;  %v354_v13 = vld [vmem:[#allocation2 + $0x88] sm:$0x1]  ;;  %v10773_v16 = vld [vmem:[#allocation2 + $0x38] sm:$0x1]  ;;  %v567_v18 = vshrl.u32 %v520_v55, 16 }
  0x8a   : > { %706 = vst [vmem:[#allocation2 + $0x58] sm:$0x1] %v705_v12  ;;  %v879_v17 = vrot.slane %v877_v8, 1  ;;  %v570_v19 = vshll.u32 %v520_v55, 16  ;;  %v352_v20 = vsel %vm10657_vm6, 0, %v351_v47  ;;  %v837_v21 = vsel %vm813_vm5, %v832_v44, %v836_v10  ;;  %v10784_v32 = vld [vmem:[#allocation7 + $0x10] sm:$0xff]  }
  0x8b   : > { %v848_v23 = vrot.slane %v846_v11, 1  ;;  %v858_v24 = vshll.u32 %v10773_v16, 16  ;;  %353 = vst [vmem:[#allocation2 + $0x78] sm:$0x1] %v352_v20  ;;  %v574_v25 = vshrl.u32 %v521_v9, 16  ;;  %8882 = vmatmul.mubr.msk.bf16.vlgmr.msra.gmra.mrb[0].mxu0 %vm273_vm0, %v837_v21  ;;  %v569_v29 = vrot.slane %v567_v18, 7 }
  0x8c   : > { %v307_v26 = vld [vmem:[#allocation2 + $0x90] sm:$0x1]  ;;  %v10780_v27 = vld [vmem:[#allocation2 + $0x48] sm:$0x1]  ;;  %v577_v30 = vshll.u32 %v521_v9, 16  ;;  %v305_v31 = vsel %vm10652_vm3, 0, %v304_v62  ;;  %8914 = vmatpush3.bf16.msra.mxu0 %v10686_v42  ;;  %v880_v47 = vor.u32 %v879_v17, %v875_v7 }
  0x8d   : > { %v849_v33 = vsel %vm813_vm5, %v844_v52, %v848_v23  ;;  %v860_v34 = vrot.slane %v858_v24, 1  ;;  %v870_v35 = vshll.u32 %v10780_v27, 16  ;;  %v707_v36 = vld [vmem:[#allocation2 + $0x60] sm:$0xff]  ;;  %v576_v37 = vrot.slane %v574_v25, 7  ;;  %306 = vst [vmem:[#allocation2 + $0x80] sm:$0x1] %v305_v31  ;;  %8915 = vmatprep.subr.bf16.mxu0 %v10763_v3 }
  0x8e   : > { %v357_v38 = vld [vmem:[#allocation2 + $0x98] sm:$0x1]  ;;  %8885 = vmatprep.mubr.msk.bf16.mxu0 %vm273_vm0, %v849_v33  ;;  %v572_v40 = vor.u32 %v570_v19, %v569_v29  ;;  %v710_v41 = vld [vmem:[#allocation2 + $0x68] sm:$0x1]  ;;  %v713_v43 = vld [vmem:[#allocation2 + $0x70] sm:$0xff]  ;;  %v355_v42 = vsel %vm10657_vm6, 0, %v354_v13 }
  0x8f   : > { %v581_v44 = vshrl.u32 %v10771_v15, 16  ;;  %v584_v45 = vshll.u32 %v10771_v15, 16  ;;  %v872_v46 = vrot.slane %v870_v35, 1  ;;  %v711_v49 = vsel %vm10652_vm3, %v569_v29, %v710_v41  ;;  %356 = vst [vmem:[#allocation2 + $0x88] sm:$0x1] %v355_v42  ;;  %v499_v52 = vld [vmem:[%s10634_s6 + $0x80] sm:$0xff] }
  0x90   : > { %v579_v50 = vor.u32 %v577_v30, %v576_v37  ;;  %v500_v53 = vld [vmem:[%s10634_s6 + $0x88] sm:$0xff]  ;;  %v10801_v54 = vsel %vm10693_vm7, %v572_v40, %v707_v36  ;;  %712 = vst [vmem:[#allocation2 + $0x68] sm:$0x1] %v711_v49  ;;  %v308_v56 = vsel %vm10652_vm3, 0, %v307_v26  ;;  %v358_v57 = vsel %vm10657_vm6, 0, %v357_v38  ;;  %v501_v59 = vld [vmem:[%s10634_s6 + $0x90] sm:$0xff]  ;;  %8916 = vmatpush3.bf16.msra.mxu0 %v10763_v3 }
  0x91   : > { %v583_v55 = vrot.slane %v581_v44, 7  ;;  %v310_v58 = vld [vmem:[#allocation2 + $0xa0] sm:$0x1]  ;;  %v861_v60 = vsel %vm813_vm5, %v856_v2, %v860_v34  ;;  %v873_v62 = vsel %vm813_vm5, %v868_v28, %v872_v46  ;;  %v10810_v5 = vld [vmem:[#allocation2 + $0x58] sm:$0x1]  ;;  %709 = vst [vmem:[#allocation2 + $0x60] sm:$0xff] %v10801_v54  ;;  %8917 = vmatprep.subr.bf16.mxu0 %v10784_v32  ;;  %v523_v18 = vpack.c.bf16 %v500_v53, %v499_v52 }
  0x92   : > { %v889_v7 = vshll.u32 %v10801_v54, 16  ;;  %v10817_v8 = vsel %vm10693_vm7, %v579_v50, %v713_v43  ;;  %309 = vst [vmem:[#allocation2 + $0x90] sm:$0x1] %v308_v56  ;;  %359 = vst [vmem:[#allocation2 + $0x98] sm:$0x1] %v358_v57  ;;  %v502_v10 = vld [vmem:[%s10634_s6 + $0x98] sm:$0xff] }
  0x93   : > { %v360_v9 = vld [vmem:[#allocation2 + $0xa8] sm:$0x1]  ;;  %v882_v2 = vshll.u32 %v10810_v5, 16  ;;  %v887_v11 = vshrl.u32 %v10801_v54, 16  ;;  %715 = vst [vmem:[#allocation2 + $0x70] sm:$0xff] %v10817_v8  ;;  %v901_v12 = vshll.u32 %v10817_v8, 16  ;;  %v586_v13 = vor.u32 %v584_v45, %v583_v55  ;;  %8886 = vmatmul.mubr.msk.bf16.gmra.mrb[4].mxu0 %vm273_vm0, %v861_v60 }
  0x94   : > { %v716_v3 = vld [vmem:[#allocation2 + $0x78] sm:$0x1]  ;;  %v891_v15 = vrot.slane %v889_v7, 1  ;;  %v311_v19 = vsel %vm10652_vm3, 0, %v310_v58  ;;  %v313_v20 = vld [vmem:[#allocation2 + $0xb0] sm:$0x1]  ;;  %v524_v29 = vpack.c.bf16 %v502_v10, %v501_v59  ;;  %8889 = vmatprep.mubr.msk.bf16.mxu0 %vm273_vm0, %v873_v62  ;;  %8918 = vmatpush3.bf16.msra.mxu0 %v10784_v32 }
  0x95   : > { %v717_v17 = vsel %vm10652_vm3, %v576_v37, %v716_v3  ;;  %v503_v21 = vld [vmem:[%s10634_s6 + $0xa0] sm:$0xff]  ;;  %v10186_v23 = vld [vmem:[#allocation7 + $0x18] sm:$0xff]   ;;  %v884_v24 = vrot.slane %v882_v2, 1  ;;  %v899_v25 = vshrl.u32 %v10817_v8, 16  ;;  %312 = vst [vmem:[#allocation2 + $0xa0] sm:$0x1] %v311_v19 }
  0x96   : > { %718 = vst [vmem:[#allocation2 + $0x78] sm:$0x1] %v717_v17  ;;  %v719_v26 = vld [vmem:[#allocation2 + $0x80] sm:$0xff]  ;;  %v361_v28 = vsel %vm10657_vm6, 0, %v360_v9  ;;  %v363_v30 = vld [vmem:[#allocation2 + $0xb8] sm:$0x1]  ;;  %v892_v38 = vor.u32 %v891_v15, %v887_v11  ;;  %8919 = vmatprep.subr.bf16.mxu0 %v10186_v23 }
  0x97   : > { %v903_v31 = vrot.slane %v901_v12, 1  ;;  %v10837_v33 = vsel %vm10693_vm7, %v586_v13, %v719_v26  ;;  %v588_v34 = vshrl.u32 %v523_v18, 16  ;;  %v591_v35 = vshll.u32 %v523_v18, 16  ;;  %362 = vst [vmem:[#allocation2 + $0xa8] sm:$0x1] %v361_v28  ;;  %v504_v36 = vld [vmem:[%s10634_s6 + $0xa8] sm:$0xff] }
  0x98   : > { %v885_v37 = vsel %vm813_vm5, %v880_v47, %v884_v24  ;;  %721 = vst [vmem:[#allocation2 + $0x80] sm:$0xff] %v10837_v33  ;;  %v722_v40 = vld [vmem:[#allocation2 + $0x88] sm:$0x1]  ;;  %v911_v41 = vshrl.u32 %v10837_v33, 16  ;;  %v913_v43 = vshll.u32 %v10837_v33, 16  ;;  %v595_v49 = vshrl.u32 %v524_v29, 16  ;;  %8920 = vmatpush3.bf16.msra.mxu0 %v10186_v23 }
  0x99   : > { %v316_v42 = vld [vmem:[#allocation2 + $0xc0] sm:$0x1]  ;;  %v366_v44 = vld [vmem:[#allocation2 + $0xc8] sm:$0x1]  ;;  %v723_v32 = vsel %vm10652_vm3, %v583_v55, %v722_v40  ;;  %v590_v46 = vrot.slane %v588_v34, 7  ;;  %v598_v47 = vshll.u32 %v524_v29, 16  ;;  %v525_v58 = vpack.c.bf16 %v504_v36, %v503_v21 }
  0x9a   : > { %v10845_v45 = vld [vmem:[#allocation2 + $0x68] sm:$0x1]  ;;  %724 = vst [vmem:[#allocation2 + $0x88] sm:$0x1] %v723_v32  ;;  %v915_v52 = vrot.slane %v913_v43, 1  ;;  %v725_v53 = vld [vmem:[#allocation2 + $0x90] sm:$0xff]  ;;  %v904_v10 = vor.u32 %v903_v31, %v899_v25 }
  0x9b   : > { %v894_v50 = vshll.u32 %v10845_v45, 16  ;;  %v728_v56 = vld [vmem:[#allocation2 + $0x98] sm:$0x1]  ;;  %v314_v57 = vsel %vm10652_vm3, 0, %v313_v20  ;;  %v593_v59 = vor.u32 %v591_v35, %v590_v46  ;;  %v597_v55 = vrot.slane %v595_v49, 7  ;;  %v505_v7 = vld [vmem:[%s10634_s6 + $0xb0] sm:$0xff]  ;;  %8890 = vmatmul.mubr.msk.bf16.gmra.mrb[8].mxu0 %vm273_vm0, %v885_v37 }
  0x9c   : > { %v729_v60 = vsel %vm10652_vm3, %v590_v46, %v728_v56  ;;  %315 = vst [vmem:[#allocation2 + $0xb0] sm:$0x1] %v314_v57  ;;  %v364_v62 = vsel %vm10657_vm6, 0, %v363_v30  ;;  %v602_v2 = vshrl.u32 %v525_v58, 16  ;;  %v605_v11 = vshll.u32 %v525_v58, 16  ;;  %v506_v3 = vld [vmem:[%s10634_s6 + $0xb8] sm:$0xff] }
  0x9d   : > { %v896_v9 = vrot.slane %v894_v50, 1  ;;  %730 = vst [vmem:[#allocation2 + $0x98] sm:$0x1] %v729_v60  ;;  %365 = vst [vmem:[#allocation2 + $0xb8] sm:$0x1] %v364_v62  ;;  %v10862_v15 = vsel %vm10693_vm7, %v593_v59, %v725_v53  ;;  %v600_v17 = vor.u32 %v598_v47, %v597_v55  ;;  %v731_v18 = vld [vmem:[#allocation2 + $0xa0] sm:$0xff]  ;;  %v10871_v24 = vor.u32 %v915_v52, %v911_v41 }
  0x9e   : > { %v319_v12 = vld [vmem:[#allocation2 + $0xd0] sm:$0x1]  ;;  %v10858_v13 = vld [vmem:[#allocation2 + $0x78] sm:$0x1]  ;;  %v317_v19 = vsel %vm10652_vm3, 0, %v316_v42  ;;  %v367_v20 = vsel %vm10657_vm6, 0, %v366_v44  ;;  %v526_v34 = vpack.c.bf16 %v506_v3, %v505_v7 }
  0x9f   : > { %v897_v21 = vsel %vm813_vm5, %v892_v38, %v896_v9  ;;  %v906_v23 = vshll.u32 %v10858_v13, 16  ;;  %727 = vst [vmem:[#allocation2 + $0x90] sm:$0xff] %v10862_v15  ;;  %v925_v25 = vshll.u32 %v10862_v15, 16  ;;  %v734_v26 = vld [vmem:[#allocation2 + $0xa8] sm:$0x1]  ;;  %v10878_v29 = vsel %vm10693_vm7, %v600_v17, %v731_v18  ;;  %v507_v35 = vld [vmem:[%s10634_s6 + $0xc0] sm:$0xff] }
  0xa0   : > { %318 = vst [vmem:[#allocation2 + $0xc0] sm:$0x1] %v317_v19  ;;  %368 = vst [vmem:[#allocation2 + $0xc8] sm:$0x1] %v367_v20  ;;  %v369_v28 = vld [vmem:[#allocation2 + $0xd8] sm:$0x1]  ;;  %8893 = vmatprep.mubr.msk.bf16.mxu0 %vm273_vm0, %v897_v21  ;;  %v735_v30 = vsel %vm10652_vm3, %v597_v55, %v734_v26 }
  0xa1   : > { %v604_v31 = vrot.slane %v602_v2, 7  ;;  %v508_v36 = vld [vmem:[%s10634_s6 + $0xc8] sm:$0xff]  ;;  %v10884_v37 = vld [vmem:[#allocation7 + $0x40] sm:$0xff]   ;;  %v908_v38 = vrot.slane %v906_v23, 1  ;;  %v923_v40 = vshrl.u32 %v10862_v15, 16  ;;  %v927_v41 = vrot.slane %v925_v25, 1 }
  0xa2   : > { %733 = vst [vmem:[#allocation2 + $0xa0] sm:$0xff] %v10878_v29  ;;  %736 = vst [vmem:[#allocation2 + $0xa8] sm:$0x1] %v735_v30  ;;  %v937_v43 = vshll.u32 %v10878_v29, 16  ;;  %v10889_v42 = vld [vmem:[#allocation2 + $0x88] sm:$0x1]  ;;  %8953 = vmatprep.subr.bf16.mxu0 %v10884_v37  ;;  %v527_v7 = vpack.c.bf16 %v508_v36, %v507_v35 }
  0xa3   : > { %v607_v44 = vor.u32 %v605_v11, %v604_v31  ;;  %v609_v32 = vshrl.u32 %v526_v34, 16  ;;  %v612_v46 = vshll.u32 %v526_v34, 16  ;;  %v320_v49 = vsel %vm10652_vm3, 0, %v319_v12  ;;  %v737_v56 = vld [vmem:[#allocation2 + $0xb0] sm:$0xff]  ;;  %v322_v57 = vld [vmem:[#allocation2 + $0xe0] sm:$0x1] }
  0xa4   : > { %v909_v47 = vsel %vm813_vm5, %v904_v10, %v908_v38  ;;  %v918_v50 = vshll.u32 %v10889_v42, 16  ;;  %v935_v52 = vshrl.u32 %v10878_v29, 16  ;;  %v939_v53 = vrot.slane %v937_v43, 1  ;;  %321 = vst [vmem:[#allocation2 + $0xd0] sm:$0x1] %v320_v49  ;;  %v509_v3 = vld [vmem:[%s10634_s6 + $0xd0] sm:$0xff] }
  0xa5   : > { %v10897_v58 = vld [vmem:[#allocation2 + $0x98] sm:$0x1]  ;;  %v10901_v59 = vsel %vm10693_vm7, %v607_v44, %v737_v56  ;;  %v611_v55 = vrot.slane %v609_v32, 7  ;;  %v370_v62 = vsel %vm10657_vm6, 0, %v369_v28  ;;  %v372_v11 = vld [vmem:[#allocation2 + $0xe8] sm:$0x1]  ;;  %v10910_v12 = vor.u32 %v927_v41, %v923_v40  ;;  %8894 = vmatmul.mubr.msk.bf16.gmra.mrb[12].mxu0 %vm273_vm0, %v909_v47 }
  0xa6   : > { %v740_v60 = vld [vmem:[#allocation2 + $0xb8] sm:$0x1]  ;;  %v920_v9 = vrot.slane %v918_v50, 1  ;;  %v930_v10 = vshll.u32 %v10897_v58, 16  ;;  %739 = vst [vmem:[#allocation2 + $0xb0] sm:$0xff] %v10901_v59  ;;  %v949_v17 = vshll.u32 %v10901_v59, 16  ;;  %v10929_v43 = vor.u32 %v939_v53, %v935_v52 }
  0xa7   : > { %v741_v2 = vsel %vm10652_vm3, %v604_v31, %v740_v60  ;;  %371 = vst [vmem:[#allocation2 + $0xd8] sm:$0x1] %v370_v62  ;;  %v614_v18 = vor.u32 %v612_v46, %v611_v55  ;;  %v743_v19 = vld [vmem:[#allocation2 + $0xc0] sm:$0xff]  ;;  %v746_v20 = vld [vmem:[#allocation2 + $0xc8] sm:$0x1]  ;;  %v616_v21 = vshrl.u32 %v527_v7, 16 }
  0xa8   : > { %742 = vst [vmem:[#allocation2 + $0xb8] sm:$0x1] %v741_v2  ;;  %v510_v23 = vld [vmem:[%s10634_s6 + $0xd8] sm:$0xff]  ;;  %v325_v25 = vld [vmem:[#allocation2 + $0xf0] sm:$0x1]  ;;  %v921_v26 = vsel %vm813_vm5, %v10871_v24, %v920_v9  ;;  %v932_v28 = vrot.slane %v930_v10, 1  ;;  %v747_v30 = vsel %vm10652_vm3, %v611_v55, %v746_v20 }
  0xa9   : > { %v619_v31 = vshll.u32 %v527_v7, 16  ;;  %v511_v34 = vld [vmem:[%s10634_s6 + $0xe0] sm:$0xff]  ;;  %8897 = vmatprep.mubr.msk.bf16.mxu0 %vm273_vm0, %v921_v26  ;;  %v10921_v35 = vld [vmem:[#allocation2 + $0xa8] sm:$0x1]  ;;  %v10925_v36 = vsel %vm10693_vm7, %v614_v18, %v743_v19  ;;  %748 = vst [vmem:[#allocation2 + $0xc8] sm:$0x1] %v747_v30 }
  0xaa   : > { %v618_v38 = vrot.slane %v616_v21, 7  ;;  %v323_v40 = vsel %vm10652_vm3, 0, %v322_v57  ;;  %v375_v41 = vld [vmem:[#allocation2 + $0xf8] sm:$0x1]  ;;  %v942_v44 = vshll.u32 %v10921_v35, 16  ;;  %v947_v32 = vshrl.u32 %v10901_v59, 16 }
  0xab   : > { %745 = vst [vmem:[#allocation2 + $0xc0] sm:$0xff] %v10925_v36  ;;  %v961_v46 = vshll.u32 %v10925_v36, 16  ;;  %324 = vst [vmem:[#allocation2 + $0xe0] sm:$0x1] %v323_v40  ;;  %v512_v49 = vld [vmem:[%s10634_s6 + $0xe8] sm:$0xff]  ;;  %v951_v47 = vrot.slane %v949_v17, 1  ;;  %v528_v57 = vpack.c.bf16 %v510_v23, %v509_v3  ;;  %v933_v52 = vsel %vm813_vm5, %v10910_v12, %v932_v28 }
  0xac   : > { %v621_v50 = vor.u32 %v619_v31, %v618_v38  ;;  %v749_v56 = vld [vmem:[#allocation2 + $0xd0] sm:$0xff]  ;;  %v373_v60 = vsel %vm10657_vm6, 0, %v372_v11  ;;  %v944_v53 = vrot.slane %v942_v44, 1  ;;  %v326_v55 = vsel %vm10652_vm3, 0, %v325_v25  ;;  %s8026_s22 = scalar_lea.sflag [#allocation6], %s10628_s29  ;;  %s10343_s12 = scalar_lea.vmem %s12530_s30, 4096 }
  0xad   : > { %374 = vst [vmem:[#allocation2 + $0xe8] sm:$0x1] %v373_v60  ;;  %v376_v62 = vsel %vm10657_vm6, 0, %v375_v41  ;;  %v623_v10 = vshrl.u32 %v528_v57, 16  ;;  %v626_v2 = vshll.u32 %v528_v57, 16  ;;  %v529_v11 = vpack.c.bf16 %v512_v49, %v511_v34  ;;  %8898 = vmatmul.mubr.msk.bf16.gmra.mrb[16].mxu0 %vm273_vm0, %v933_v52  ;;  %p10344_p11 = scmp.ne.s32.totalorder %s12530_s30, %s10343_s12  ;;  %p12605_p0 = scmp.ne.s32.totalorder %s12594_s23, 0 }
  0xae   : > { %v10946_v7 = vsel %vm10693_vm7, %v621_v50, %v749_v56  ;;  %v752_v9 = vld [vmem:[#allocation2 + $0xd8] sm:$0x1]  ;;  %327 = vst [vmem:[#allocation2 + $0xf0] sm:$0x1] %v326_v55  ;;  %377 = vst [vmem:[#allocation2 + $0xf8] sm:$0x1] %v376_v62  ;;  %v945_v3 = vsel %vm813_vm5, %v10929_v43, %v944_v53  ;;  %v10962_v31 = vor.u32 %v951_v47, %v947_v32 }
  0xaf   : > { %v10950_v17 = vld [vmem:[#allocation2 + $0xb8] sm:$0x1]  ;;  %v959_v18 = vshrl.u32 %v10925_v36, 16  ;;  %v963_v19 = vrot.slane %v961_v46, 1  ;;  %751 = vst [vmem:[#allocation2 + $0xd0] sm:$0xff] %v10946_v7  ;;  %v753_v20 = vsel %vm10652_vm3, %v618_v38, %v752_v9  ;;  %v625_v23 = vrot.slane %v623_v10, 7  ;;  %8901 = vmatprep.mubr.msk.bf16.mxu0 %vm273_vm0, %v945_v3  ;;  %p10345_p1 = pnand %p10344_p11, %p12605_p0 }
  0xb0   : > { %v954_v21 = vshll.u32 %v10950_v17, 16  ;;  %754 = vst [vmem:[#allocation2 + $0xd8] sm:$0x1] %v753_v20  ;;  %v630_v25 = vshrl.u32 %v529_v11, 16  ;;  %v10958_v26 = vld [vmem:[#allocation2 + $0xc8] sm:$0x1] }
  0xb1   : > { %v973_v28 = vshll.u32 %v10946_v7, 16  ;;  %v633_v30 = vshll.u32 %v529_v11, 16  ;;  %v966_v40 = vshll.u32 %v10958_v26, 16  ;;  %v628_v38 = vor.u32 %v626_v2, %v625_v23  ;;  %p10346_p3 = pneg %p10345_p1  ;;  %s10423_s13 = smov [#allocation10]  }
  0xb2   : > { %v956_v34 = vrot.slane %v954_v21, 1  ;;  %v755_v41 = vld [vmem:[#allocation2 + $0xe0] sm:$0xff]  ;;  %v10965_v44 = vor.u32 %v963_v19, %v959_v18  ;;  %v632_v46 = vrot.slane %v630_v25, 7  ;;  %v971_v60 = vshrl.u32 %v10946_v7, 16  ;;  %s10347_s17 = sshll.u32 %s10423_s13, 4  ;;  %s10348_s17 = int_to_ptr.vmem [resolvable:$false] %s10347_s17 }
  0xb3   : > { %v968_v49 = vrot.slane %v966_v40, 1  ;;  %v10969_v50 = vsel %vm10693_vm7, %v628_v38, %v755_v41  ;;  %v975_v57 = vrot.slane %v973_v28, 1  ;;  %s10349_s7 = scalar_lea.vmem %s10348_s17, 8192  ;;  %p10350_p7 = scmp.lt.s32.totalorder %s12530_s30, %s10348_s17 }
  0xb4   : > { %v758_v56 = vld [vmem:[#allocation2 + $0xe8] sm:$0x1]  ;;  %757 = vst [vmem:[#allocation2 + $0xe0] sm:$0xff] %v10969_v50  ;;  %v635_v47 = vor.u32 %v633_v30, %v632_v46  ;;  %v957_v55 = vsel %vm813_vm5, %v10962_v31, %v956_v34  ;;  %v985_v62 = vshll.u32 %v10969_v50, 16  ;;  %v983_v20 = vshrl.u32 %v10969_v50, 16  ;;  %p10351_p9 = scmp.lt.s32.totalorder %s10349_s7, %s10343_s12 }
  0xb5   : > { %v759_v32 = vsel %vm10652_vm3, %v625_v23, %v758_v56  ;;  %v761_v52 = vld [vmem:[#allocation2 + $0xf0] sm:$0xff]  ;;  %v764_v53 = vld [vmem:[#allocation2 + $0xf8] sm:$0x1]  ;;  %v969_v10 = vsel %vm813_vm5, %v10965_v44, %v968_v49  ;;  %8902 = vmatmul.mubr.msk.bf16.gmra.mrb[20].mxu0 %vm273_vm0, %v957_v55  ;;  %v10991_v18 = vor.u32 %v975_v57, %v971_v60  ;;  %v10251_v55 = vld [vmem:[#allocation2 + $0x8] sm:$0x1] }
  0xb6   : > { %760 = vst [vmem:[#allocation2 + $0xe8] sm:$0x1] %v759_v32  ;;  %v765_v9 = vsel %vm10652_vm3, %v632_v46, %v764_v53  ;;  %v10986_v11 = vsel %vm10693_vm7, %v635_v47, %v761_v52  ;;  %8905 = vmatprep.mubr.msk.bf16.mxu0 %vm273_vm0, %v969_v10  ;;  %v987_v21 = vrot.slane %v985_v62, 1  ;;  %v10188_v47 = vld [vmem:[#allocation7 + $0x48] sm:$0xff]   ;;  %v10189_v52 = vld [vmem:[#allocation7 + $0x50] sm:$0xff]   ;;  %v10190_v53 = vld [vmem:[#allocation7 + $0x58] sm:$0xff]   ;;  %p10352_p12 = por %p10351_p9, %p10350_p7 }
  0xb7   : > { %v10982_v2 = vld [vmem:[#allocation2 + $0xd8] sm:$0x1]  ;;  %766 = vst [vmem:[#allocation2 + $0xf8] sm:$0x1] %v765_v9  ;;  %763 = vst [vmem:[#allocation2 + $0xf0] sm:$0xff] %v10986_v11  ;;  %v997_v23 = vshll.u32 %v10986_v11, 16 }
  0xb8   : > { %v978_v3 = vshll.u32 %v10982_v2, 16  ;;  %v995_v28 = vshrl.u32 %v10986_v11, 16  ;;  %v11001_v34 = vor.u32 %v987_v21, %v983_v20  ;;  %v1515_v62 = vrot.slane %v10251_v55, 1  ;;  %v1466_v20 = vld [vmem:[#allocation2 + $0x10] sm:$0xfe]  ;;  %p10353_p2 = pnand %p10352_p12, %p10346_p3 }
  0xb9   : > { %v999_v41 = vrot.slane %v997_v23, 1  ;;  %v1467_v23 = vld [vmem:[#allocation2 + $0x20] sm:$0xfe] }
  0xba   : > { %v980_v19 = vrot.slane %v978_v3, 1 }
  0xbb   : > { %v11010_v60 = vor.u32 %v999_v41, %v995_v28  ;;  %v1520_v41 = vrot.slane %v1467_v23, 1 }
  0xbc   : > { %v981_v30 = vsel %vm813_vm5, %v10991_v18, %v980_v19 }
  0xbd   : > { %v10996_v25 = vld [vmem:[#allocation2 + $0xe8] sm:$0x1]  ;;  %8906 = vmatmul.mubr.msk.bf16.gmra.mrb[24].mxu0 %vm273_vm0, %v981_v30  ;;  %v1518_v30 = vrot.slane %v10748_v51, 1  ;;  %v1524_v51 = vrot.slane %v10773_v16, 1  ;;  %v1530_v16 = vrot.slane %v10810_v5, 1 }
  0xbe   : > { %v990_v40 = vshll.u32 %v10996_v25, 16  ;;  %v11004_v38 = vld [vmem:[#allocation2 + $0xf8] sm:$0x1] }
  0xbf   : > { %v1002_v46 = vshll.u32 %v11004_v38, 16 }
  0xc0   : > { %v992_v49 = vrot.slane %v990_v40, 1  ;;  %v1517_v40 = vrot.slane %v1466_v20, 1  ;;  %v1539_v20 = vrot.slane %v10889_v42, 1 }
  0xc1   : > { %v1004_v57 = vrot.slane %v1002_v46, 1  ;;  %v1521_v46 = vrot.slane %v10761_v63, 1  ;;  %v10193_v63 = vld [vmem:[#allocation7 + $0x70] sm:$0xff]  }
  0xc2   : > { %v993_v56 = vsel %vm813_vm5, %v11001_v34, %v992_v49  ;;  %v1519_v49 = vsel %vm1513_vm8, %v1517_v40, %v1518_v30  ;;  %v1474_v30 = vld [vmem:[#allocation2 + $0x90] sm:$0xfe]  ;;  %v1475_v40 = vld [vmem:[#allocation2 + $0xa0] sm:$0xfe] }
  0xc3   : > { %8909 = vmatprep.mubr.msk.bf16.mxu0 %vm273_vm0, %v993_v56  ;;  %v1005_v32 = vsel %vm813_vm5, %v11010_v60, %v1004_v57  ;;  %v1522_v56 = vsel %vm1513_vm8, %v1520_v41, %v1521_v46  ;;  %v1468_v57 = vld [vmem:[#allocation2 + $0x30] sm:$0xfe]  ;;  %v1541_v41 = vrot.slane %v1474_v30, 1  ;;  %v1542_v46 = vrot.slane %v10897_v58, 1  ;;  %v11142_v30 = vld [vmem:[#allocation2 + $0x18] sm:$0x1] }
  0xc5   : > { %8910 = vmatmul.mubr.msk.bf16.gmra.mrb[28].mxu0 %vm273_vm0, %v1005_v32  ;;  %v10192_v32 = vld [vmem:[#allocation7 + $0x68] sm:$0xff]  }
  0xc6   : > { %8921 = vmatprep.mubr.msk.bf16.mxu0 %vm273_vm0, %v10661_v6  ;;  %v10191_v6 = vld [vmem:[#allocation7 + $0x60] sm:$0xff]  }
  0xcd   : > { %8922 = vmatmul.mubr.msk.bf16.vlgmr.msra.gmra.mrb[0].mxu0 %vm273_vm0, %v10704_v0  ;;  %v328_v0 = vld [vmem:[#allocation2 + $0x100] sm:$0x1] }
  0xce   : > { %8954 = vmatpush3.bf16.msra.mxu0 %v10884_v37  ;;  %8925 = vmatprep.mubr.msk.bf16.mxu0 %vm273_vm0, %v10715_v14  ;;  %v329_v14 = vsel %vm10652_vm3, 0, %v328_v0  ;;  %v1527_v0 = vrot.slane %v10780_v27, 1 }
  0xcf   : > { %8955 = vmatprep.subr.bf16.mxu0 %v10188_v47  ;;  %330 = vst [vmem:[#allocation2 + $0x100] sm:$0x1] %v329_v14 }
  0xd2   : > { %8956 = vmatpush3.bf16.msra.mxu0 %v10188_v47  ;;  %v1469_v47 = vld [vmem:[#allocation2 + $0x40] sm:$0xfe] }
  0xd3   : > { %8957 = vmatprep.subr.bf16.mxu0 %v10189_v52 }
  0xd5   : > { %8926 = vmatmul.mubr.msk.bf16.gmra.mrb[4].mxu0 %vm273_vm0, %v10725_v22  ;;  %v513_v22 = vld [vmem:[%s10634_s6 + $0xf0] sm:$0xff] }
  0xd6   : > { %8929 = vmatprep.mubr.msk.bf16.mxu0 %vm273_vm0, %v10737_v39  ;;  %8958 = vmatpush3.bf16.msra.mxu0 %v10189_v52  ;;  %v514_v39 = vld [vmem:[%s10634_s6 + $0xf8] sm:$0xff]  ;;  %v767_v21 = vld [vmem:[#allocation2 + $0x100] sm:$0xff]  ;;  %v1523_v52 = vrot.slane %v1468_v57, 1  ;;  %v1476_v57 = vld [vmem:[#allocation2 + $0xb0] sm:$0xfe] }
  0xd7   : > { %8959 = vmatprep.subr.bf16.mxu0 %v10190_v53 }
  0xd8   : > { %v1525_v14 = vsel %vm1513_vm8, %v1523_v52, %v1524_v51  ;;  %v1547_v52 = vrot.slane %v1476_v57, 1  ;;  %v1548_v51 = vrot.slane %v10950_v17, 1  ;;  %v1554_v17 = vrot.slane %v10982_v2, 1 }
  0xd9   : > { %v1560_v2 = vrot.slane %v11004_v38, 1  ;;  %v10197_v38 = vld [vmem:[#allocation7 + $0x90] sm:$0xff]  }
  0xda   : > { %8960 = vmatpush3.bf16.msra.mxu0 %v10190_v53  ;;  %v1526_v53 = vrot.slane %v1469_v47, 1  ;;  %v378_v47 = vld [vmem:[#allocation2 + $0x108] sm:$0x1] }
  0xdb   : > { %8993 = vmatprep.subr.bf16.mxu0 %v10191_v6  ;;  %v379_v58 = vsel %vm10657_vm6, 0, %v378_v47  ;;  %v11162_v47 = vld [vmem:[#allocation2 + $0x50] sm:$0xff] }
  0xdc   : > { %380 = vst [vmem:[#allocation2 + $0x108] sm:$0x1] %v379_v58 }
  0xdd   : > { %8930 = vmatmul.mubr.msk.bf16.gmra.mrb[8].mxu0 %vm273_vm0, %v10759_v61  ;;  %v1465_v61 = vld [vmem:[#allocation2] sm:$0xfe] }
  0xde   : > { %8933 = vmatprep.mubr.msk.bf16.mxu0 %vm273_vm0, %v10801_v54  ;;  %v530_v54 = vpack.c.bf16 %v514_v39, %v513_v22  ;;  %v1514_v9 = vrot.slane %v1465_v61, 1  ;;  %v1528_v22 = vsel %vm1513_vm8, %v1526_v53, %v1527_v0  ;;  %v1470_v39 = vld [vmem:[#allocation2 + $0x50] sm:$0xfe]  ;;  %v10194_v61 = vld [vmem:[#allocation7 + $0x78] sm:$0xff]   ;;  %v1549_v0 = vsel %vm1513_vm8, %v1547_v52, %v1548_v51 }
  0xe0   : > { %v640_v37 = vshll.u32 %v530_v54, 16  ;;  %v1516_v19 = vsel %vm1513_vm8, %v1514_v9, %v1515_v62  ;;  %v1472_v9 = vld [vmem:[#allocation2 + $0x70] sm:$0xfe] }
  0xe1   : > { %v1535_v5 = vrot.slane %v1472_v9, 1  ;;  %v11119_v9 = vld [vmem:[#allocation2 + $0x30] sm:$0xff] }
  0xe5   : > { %8934 = vmatmul.mubr.msk.bf16.gmra.mrb[12].mxu0 %vm273_vm0, %v10817_v8  ;;  %v637_v8 = vshrl.u32 %v530_v54, 16  ;;  %v1471_v54 = vld [vmem:[#allocation2 + $0x60] sm:$0xfe] }
  0xe6   : > { %8937 = vmatprep.mubr.msk.bf16.mxu0 %vm273_vm0, %v10837_v33  ;;  %v1532_v27 = vrot.slane %v1471_v54, 1 }
  0xe7   : > { %v11051_v10 = vrot.slane %v637_v8, 7  ;;  %v1533_v8 = vrot.slane %v10845_v45, 1 }
  0xe9   : > { %v642_v3 = vor.u32 %v640_v37, %v11051_v10  ;;  %v11077_v37 = vld [vmem:[#allocation7 + $0x80] sm:$0xff]   ;;  %v1534_v62 = vsel %vm1513_vm8, %v1532_v27, %v1533_v8  ;;  %v1480_v8 = vld [vmem:[#allocation2 + $0xf0] sm:$0xfe] }
  0xeb   : > { %v11057_v28 = vsel %vm10693_vm7, %v642_v3, %v767_v21  ;;  %v1473_v3 = vld [vmem:[#allocation2 + $0x80] sm:$0xfe] }
  0xec   : > { %769 = vst [vmem:[#allocation2 + $0x100] sm:$0xff] %v11057_v28  ;;  %v1538_v45 = vrot.slane %v1473_v3, 1  ;;  %v10196_v3 = vld [vmem:[#allocation7 + $0x88] sm:$0xff]  }
  0xed   : > { %8938 = vmatmul.mubr.msk.bf16.gmra.mrb[16].mxu0 %vm273_vm0, %v10862_v15 }
  0xee   : > { %8941 = vmatprep.mubr.msk.bf16.mxu0 %vm273_vm0, %v10878_v29  ;;  %v1540_v23 = vsel %vm1513_vm8, %v1538_v45, %v1539_v20  ;;  %v10253_v45 = vld [vmem:[#allocation2 + $0x50] sm:$0xff]  ;;  %v10199_v20 = vld [vmem:[#allocation7 + $0xa0] sm:$0xff]  }
  0xf5   : > { %8942 = vmatmul.mubr.msk.bf16.gmra.mrb[20].mxu0 %vm273_vm0, %v10901_v59 }
  0xf6   : > { %8945 = vmatprep.mubr.msk.bf16.mxu0 %vm273_vm0, %v10925_v36 }
  0xfd   : > { %8946 = vmatmul.mubr.msk.bf16.gmra.mrb[24].mxu0 %vm273_vm0, %v10946_v7 }
  0xfe   : > { %8949 = vmatprep.mubr.msk.bf16.mxu0 %vm273_vm0, %v10969_v50 }
 0x105   : > { %8950 = vmatmul.mubr.msk.bf16.gmra.mrb[28].mxu0 %vm273_vm0, %v10986_v11 }
 0x106   : > { %8961 = vmatprep.mubr.msk.bf16.mxu0 %vm273_vm0, %v1516_v19  ;;  %v1536_v19 = vrot.slane %v10858_v13, 1  ;;  %v1543_v13 = vsel %vm1513_vm8, %v1541_v41, %v1542_v46  ;;  %v2166_v41 = vshll.u32 %v11142_v30, 16  ;;  %v11153_v46 = vld [vmem:[#allocation2 + $0x38] sm:$0x1] }
 0x107   : > { %v2190_v57 = vshll.u32 %v11153_v46, 16 }
 0x108   : > { %v1537_v21 = vsel %vm1513_vm8, %v1535_v5, %v1536_v19  ;;  %v10198_v5 = vld [vmem:[#allocation7 + $0x98] sm:$0xff]   ;;  %v10252_v19 = vld [vmem:[#allocation2 + $0x40] sm:$0xff] }
 0x10d   : > { %8962 = vmatmul.mubr.msk.bf16.vlgmr.msra.gmra.mrb[0].mxu0 %vm273_vm0, %v1519_v49  ;;  %v1544_v49 = vrot.slane %v1475_v40, 1 }
 0x10e   : > { %8994 = vmatpush3.bf16.msra.mxu0 %v10191_v6  ;;  %8965 = vmatprep.mubr.msk.bf16.mxu0 %vm273_vm0, %v1522_v56  ;;  %v1529_v6 = vrot.slane %v1470_v39, 1  ;;  %v1545_v56 = vrot.slane %v10921_v35, 1  ;;  %v1551_v35 = vrot.slane %v10958_v26, 1 }
 0x10f   : > { %8995 = vmatprep.subr.bf16.mxu0 %v10192_v32 }
 0x110   : > { %v1531_v55 = vsel %vm1513_vm8, %v1529_v6, %v1530_v16  ;;  %v1546_v42 = vsel %vm1513_vm8, %v1544_v49, %v1545_v56  ;;  %v1557_v6 = vrot.slane %v10996_v25, 1  ;;  %v1836_v25 = vld [vmem:[#allocation2 + $0x10] sm:$0xff] }
 0x111   : > { %v2159_v40 = vshrl.u32 %v1836_v25, 16 }
 0x112   : > { %8996 = vmatpush3.bf16.msra.mxu0 %v10192_v32  ;;  %v1477_v32 = vld [vmem:[#allocation2 + $0xc0] sm:$0xfe] }
 0x113   : > { %8997 = vmatprep.subr.bf16.mxu0 %v10193_v63  ;;  %v1550_v53 = vrot.slane %v1477_v32, 1  ;;  %v11160_v32 = vld [vmem:[#allocation2 + $0x40] sm:$0xff] }
 0x114   : > { %v2197_v58 = vshll.u32 %v11160_v32, 16 }
 0x115   : > { %8966 = vmatmul.mubr.msk.bf16.gmra.mrb[4].mxu0 %vm273_vm0, %v1525_v14  ;;  %v1478_v14 = vld [vmem:[#allocation2 + $0xd0] sm:$0xfe] }
 0x116   : > { %8969 = vmatprep.mubr.msk.bf16.mxu0 %vm273_vm0, %v1528_v22  ;;  %8998 = vmatpush3.bf16.msra.mxu0 %v10193_v63  ;;  %v1552_v63 = vsel %vm1513_vm8, %v1550_v53, %v1551_v35  ;;  %v1479_v22 = vld [vmem:[#allocation2 + $0xe0] sm:$0xfe]  ;;  %v1553_v39 = vrot.slane %v1478_v14, 1  ;;  %v2192_v35 = vrot.slane %v2190_v57, 1  ;;  %v11175_v14 = vld [vmem:[#allocation2 + $0x58] sm:$0x1] }
 0x117   : > { %8999 = vmatprep.subr.bf16.mxu0 %v10194_v61  ;;  %v1556_v54 = vrot.slane %v1479_v22, 1 }
 0x118   : > { %v1555_v16 = vsel %vm1513_vm8, %v1553_v39, %v1554_v17  ;;  %v2195_v39 = vshrl.u32 %v11160_v32, 16  ;;  %v2199_v17 = vrot.slane %v2197_v58, 1 }
 0x119   : > { %v1558_v27 = vsel %vm1513_vm8, %v1556_v54, %v1557_v6  ;;  %v2207_v6 = vshrl.u32 %v11162_v47, 16 }
 0x11a   : > { %9000 = vmatpush3.bf16.msra.mxu0 %v10194_v61  ;;  %v770_v61 = vld [vmem:[#allocation2 + $0x108] sm:$0x1] }
 0x11b   : > { %9033 = vmatprep.subr.bf16.mxu0 %v11077_v37  ;;  %v771_v26 = vsel %vm10652_vm3, %v11051_v10, %v770_v61  ;;  %v11117_v10 = vld [vmem:[#allocation2 + $0x20] sm:$0xff] }
 0x11c   : > { %772 = vst [vmem:[#allocation2 + $0x108] sm:$0x1] %v771_v26  ;;  %v2171_v49 = vshrl.u32 %v11117_v10, 16 }
 0x11d   : > { %8970 = vmatmul.mubr.msk.bf16.gmra.mrb[8].mxu0 %vm273_vm0, %v1531_v55  ;;  %v1559_v55 = vrot.slane %v1480_v8, 1  ;;  %v11185_v8 = vld [vmem:[#allocation2 + $0x60] sm:$0xff] }
 0x11e   : > { %8973 = vmatprep.mubr.msk.bf16.mxu0 %vm273_vm0, %v1534_v62 }
 0x11f   : > { %v1561_v62 = vsel %vm1513_vm8, %v1559_v55, %v1560_v2  ;;  %v11187_v55 = vld [vmem:[#allocation2 + $0x70] sm:$0xff]  ;;  %v11191_v2 = vor.u32 %v2199_v17, %v2195_v39  ;;  %v11230_v39 = vld [vmem:[#allocation2 + $0xa8] sm:$0x1]  ;;  %v11232_v17 = vld [vmem:[#allocation2 + $0xb8] sm:$0x1] }
 0x125   : > { %8974 = vmatmul.mubr.msk.bf16.gmra.mrb[12].mxu0 %vm273_vm0, %v1537_v21  ;;  %v10255_v21 = vld [vmem:[#allocation2 + $0x70] sm:$0xff] }
 0x126   : > { %8977 = vmatprep.mubr.msk.bf16.mxu0 %vm273_vm0, %v1540_v23  ;;  %v2161_v23 = vshll.u32 %v1836_v25, 16 }
 0x12d   : > { %8978 = vmatmul.mubr.msk.bf16.gmra.mrb[16].mxu0 %vm273_vm0, %v1543_v13 }
 0x12e   : > { %8981 = vmatprep.mubr.msk.bf16.mxu0 %vm273_vm0, %v1546_v42  ;;  %v2183_v42 = vshrl.u32 %v11119_v9, 16 }
 0x135   : > { %8982 = vmatmul.mubr.msk.bf16.gmra.mrb[20].mxu0 %vm273_vm0, %v1549_v0  ;;  %v11172_v0 = vld [vmem:[#allocation2 + $0x48] sm:$0x1] }
 0x136   : > { %8985 = vmatprep.mubr.msk.bf16.mxu0 %vm273_vm0, %v1552_v63  ;;  %v2209_v63 = vshll.u32 %v11162_v47, 16  ;;  %v2202_v61 = vshll.u32 %v11172_v0, 16 }
 0x138   : > { %v2211_v26 = vrot.slane %v2209_v63, 1 }
 0x13d   : > { %8986 = vmatmul.mubr.msk.bf16.gmra.mrb[24].mxu0 %vm273_vm0, %v1555_v16  ;;  %v2214_v16 = vshll.u32 %v11175_v14, 16 }
 0x13e   : > { %8989 = vmatprep.mubr.msk.bf16.mxu0 %vm273_vm0, %v1558_v27  ;;  %v10200_v27 = vld [vmem:[#allocation7 + $0xa8] sm:$0xff]  }
 0x145   : > { %8990 = vmatmul.mubr.msk.bf16.gmra.mrb[28].mxu0 %vm273_vm0, %v1561_v62  ;;  %v2204_v62 = vrot.slane %v2202_v61, 1 }
 0x146   : > { %9001 = vmatprep.mubr.msk.bf16.mxu0 %vm273_vm0, %v1836_v25  ;;  %v2221_v25 = vshll.u32 %v11185_v8, 16 }
 0x14d   : > { %9002 = vmatmul.mubr.msk.bf16.vlgmr.msra.gmra.mrb[0].mxu0 %vm273_vm0, %v11117_v10 }
 0x14e   : > { %9034 = vmatpush3.bf16.msra.mxu0 %v11077_v37  ;;  %9005 = vmatprep.mubr.msk.bf16.mxu0 %vm273_vm0, %v11119_v9  ;;  %v10254_v37 = vld [vmem:[#allocation2 + $0x60] sm:$0xff] }
 0x14f   : > { %9035 = vmatprep.subr.bf16.mxu0 %v10196_v3 }
 0x152   : > { %9036 = vmatpush3.bf16.msra.mxu0 %v10196_v3  ;;  %v11194_v3 = vor.u32 %v2211_v26, %v2207_v6  ;;  %v2286_v26 = vshll.u32 %v11232_v17, 16 }
 0x153   : > { %9037 = vmatprep.subr.bf16.mxu0 %v10197_v38 }
 0x155   : > { %9006 = vmatmul.mubr.msk.bf16.gmra.mrb[4].mxu0 %vm273_vm0, %v10252_v19  ;;  %v2233_v19 = vshll.u32 %v11187_v55, 16 }
 0x156   : > { %9009 = vmatprep.mubr.msk.bf16.mxu0 %vm273_vm0, %v10253_v45  ;;  %9038 = vmatpush3.bf16.msra.mxu0 %v10197_v38  ;;  %v2216_v38 = vrot.slane %v2214_v16, 1  ;;  %v10201_v45 = vld [vmem:[#allocation7 + $0xb0] sm:$0xff]  }
 0x157   : > { %9039 = vmatprep.subr.bf16.mxu0 %v10198_v5 }
 0x15a   : > { %9040 = vmatpush3.bf16.msra.mxu0 %v10198_v5  ;;  %v11196_v5 = vld [vmem:[#allocation2 + $0x68] sm:$0x1] }
 0x15b   : > { %9073 = vmatprep.subr.bf16.mxu0 %v10199_v20 }
 0x15d   : > { %9010 = vmatmul.mubr.msk.bf16.gmra.mrb[8].mxu0 %vm273_vm0, %v10254_v37  ;;  %v11199_v37 = vld [vmem:[#allocation2 + $0x78] sm:$0x1] }
 0x15e   : > { %9013 = vmatprep.mubr.msk.bf16.mxu0 %vm273_vm0, %v10255_v21  ;;  %v2219_v21 = vshrl.u32 %v11185_v8, 16 }
 0x165   : > { %9014 = vmatmul.mubr.msk.bf16.gmra.mrb[12].mxu0 %vm273_vm0, %v10837_v33  ;;  %v2163_v33 = vrot.slane %v2161_v23, 1  ;;  %v2223_v23 = vrot.slane %v2221_v25, 1  ;;  %v11244_v25 = vld [vmem:[#allocation2 + $0xd8] sm:$0x1] }
 0x166   : > { %9017 = vmatprep.mubr.msk.bf16.mxu0 %vm273_vm0, %v10862_v15  ;;  %v2173_v15 = vshll.u32 %v11117_v10, 16 }
 0x168   : > { %v2175_v56 = vrot.slane %v2173_v15, 1  ;;  %v2235_v15 = vrot.slane %v2233_v19, 1  ;;  %v2310_v19 = vshll.u32 %v11244_v25, 16 }
 0x16a   : > { %v11167_v52 = vor.u32 %v2175_v56, %v2171_v49 }
 0x16d   : > { %9018 = vmatmul.mubr.msk.bf16.gmra.mrb[16].mxu0 %vm273_vm0, %v10878_v29  ;;  %v2164_v29 = vor.u32 %v2163_v33, %v2159_v40  ;;  %v2226_v40 = vshll.u32 %v11196_v5, 16  ;;  %v2217_v33 = vsel %vm813_vm5, %v11194_v3, %v2216_v38 }
 0x16e   : > { %9021 = vmatprep.mubr.msk.bf16.mxu0 %vm273_vm0, %v10901_v59  ;;  %v2168_v59 = vrot.slane %v2166_v41, 1  ;;  %v2231_v41 = vshrl.u32 %v11187_v55, 16 }
 0x16f   : > { %v2228_v49 = vrot.slane %v2226_v40, 1 }
 0x170   : > { %v11213_v56 = vor.u32 %v2235_v15, %v2231_v41  ;;  %v2341_v15 = vshll.u32 %v11057_v28, 16 }
 0x175   : > { %9022 = vmatmul.mubr.msk.bf16.gmra.mrb[20].mxu0 %vm273_vm0, %v10925_v36  ;;  %v11150_v36 = vld [vmem:[#allocation2 + $0x28] sm:$0x1] }
 0x176   : > { %9025 = vmatprep.mubr.msk.bf16.mxu0 %vm273_vm0, %v10946_v7  ;;  %v2185_v7 = vshll.u32 %v11119_v9, 16  ;;  %v2178_v13 = vshll.u32 %v11150_v36, 16 }
 0x178   : > { %v2180_v51 = vrot.slane %v2178_v13, 1 }
 0x17a   : > { %v2181_v22 = vsel %vm813_vm5, %v11167_v52, %v2180_v51 }
 0x17d   : > { %9026 = vmatmul.mubr.msk.bf16.gmra.mrb[24].mxu0 %vm273_vm0, %v10969_v50  ;;  %v2169_v50 = vsel %vm813_vm5, %v2164_v29, %v2168_v59  ;;  %v2238_v29 = vshll.u32 %v11199_v37, 16  ;;  %v10202_v59 = vld [vmem:[#allocation7 + $0xb8] sm:$0xff]  }
 0x17e   : > { %9029 = vmatprep.mubr.msk.bf16.mxu0 %vm273_vm0, %v10986_v11  ;;  %v2187_v11 = vrot.slane %v2185_v7, 1  ;;  %v11211_v7 = vor.u32 %v2223_v23, %v2219_v21  ;;  %v11254_v21 = vld [vmem:[#allocation2 + $0xe8] sm:$0x1]  ;;  %v11256_v23 = vld [vmem:[#allocation2 + $0xf8] sm:$0x1] }
 0x17f   : > { %v2240_v13 = vrot.slane %v2238_v29, 1  ;;  %v2322_v40 = vshll.u32 %v11254_v21, 16 }
 0x180   : > { %v11170_v53 = vor.u32 %v2187_v11, %v2183_v42  ;;  %v11217_v42 = vld [vmem:[#allocation7 + $0xc0] sm:$0xff]   ;;  %v11219_v11 = vld [vmem:[#allocation2 + $0x98] sm:$0x1]  ;;  %v2229_v57 = vsel %vm813_vm5, %v11211_v7, %v2228_v49  ;;  %v2339_v49 = vshrl.u32 %v11057_v28, 16 }
 0x181   : > { %v2241_v58 = vsel %vm813_vm5, %v11213_v56, %v2240_v13  ;;  %v2324_v41 = vrot.slane %v2322_v40, 1  ;;  %v2343_v13 = vrot.slane %v2341_v15, 1  ;;  %v2630_v15 = vld [vmem:[#allocation2 + $0x70] sm:$0xfe] }
 0x182   : > { %v2193_v54 = vsel %vm813_vm5, %v11170_v53, %v2192_v35  ;;  %v2262_v35 = vshll.u32 %v11219_v11, 16 }
 0x185   : > { %9030 = vmatmul.mubr.msk.bf16.gmra.mrb[28].mxu0 %vm273_vm0, %v11057_v28 }
 0x186   : > { %9041 = vmatprep.mubr.msk.bf16.mxu0 %vm273_vm0, %v2169_v50  ;;  %v11215_v50 = vld [vmem:[#allocation2 + $0x88] sm:$0x1] }
 0x187   : > { %v2250_v51 = vshll.u32 %v11215_v50, 16 }
 0x189   : > { %v2252_v63 = vrot.slane %v2250_v51, 1  ;;  %v2624_v51 = vld [vmem:[#allocation2 + $0x10] sm:$0xfe] }
 0x18b   : > { %v2253_v61 = vsel %vm813_vm5, %v10871_v24, %v2252_v63  ;;  %v2672_v63 = vrot.slane %v2624_v51, 1 }
 0x18d   : > { %9042 = vmatmul.mubr.msk.bf16.vlgmr.msra.gmra.mrb[0].mxu0 %vm273_vm0, %v2181_v22  ;;  %v2264_v22 = vrot.slane %v2262_v35, 1 }
 0x18e   : > { %9074 = vmatpush3.bf16.msra.mxu0 %v10199_v20  ;;  %9045 = vmatprep.mubr.msk.bf16.mxu0 %vm273_vm0, %v2193_v54  ;;  %v2205_v20 = vsel %vm813_vm5, %v11191_v2, %v2204_v62  ;;  %v2274_v54 = vshll.u32 %v11230_v39, 16  ;;  %v11242_v62 = vld [vmem:[#allocation2 + $0xc8] sm:$0x1] }
 0x18f   : > { %9075 = vmatprep.subr.bf16.mxu0 %v10200_v27  ;;  %v2265_v6 = vsel %vm813_vm5, %v10910_v12, %v2264_v22  ;;  %v2298_v38 = vshll.u32 %v11242_v62, 16  ;;  %v2673_v22 = vrot.slane %v11142_v30, 1 }
 0x190   : > { %v2276_v16 = vrot.slane %v2274_v54, 1  ;;  %v2625_v54 = vld [vmem:[#allocation2 + $0x20] sm:$0xfe] }
 0x192   : > { %9076 = vmatpush3.bf16.msra.mxu0 %v10200_v27  ;;  %v2288_v27 = vrot.slane %v2286_v26, 1  ;;  %v2277_v24 = vsel %vm813_vm5, %v10929_v43, %v2276_v16  ;;  %v2676_v26 = vrot.slane %v11150_v36, 1 }
 0x193   : > { %9077 = vmatprep.subr.bf16.mxu0 %v10201_v45 }
 0x194   : > { %v2289_v12 = vsel %vm813_vm5, %v10962_v31, %v2288_v27  ;;  %v2679_v27 = vrot.slane %v11153_v46, 1  ;;  %v10205_v46 = vld [vmem:[#allocation7 + $0xd0] sm:$0xff]  }
 0x195   : > { %9046 = vmatmul.mubr.msk.bf16.gmra.mrb[4].mxu0 %vm273_vm0, %v2205_v20  ;;  %v2312_v20 = vrot.slane %v2310_v19, 1  ;;  %v2628_v19 = vld [vmem:[#allocation2 + $0x50] sm:$0xfe] }
 0x196   : > { %9049 = vmatprep.mubr.msk.bf16.mxu0 %vm273_vm0, %v2217_v33  ;;  %9078 = vmatpush3.bf16.msra.mxu0 %v10201_v45  ;;  %v2300_v45 = vrot.slane %v2298_v38, 1  ;;  %v2334_v33 = vshll.u32 %v11256_v23, 16  ;;  %v2627_v38 = vld [vmem:[#allocation2 + $0x40] sm:$0xfe]  ;;  %v2684_v36 = vrot.slane %v2628_v19, 1 }
 0x197   : > { %9079 = vmatprep.subr.bf16.mxu0 %v10202_v59  ;;  %v2313_v31 = vsel %vm813_vm5, %v10991_v18, %v2312_v20  ;;  %v2682_v20 = vrot.slane %v11172_v0, 1  ;;  %v2688_v0 = vrot.slane %v11196_v5, 1  ;;  %v2694_v5 = vrot.slane %v11215_v50, 1  ;;  %v2637_v19 = vld [vmem:[#allocation2 + $0xe0] sm:$0xfe] }
 0x198   : > { %v2301_v43 = vsel %vm813_vm5, %v10965_v44, %v2300_v45  ;;  %v2336_v29 = vrot.slane %v2334_v33, 1  ;;  %v2325_v44 = vsel %vm813_vm5, %v11001_v34, %v2324_v41  ;;  %v2681_v45 = vrot.slane %v2627_v38, 1  ;;  %v2629_v33 = vld [vmem:[#allocation2 + $0x60] sm:$0xfe]  ;;  %v10206_v41 = vld [vmem:[#allocation7 + $0xd8] sm:$0xff]  }
 0x19a   : > { %9080 = vmatpush3.bf16.msra.mxu0 %v10202_v59  ;;  %v11267_v59 = vld [vmem:[#allocation2 + $0x108] sm:$0x1]  ;;  %v2683_v40 = vsel %vm1513_vm8, %v2681_v45, %v2682_v20  ;;  %v2638_v45 = vld [vmem:[#allocation2 + $0xf0] sm:$0xfe]  ;;  %v2711_v20 = vrot.slane %v2637_v19, 1 }
 0x19b   : > { %9113 = vmatprep.subr.bf16.mxu0 %v11217_v42  ;;  %v2346_v18 = vshll.u32 %v11267_v59, 16 }
 0x19d   : > { %9050 = vmatmul.mubr.msk.bf16.gmra.mrb[8].mxu0 %vm273_vm0, %v2229_v57  ;;  %v2337_v57 = vsel %vm813_vm5, %v11010_v60, %v2336_v29  ;;  %v2348_v35 = vrot.slane %v2346_v18, 1  ;;  %v2675_v60 = vrot.slane %v2625_v54, 1  ;;  %v2691_v29 = vrot.slane %v11199_v37, 1  ;;  %v2631_v18 = vld [vmem:[#allocation2 + $0x80] sm:$0xfe] }
 0x19e   : > { %9053 = vmatprep.mubr.msk.bf16.mxu0 %vm273_vm0, %v2241_v58  ;;  %v11277_v58 = vor.u32 %v2343_v13, %v2339_v49  ;;  %v2693_v51 = vrot.slane %v2631_v18, 1  ;;  %v2697_v37 = vrot.slane %v11219_v11, 1  ;;  %v11384_v18 = vld [vmem:[#allocation2 + $0x110] sm:$0xff] }
 0x1a0   : > { %v2349_v34 = vsel %vm813_vm5, %v11277_v58, %v2348_v35 }
 0x1a5   : > { %9054 = vmatmul.mubr.msk.bf16.gmra.mrb[12].mxu0 %vm273_vm0, %v2253_v61  ;;  %v2674_v61 = vsel %vm1513_vm8, %v2672_v63, %v2673_v22  ;;  %v2695_v63 = vsel %vm1513_vm8, %v2693_v51, %v2694_v5 }
 0x1a6   : > { %9057 = vmatprep.mubr.msk.bf16.mxu0 %vm273_vm0, %v2265_v6  ;;  %v2626_v6 = vld [vmem:[#allocation2 + $0x30] sm:$0xfe] }
 0x1a7   : > { %v2678_v16 = vrot.slane %v2626_v6, 1  ;;  %v2700_v6 = vrot.slane %v11230_v39, 1 }
 0x1a9   : > { %v2680_v30 = vsel %vm1513_vm8, %v2678_v16, %v2679_v27  ;;  %v2635_v16 = vld [vmem:[#allocation2 + $0xc0] sm:$0xfe]  ;;  %v2636_v27 = vld [vmem:[#allocation2 + $0xd0] sm:$0xfe] }
 0x1aa   : > { %v2708_v38 = vrot.slane %v2636_v27, 1 }
 0x1ad   : > { %9058 = vmatmul.mubr.msk.bf16.gmra.mrb[16].mxu0 %vm273_vm0, %v2277_v24  ;;  %v2677_v24 = vsel %vm1513_vm8, %v2675_v60, %v2676_v26  ;;  %v2703_v26 = vrot.slane %v11232_v17, 1 }
 0x1ae   : > { %9061 = vmatprep.mubr.msk.bf16.mxu0 %vm273_vm0, %v2289_v12  ;;  %v10204_v12 = vld [vmem:[#allocation7 + $0xc8] sm:$0xff]  }
 0x1b5   : > { %9062 = vmatmul.mubr.msk.bf16.gmra.mrb[20].mxu0 %vm273_vm0, %v2301_v43  ;;  %v2685_v43 = vrot.slane %v11175_v14, 1  ;;  %v2690_v14 = vrot.slane %v2630_v15, 1  ;;  %v11349_v15 = vld [vmem:[#allocation2 + $0xa0] sm:$0xff] }
 0x1b6   : > { %9065 = vmatprep.mubr.msk.bf16.mxu0 %vm273_vm0, %v2313_v31 }
 0x1b7   : > { %v2686_v31 = vsel %vm1513_vm8, %v2684_v36, %v2685_v43  ;;  %v2692_v13 = vsel %vm1513_vm8, %v2690_v14, %v2691_v29  ;;  %v2712_v36 = vrot.slane %v11254_v21, 1  ;;  %v2714_v43 = vrot.slane %v2638_v45, 1  ;;  %v10208_v21 = vld [vmem:[#allocation7 + $0xe8] sm:$0xff]   ;;  %v11373_v14 = vld [vmem:[#allocation2 + $0xf0] sm:$0xff]  ;;  %v11420_v45 = vld [vmem:[#allocation2 + $0x98] sm:$0x1] }
 0x1bd   : > { %9066 = vmatmul.mubr.msk.bf16.gmra.mrb[24].mxu0 %vm273_vm0, %v2325_v44  ;;  %v10207_v44 = vld [vmem:[#allocation7 + $0xe0] sm:$0xff]  }
 0x1be   : > { %9069 = vmatprep.mubr.msk.bf16.mxu0 %vm273_vm0, %v2337_v57  ;;  %v2632_v57 = vld [vmem:[#allocation2 + $0x90] sm:$0xfe] }
 0x1bf   : > { %v2696_v35 = vrot.slane %v2632_v57, 1 }
 0x1c1   : > { %v2698_v22 = vsel %vm1513_vm8, %v2696_v35, %v2697_v37  ;;  %v11393_v37 = vld [vmem:[#allocation2 + $0x58] sm:$0x1] }
 0x1c5   : > { %9070 = vmatmul.mubr.msk.bf16.gmra.mrb[28].mxu0 %vm273_vm0, %v2349_v34  ;;  %v2633_v34 = vld [vmem:[#allocation2 + $0xa0] sm:$0xfe] }
 0x1c6   : > { %9081 = vmatprep.mubr.msk.bf16.mxu0 %vm273_vm0, %v2674_v61  ;;  %v2634_v61 = vld [vmem:[#allocation2 + $0xb0] sm:$0xfe]  ;;  %v2699_v54 = vrot.slane %v2633_v34, 1  ;;  %v3361_v34 = vshll.u32 %v11393_v37, 16 }
 0x1c7   : > { %v2702_v60 = vrot.slane %v2634_v61, 1 }
 0x1c8   : > { %v2701_v50 = vsel %vm1513_vm8, %v2699_v54, %v2700_v6  ;;  %v10212_v54 = vld [vmem:[#allocation7 + $0x108] sm:$0xff]   ;;  %v3363_v6 = vrot.slane %v3361_v34, 1 }
 0x1c9   : > { %v2704_v11 = vsel %vm1513_vm8, %v2702_v60, %v2703_v26  ;;  %v11405_v26 = vld [vmem:[#allocation2 + $0x78] sm:$0x1] }
 0x1cd   : > { %9082 = vmatmul.mubr.msk.bf16.vlgmr.msra.gmra.mrb[0].mxu0 %vm273_vm0, %v2677_v24  ;;  %v2705_v24 = vrot.slane %v2635_v16, 1  ;;  %v3385_v16 = vshll.u32 %v11405_v26, 16 }
 0x1ce   : > { %9114 = vmatpush3.bf16.msra.mxu0 %v11217_v42  ;;  %9085 = vmatprep.mubr.msk.bf16.mxu0 %vm273_vm0, %v2680_v30  ;;  %v2687_v42 = vrot.slane %v2629_v33, 1  ;;  %v2706_v30 = vrot.slane %v11242_v62, 1  ;;  %v2713_v62 = vsel %vm1513_vm8, %v2711_v20, %v2712_v36  ;;  %v2718_v33 = vrot.slane %v11267_v59, 1  ;;  %v10210_v59 = vld [vmem:[#allocation7 + $0xf8] sm:$0xff]   ;;  %v11423_v20 = vld [vmem:[#allocation2 + $0xa8] sm:$0x1] }
 0x1cf   : > { %9115 = vmatprep.subr.bf16.mxu0 %v10204_v12 }
 0x1d0   : > { %v2689_v49 = vsel %vm1513_vm8, %v2687_v42, %v2688_v0  ;;  %v2707_v39 = vsel %vm1513_vm8, %v2705_v24, %v2706_v30  ;;  %v11365_v42 = vld [vmem:[#allocation2 + $0xe0] sm:$0xff]  ;;  %v11371_v0 = vld [vmem:[#allocation2 + $0x28] sm:$0x1] }
 0x1d1   : > { %v3325_v29 = vshll.u32 %v11371_v0, 16 }
 0x1d2   : > { %9116 = vmatpush3.bf16.msra.mxu0 %v10204_v12  ;;  %v2709_v12 = vrot.slane %v11244_v25, 1 }
 0x1d3   : > { %9117 = vmatprep.subr.bf16.mxu0 %v10205_v46 }
 0x1d4   : > { %v2710_v17 = vsel %vm1513_vm8, %v2708_v38, %v2709_v12  ;;  %v10214_v12 = vld [vmem:[#allocation7 + $0x118] sm:$0xff]  }
 0x1d5   : > { %9086 = vmatmul.mubr.msk.bf16.gmra.mrb[4].mxu0 %vm273_vm0, %v2683_v40  ;;  %v2639_v40 = vld [vmem:[#allocation2 + $0x100] sm:$0xfe] }
 0x1d6   : > { %9089 = vmatprep.mubr.msk.bf16.mxu0 %vm273_vm0, %v2686_v31  ;;  %9118 = vmatpush3.bf16.msra.mxu0 %v10205_v46  ;;  %v2715_v46 = vrot.slane %v11256_v23, 1  ;;  %v2717_v31 = vrot.slane %v2639_v40, 1  ;;  %v10209_v23 = vld [vmem:[#allocation7 + $0xf0] sm:$0xff]   ;;  %v3414_v40 = vshrl.u32 %v11349_v15, 16 }
 0x1d7   : > { %9119 = vmatprep.subr.bf16.mxu0 %v10206_v41 }
 0x1d8   : > { %v2716_v25 = vsel %vm1513_vm8, %v2714_v43, %v2715_v46 }
 0x1da   : > { %9120 = vmatpush3.bf16.msra.mxu0 %v10206_v41  ;;  %v2719_v41 = vsel %vm1513_vm8, %v2717_v31, %v2718_v33  ;;  %v3421_v33 = vshll.u32 %v11423_v20, 16 }
 0x1db   : > { %9153 = vmatprep.subr.bf16.mxu0 %v10207_v44 }
 0x1dd   : > { %9090 = vmatmul.mubr.msk.bf16.gmra.mrb[8].mxu0 %vm273_vm0, %v2689_v49  ;;  %v11380_v49 = vld [vmem:[#allocation2 + $0x38] sm:$0x1] }
 0x1de   : > { %9093 = vmatprep.mubr.msk.bf16.mxu0 %vm273_vm0, %v2692_v13  ;;  %v11382_v13 = vld [vmem:[#allocation2 + $0x48] sm:$0x1]  ;;  %v3337_v57 = vshll.u32 %v11380_v49, 16 }
 0x1df   : > { %v3349_v5 = vshll.u32 %v11382_v13, 16 }
 0x1e1   : > { %v3351_v35 = vrot.slane %v3349_v5, 1 }
 0x1e5   : > { %9094 = vmatmul.mubr.msk.bf16.gmra.mrb[12].mxu0 %vm273_vm0, %v2695_v63  ;;  %v11395_v63 = vld [vmem:[#allocation2 + $0x68] sm:$0x1] }
 0x1e6   : > { %9097 = vmatprep.mubr.msk.bf16.mxu0 %vm273_vm0, %v2698_v22  ;;  %v3373_v61 = vshll.u32 %v11395_v63, 16 }
 0x1e8   : > { %v3375_v60 = vrot.slane %v3373_v61, 1 }
 0x1ea   : > { %v3376_v27 = vsel %vm813_vm5, %v11211_v7, %v3375_v60  ;;  %v3416_v7 = vshll.u32 %v11349_v15, 16  ;;  %v11452_v60 = vld [vmem:[#allocation2 + $0xe8] sm:$0x1] }
 0x1ec   : > { %v3418_v31 = vrot.slane %v3416_v7, 1 }
 0x1ed   : > { %9098 = vmatmul.mubr.msk.bf16.gmra.mrb[16].mxu0 %vm273_vm0, %v2701_v50  ;;  %v10213_v50 = vld [vmem:[#allocation7 + $0x110] sm:$0xff]  }
 0x1ee   : > { %9101 = vmatprep.mubr.msk.bf16.mxu0 %vm273_vm0, %v2704_v11  ;;  %v11408_v11 = vld [vmem:[#allocation2 + $0x88] sm:$0x1] }
 0x1ef   : > { %v3397_v38 = vshll.u32 %v11408_v11, 16 }
 0x1f1   : > { %v3399_v19 = vrot.slane %v3397_v38, 1 }
 0x1f5   : > { %9102 = vmatmul.mubr.msk.bf16.gmra.mrb[20].mxu0 %vm273_vm0, %v2707_v39  ;;  %v3387_v39 = vrot.slane %v3385_v16, 1 }
 0x1f6   : > { %9105 = vmatprep.mubr.msk.bf16.mxu0 %vm273_vm0, %v2710_v17 }
 0x1f7   : > { %v3388_v36 = vsel %vm813_vm5, %v11213_v56, %v3387_v39  ;;  %v3476_v39 = vshll.u32 %v11373_v14, 16 }
 0x1fd   : > { %9106 = vmatmul.mubr.msk.bf16.gmra.mrb[24].mxu0 %vm273_vm0, %v2713_v62  ;;  %v3409_v62 = vshll.u32 %v11420_v45, 16 }
 0x1fe   : > { %9109 = vmatprep.mubr.msk.bf16.mxu0 %vm273_vm0, %v2716_v25 }
 0x205   : > { %9110 = vmatmul.mubr.msk.bf16.gmra.mrb[28].mxu0 %vm273_vm0, %v2719_v41 }
 0x206   : > { %9121 = vmatprep.mubr.msk.bf16.mxu0 %vm273_vm0, %v11117_v10  ;;  %v10211_v10 = vld [vmem:[#allocation7 + $0x100] sm:$0xff]  }
 0x20d   : > { %9122 = vmatmul.mubr.msk.bf16.vlgmr.msra.gmra.mrb[0].mxu0 %vm273_vm0, %v11119_v9  ;;  %v11341_v9 = vld [vmem:[#allocation2 + $0x80] sm:$0xff] }
 0x20e   : > { %9154 = vmatpush3.bf16.msra.mxu0 %v10207_v44  ;;  %9125 = vmatprep.mubr.msk.bf16.mxu0 %vm273_vm0, %v11160_v32  ;;  %v11347_v32 = vld [vmem:[#allocation2 + $0x90] sm:$0xff]  ;;  %v3327_v44 = vrot.slane %v3325_v29, 1  ;;  %v3390_v24 = vshrl.u32 %v11341_v9, 16 }
 0x20f   : > { %9155 = vmatprep.subr.bf16.mxu0 %v10208_v21  ;;  %v3402_v43 = vshrl.u32 %v11347_v32, 16 }
 0x210   : > { %v3328_v51 = vsel %vm813_vm5, %v11167_v52, %v3327_v44  ;;  %v3352_v52 = vsel %vm813_vm5, %v11191_v2, %v3351_v35  ;;  %v3364_v2 = vsel %vm813_vm5, %v11194_v3, %v3363_v6  ;;  %v3404_v3 = vshll.u32 %v11347_v32, 16 }
 0x211   : > { %v3464_v6 = vshll.u32 %v11365_v42, 16 }
 0x212   : > { %9156 = vmatpush3.bf16.msra.mxu0 %v10208_v21  ;;  %v3406_v46 = vrot.slane %v3404_v3, 1  ;;  %v3411_v21 = vrot.slane %v3409_v62, 1 }
 0x213   : > { %9157 = vmatprep.subr.bf16.mxu0 %v10209_v23 }
 0x214   : > { %v3407_v41 = vor.u32 %v3406_v46, %v3402_v43 }
 0x215   : > { %9126 = vmatmul.mubr.msk.bf16.gmra.mrb[4].mxu0 %vm273_vm0, %v11162_v47  ;;  %v11355_v47 = vld [vmem:[#allocation2 + $0xb0] sm:$0xff] }
 0x216   : > { %9129 = vmatprep.mubr.msk.bf16.mxu0 %vm273_vm0, %v11185_v8  ;;  %9158 = vmatpush3.bf16.msra.mxu0 %v10209_v23  ;;  %v11357_v8 = vld [vmem:[#allocation2 + $0xc0] sm:$0xff]  ;;  %v3428_v56 = vshll.u32 %v11355_v47, 16  ;;  %v3419_v23 = vor.u32 %v3418_v31, %v3414_v40  ;;  %v3426_v29 = vshrl.u32 %v11355_v47, 16  ;;  %v3500_v31 = vshll.u32 %v11384_v18, 16 }
 0x217   : > { %9159 = vmatprep.subr.bf16.mxu0 %v10210_v59  ;;  %v3438_v5 = vshrl.u32 %v11357_v8, 16 }
 0x218   : > { %v3430_v44 = vrot.slane %v3428_v56, 1  ;;  %v3502_v56 = vrot.slane %v3500_v31, 1  ;;  %v3794_v31 = vld [vmem:[#allocation2 + $0xd0] sm:$0xfe] }
 0x21a   : > { %9160 = vmatpush3.bf16.msra.mxu0 %v10210_v59  ;;  %v3423_v59 = vrot.slane %v3421_v33, 1 }
 0x21b   : > { %9193 = vmatprep.subr.bf16.mxu0 %v10211_v10 }
 0x21d   : > { %9130 = vmatmul.mubr.msk.bf16.gmra.mrb[8].mxu0 %vm273_vm0, %v11187_v55  ;;  %v11363_v55 = vld [vmem:[#allocation2 + $0xd0] sm:$0xff] }
 0x21e   : > { %9133 = vmatprep.mubr.msk.bf16.mxu0 %vm273_vm0, %v11341_v9 }
 0x225   : > { %9134 = vmatmul.mubr.msk.bf16.gmra.mrb[12].mxu0 %vm273_vm0, %v11347_v32  ;;  %v11438_v32 = vld [vmem:[#allocation2 + $0xc8] sm:$0x1] }
 0x226   : > { %9137 = vmatprep.mubr.msk.bf16.mxu0 %vm273_vm0, %v11349_v15  ;;  %v3412_v15 = vsel %vm813_vm5, %v3407_v41, %v3411_v21  ;;  %v3445_v35 = vshll.u32 %v11438_v32, 16  ;;  %v11475_v41 = vld [vmem:[#allocation2 + $0x118] sm:$0x1]  ;;  %v3498_v21 = vshrl.u32 %v11384_v18, 16 }
 0x22d   : > { %9138 = vmatmul.mubr.msk.bf16.gmra.mrb[16].mxu0 %vm273_vm0, %v11355_v47  ;;  %v3447_v47 = vrot.slane %v3445_v35, 1  ;;  %v3835_v35 = vrot.slane %v11380_v49, 1 }
 0x22e   : > { %9141 = vmatprep.mubr.msk.bf16.mxu0 %vm273_vm0, %v11357_v8 }
 0x235   : > { %9142 = vmatmul.mubr.msk.bf16.gmra.mrb[20].mxu0 %vm273_vm0, %v11363_v55 }
 0x236   : > { %9145 = vmatprep.mubr.msk.bf16.mxu0 %vm273_vm0, %v11365_v42 }
 0x23d   : > { %9146 = vmatmul.mubr.msk.bf16.gmra.mrb[24].mxu0 %vm273_vm0, %v11373_v14 }
 0x23e   : > { %9149 = vmatprep.mubr.msk.bf16.mxu0 %vm273_vm0, %v11057_v28  ;;  %v3339_v28 = vrot.slane %v3337_v57, 1 }
 0x240   : > { %v3340_v22 = vsel %vm813_vm5, %v11170_v53, %v3339_v28  ;;  %v3392_v53 = vshll.u32 %v11341_v9, 16  ;;  %v3440_v9 = vshll.u32 %v11357_v8, 16 }
 0x242   : > { %v3394_v30 = vrot.slane %v3392_v53, 1  ;;  %v3442_v28 = vrot.slane %v3440_v9, 1  ;;  %v3450_v53 = vshrl.u32 %v11363_v55, 16  ;;  %v3783_v9 = vld [vmem:[#allocation2 + $0x20] sm:$0xfe] }
 0x244   : > { %v3395_v17 = vor.u32 %v3394_v30, %v3390_v24  ;;  %v3443_v61 = vor.u32 %v3442_v28, %v3438_v5  ;;  %v3466_v24 = vrot.slane %v3464_v6, 1  ;;  %v3469_v30 = vshll.u32 %v11452_v60, 16  ;;  %v3784_v5 = vld [vmem:[#allocation2 + $0x30] sm:$0xfe]  ;;  %v3785_v28 = vld [vmem:[#allocation2 + $0x40] sm:$0xfe] }
 0x245   : > { %9150 = vmatmul.mubr.msk.bf16.gmra.mrb[28].mxu0 %vm273_vm0, %v11384_v18 }
 0x246   : > { %9161 = vmatprep.mubr.msk.bf16.mxu0 %vm273_vm0, %v3328_v51  ;;  %v3400_v25 = vsel %vm813_vm5, %v3395_v17, %v3399_v19  ;;  %v3424_v51 = vsel %vm813_vm5, %v3419_v23, %v3423_v59  ;;  %v3448_v16 = vsel %vm813_vm5, %v3443_v61, %v3447_v47  ;;  %v11463_v17 = vld [vmem:[#allocation2 + $0xf8] sm:$0x1]  ;;  %v11465_v19 = vld [vmem:[#allocation2 + $0x108] sm:$0x1]  ;;  %v3505_v23 = vshll.u32 %v11475_v41, 16 }
 0x247   : > { %v3481_v43 = vshll.u32 %v11463_v17, 16  ;;  %v3493_v62 = vshll.u32 %v11465_v19, 16  ;;  %v3786_v61 = vld [vmem:[#allocation2 + $0x50] sm:$0xfe]  ;;  %v3787_v47 = vld [vmem:[#allocation2 + $0x60] sm:$0xfe] }
 0x248   : > { %v3840_v6 = vrot.slane %v3786_v61, 1  ;;  %v444_v61 = vld [vmem:[#allocation3 + $0x48] sm:$0x1] }
 0x249   : > { %v3483_v40 = vrot.slane %v3481_v43, 1  ;;  %v3495_v33 = vrot.slane %v3493_v62, 1  ;;  %v3793_v43 = vld [vmem:[#allocation2 + $0xc0] sm:$0xfe] }
 0x24b   : > { %v3496_v59 = vsel %vm813_vm5, %v11277_v58, %v3495_v33  ;;  %v3834_v58 = vrot.slane %v3784_v5, 1  ;;  %v3795_v33 = vld [vmem:[#allocation2 + $0xe0] sm:$0xfe]  ;;  %v3877_v5 = vrot.slane %v11475_v41, 1 }
 0x24d   : > { %9162 = vmatmul.mubr.msk.bf16.vlgmr.msra.gmra.mrb[0].mxu0 %vm273_vm0, %v3340_v22  ;;  %v3431_v22 = vor.u32 %v3430_v44, %v3426_v29  ;;  %v3507_v29 = vrot.slane %v3505_v23, 1  ;;  %v3831_v44 = vrot.slane %v3783_v9, 1  ;;  %v3868_v23 = vrot.slane %v11452_v60, 1  ;;  %v3797_v9 = vld [vmem:[#allocation2 + $0x100] sm:$0xfe] }
 0x24e   : > { %9194 = vmatpush3.bf16.msra.mxu0 %v10211_v10  ;;  %9165 = vmatprep.mubr.msk.bf16.mxu0 %vm273_vm0, %v3352_v52  ;;  %v11435_v10 = vld [vmem:[#allocation2 + $0xb8] sm:$0x1]  ;;  %v3452_v52 = vshll.u32 %v11363_v55, 16  ;;  %v3471_v55 = vrot.slane %v3469_v30, 1 }
 0x24f   : > { %9195 = vmatprep.subr.bf16.mxu0 %v10212_v54  ;;  %v3433_v57 = vshll.u32 %v11435_v10, 16  ;;  %v3859_v62 = vrot.slane %v11435_v10, 1 }
 0x251   : > { %v3435_v34 = vrot.slane %v3433_v57, 1  ;;  %v3832_v57 = vrot.slane %v11371_v0, 1 }
 0x252   : > { %9196 = vmatpush3.bf16.msra.mxu0 %v10212_v54  ;;  %v11449_v54 = vld [vmem:[#allocation2 + $0xd8] sm:$0x1] }
 0x253   : > { %9197 = vmatprep.subr.bf16.mxu0 %v10213_v50  ;;  %v3436_v8 = vsel %vm813_vm5, %v3431_v22, %v3435_v34  ;;  %v3833_v18 = vsel %vm1513_vm8, %v3831_v44, %v3832_v57  ;;  %v3837_v22 = vrot.slane %v3785_v28, 1  ;;  %v3838_v34 = vrot.slane %v11382_v13, 1 }
 0x254   : > { %v3873_v44 = vrot.slane %v3797_v9, 1  ;;  %v3874_v57 = vrot.slane %v11465_v19, 1 }
 0x255   : > { %9166 = vmatmul.mubr.msk.bf16.gmra.mrb[4].mxu0 %vm273_vm0, %v3364_v2  ;;  %v3457_v2 = vshll.u32 %v11449_v54, 16  ;;  %v3839_v0 = vsel %vm1513_vm8, %v3837_v22, %v3838_v34 }
 0x256   : > { %9169 = vmatprep.mubr.msk.bf16.mxu0 %vm273_vm0, %v3376_v27  ;;  %9198 = vmatpush3.bf16.msra.mxu0 %v10213_v50  ;;  %v3454_v50 = vrot.slane %v3452_v52, 1  ;;  %v3462_v27 = vshrl.u32 %v11365_v42, 16  ;;  %v3474_v42 = vshrl.u32 %v11373_v14, 16  ;;  %v3836_v52 = vsel %vm1513_vm8, %v3834_v58, %v3835_v35  ;;  %v390_v58 = vld [vmem:[#allocation3 + $0x20] sm:$0x1] }
 0x257   : > { %9199 = vmatprep.subr.bf16.mxu0 %v10214_v12  ;;  %v3875_v60 = vsel %vm1513_vm8, %v3873_v44, %v3874_v57  ;;  %v435_v35 = vld [vmem:[#allocation3 + $0x18] sm:$0x1]  ;;  %v391_v22 = vsel %vm10652_vm3, 0, %v390_v58  ;;  %v420_v57 = vld [vmem:[#allocation3 + $0xc0] sm:$0x1] }
 0x258   : > { %v3455_v38 = vor.u32 %v3454_v50, %v3450_v53  ;;  %v3467_v3 = vor.u32 %v3466_v24, %v3462_v27  ;;  %v3843_v53 = vrot.slane %v3787_v47, 1  ;;  %v3844_v50 = vrot.slane %v11395_v63, 1  ;;  %392 = vst [vmem:[#allocation3 + $0x20] sm:$0x1] %v391_v22  ;;  %v426_v58 = vld [vmem:[#allocation3 + $0xe0] sm:$0x1] }
 0x259   : > { %v3847_v24 = vrot.slane %v11405_v26, 1  ;;  %v436_v34 = vsel %vm10657_vm6, 0, %v435_v35  ;;  %v445_v47 = vsel %vm10657_vm6, 0, %v444_v61  ;;  %v427_v35 = vsel %vm10652_vm3, 0, %v426_v58  ;;  %v432_v61 = vld [vmem:[#allocation3 + $0x100] sm:$0x1] }
 0x25a   : > { %9200 = vmatpush3.bf16.msra.mxu0 %v10214_v12  ;;  %v3459_v12 = vrot.slane %v3457_v2, 1  ;;  %v3472_v46 = vsel %vm813_vm5, %v3467_v3, %v3471_v55  ;;  %v3845_v13 = vsel %vm1513_vm8, %v3843_v53, %v3844_v50  ;;  %v3788_v2 = vld [vmem:[#allocation2 + $0x70] sm:$0xfe]  ;;  %v3853_v55 = vrot.slane %v11420_v45, 1  ;;  %437 = vst [vmem:[#allocation3 + $0x18] sm:$0x1] %v436_v34 }
 0x25b   : > { %v3846_v27 = vrot.slane %v3788_v2, 1  ;;  %446 = vst [vmem:[#allocation3 + $0x48] sm:$0x1] %v445_v47  ;;  %428 = vst [vmem:[#allocation3 + $0xe0] sm:$0x1] %v427_v35 }
 0x25c   : > { %v3460_v7 = vsel %vm813_vm5, %v3455_v38, %v3459_v12  ;;  %v3850_v38 = vrot.slane %v11408_v11, 1  ;;  %v3790_v12 = vld [vmem:[#allocation2 + $0x90] sm:$0xfe]  ;;  %v423_v34 = vld [vmem:[#allocation3 + $0xd0] sm:$0x1] }
 0x25d   : > { %9170 = vmatmul.mubr.msk.bf16.gmra.mrb[8].mxu0 %vm273_vm0, %v3388_v36  ;;  %v3478_v36 = vrot.slane %v3476_v39, 1  ;;  %v3791_v39 = vld [vmem:[#allocation2 + $0xa0] sm:$0xfe]  ;;  %v3852_v3 = vrot.slane %v3790_v12, 1  ;;  %v480_v47 = vld [vmem:[#allocation3 + $0x108] sm:$0x1] }
 0x25e   : > { %9173 = vmatprep.mubr.msk.bf16.mxu0 %vm273_vm0, %v3400_v25 }
 0x25f   : > { %v3479_v25 = vor.u32 %v3478_v36, %v3474_v42  ;;  %v3856_v42 = vrot.slane %v11423_v20, 1  ;;  %v3854_v26 = vsel %vm1513_vm8, %v3852_v3, %v3853_v55  ;;  %v3792_v36 = vld [vmem:[#allocation2 + $0xb0] sm:$0xfe]  ;;  %v399_v3 = vld [vmem:[#allocation3 + $0x50] sm:$0x1]  ;;  %v10218_v55 = vld [vmem:[#allocation9 + $0x38] sm:$0xff]  }
 0x261   : > { %v3484_v14 = vsel %vm813_vm5, %v3479_v25, %v3483_v40  ;;  %v3861_v25 = vrot.slane %v3793_v43, 1  ;;  %v3862_v40 = vrot.slane %v11438_v32, 1 }
 0x263   : > { %v3863_v20 = vsel %vm1513_vm8, %v3861_v25, %v3862_v40  ;;  %v453_v40 = vld [vmem:[#allocation3 + $0x78] sm:$0x1] }
 0x265   : > { %9174 = vmatmul.mubr.msk.bf16.gmra.mrb[12].mxu0 %vm273_vm0, %v3412_v15  ;;  %v3503_v15 = vor.u32 %v3502_v56, %v3498_v21  ;;  %v3865_v21 = vrot.slane %v11449_v54, 1  ;;  %v3867_v56 = vrot.slane %v3795_v33, 1 }
 0x266   : > { %9177 = vmatprep.mubr.msk.bf16.mxu0 %vm273_vm0, %v3424_v51 }
 0x267   : > { %v3508_v51 = vsel %vm813_vm5, %v3503_v15, %v3507_v29  ;;  %v3869_v32 = vsel %vm1513_vm8, %v3867_v56, %v3868_v23  ;;  %v3871_v29 = vrot.slane %v11463_v17, 1  ;;  %v438_v17 = vld [vmem:[#allocation3 + $0x28] sm:$0x1] }
 0x268   : > { %v439_v19 = vsel %vm10657_vm6, 0, %v438_v17  ;;  %v462_v56 = vld [vmem:[#allocation3 + $0xa8] sm:$0x1] }
 0x269   : > { %440 = vst [vmem:[#allocation3 + $0x28] sm:$0x1] %v439_v19  ;;  %v463_v23 = vsel %vm10657_vm6, 0, %v462_v56  ;;  %v474_v19 = vld [vmem:[#allocation3 + $0xe8] sm:$0x1]  ;;  %v4390_v56 = vld [vmem:[#allocation3 + $0x20] sm:$0xff] }
 0x26a   : > { %464 = vst [vmem:[#allocation3 + $0xa8] sm:$0x1] %v463_v23  ;;  %v475_v22 = vsel %vm10657_vm6, 0, %v474_v19 }
 0x26b   : > { %476 = vst [vmem:[#allocation3 + $0xe8] sm:$0x1] %v475_v22 }
 0x26d   : > { %9178 = vmatmul.mubr.msk.bf16.gmra.mrb[16].mxu0 %vm273_vm0, %v3436_v8  ;;  %v3841_v8 = vrot.slane %v11393_v37, 1  ;;  %v3848_v37 = vsel %vm1513_vm8, %v3846_v27, %v3847_v24  ;;  %v450_v27 = vld [vmem:[#allocation3 + $0x68] sm:$0x1]  ;;  %v11550_v24 = vld [vmem:[#allocation3] sm:$0xff] }
 0x26e   : > { %9181 = vmatprep.mubr.msk.bf16.mxu0 %vm273_vm0, %v3448_v16  ;;  %v3789_v16 = vld [vmem:[#allocation2 + $0x80] sm:$0xfe] }
 0x26f   : > { %v3842_v49 = vsel %vm1513_vm8, %v3840_v6, %v3841_v8  ;;  %v3849_v30 = vrot.slane %v3789_v16, 1  ;;  %v441_v6 = vld [vmem:[#allocation3 + $0x38] sm:$0x1]  ;;  %v396_v8 = vld [vmem:[#allocation3 + $0x40] sm:$0x1]  ;;  %v10217_v16 = vld [vmem:[#allocation9 + $0x30] sm:$0xff]  }
 0x270   : > { %v442_v53 = vsel %vm10657_vm6, 0, %v441_v6  ;;  %v397_v50 = vsel %vm10652_vm3, 0, %v396_v8  ;;  %v433_v6 = vsel %vm10652_vm3, 0, %v432_v61  ;;  %v481_v8 = vsel %vm10657_vm6, 0, %v480_v47  ;;  %v4405_v61 = vld [vmem:[#allocation3 + $0x48] sm:$0x1] }
 0x271   : > { %v3851_v63 = vsel %vm1513_vm8, %v3849_v30, %v3850_v38  ;;  %443 = vst [vmem:[#allocation3 + $0x38] sm:$0x1] %v442_v53  ;;  %398 = vst [vmem:[#allocation3 + $0x40] sm:$0x1] %v397_v50  ;;  %v451_v30 = vsel %vm10657_vm6, 0, %v450_v27 }
 0x272   : > { %v447_v38 = vld [vmem:[#allocation3 + $0x58] sm:$0x1]  ;;  %452 = vst [vmem:[#allocation3 + $0x68] sm:$0x1] %v451_v30  ;;  %434 = vst [vmem:[#allocation3 + $0x100] sm:$0x1] %v433_v6 }
 0x273   : > { %v448_v12 = vsel %vm10657_vm6, 0, %v447_v38  ;;  %482 = vst [vmem:[#allocation3 + $0x108] sm:$0x1] %v481_v8  ;;  %v429_v53 = vld [vmem:[#allocation3 + $0xf0] sm:$0x1] }
 0x274   : > { %449 = vst [vmem:[#allocation3 + $0x58] sm:$0x1] %v448_v12  ;;  %v430_v50 = vsel %vm10652_vm3, 0, %v429_v53 }
 0x275   : > { %9182 = vmatmul.mubr.msk.bf16.gmra.mrb[20].mxu0 %vm273_vm0, %v3460_v7  ;;  %v3855_v7 = vrot.slane %v3791_v39, 1  ;;  %431 = vst [vmem:[#allocation3 + $0xf0] sm:$0x1] %v430_v50 }
 0x276   : > { %9185 = vmatprep.mubr.msk.bf16.mxu0 %vm273_vm0, %v3472_v46  ;;  %v3858_v46 = vrot.slane %v3792_v36, 1 }
 0x277   : > { %v3857_v11 = vsel %vm1513_vm8, %v3855_v7, %v3856_v42  ;;  %v4521_v7 = vshrl.u32 %v11550_v24, 16  ;;  %v400_v42 = vsel %vm10652_vm3, 0, %v399_v3 }
 0x278   : > { %v3860_v45 = vsel %vm1513_vm8, %v3858_v46, %v3859_v62  ;;  %401 = vst [vmem:[#allocation3 + $0x50] sm:$0x1] %v400_v42  ;;  %v456_v62 = vld [vmem:[#allocation3 + $0x88] sm:$0x1] }
 0x279   : > { %v457_v25 = vsel %vm10657_vm6, 0, %v456_v62  ;;  %v4393_v62 = vld [vmem:[#allocation3 + $0x28] sm:$0x1] }
 0x27a   : > { %458 = vst [vmem:[#allocation3 + $0x88] sm:$0x1] %v457_v25 }
 0x27d   : > { %9186 = vmatmul.mubr.msk.bf16.gmra.mrb[24].mxu0 %vm273_vm0, %v3484_v14  ;;  %v3864_v14 = vrot.slane %v3794_v31, 1  ;;  %v454_v31 = vsel %vm10657_vm6, 0, %v453_v40 }
 0x27e   : > { %9189 = vmatprep.mubr.msk.bf16.mxu0 %vm273_vm0, %v3496_v59  ;;  %v3796_v59 = vld [vmem:[#allocation2 + $0xf0] sm:$0xfe]  ;;  %455 = vst [vmem:[#allocation3 + $0x78] sm:$0x1] %v454_v31 }
 0x27f   : > { %v3866_v10 = vsel %vm1513_vm8, %v3864_v14, %v3865_v21  ;;  %v3870_v15 = vrot.slane %v3796_v59, 1  ;;  %v405_v14 = vld [vmem:[#allocation3 + $0x70] sm:$0x1] }
 0x280   : > { %v406_v21 = vsel %vm10652_vm3, 0, %v405_v14 }
 0x281   : > { %v3872_v54 = vsel %vm1513_vm8, %v3870_v15, %v3871_v29  ;;  %407 = vst [vmem:[#allocation3 + $0x70] sm:$0x1] %v406_v21  ;;  %v411_v15 = vld [vmem:[#allocation3 + $0x90] sm:$0x1]  ;;  %v11578_v29 = vld [vmem:[#allocation9] sm:$0xff]  }
 0x282   : > { %v412_v44 = vsel %vm10652_vm3, 0, %v411_v15 }
 0x283   : > { %413 = vst [vmem:[#allocation3 + $0x90] sm:$0x1] %v412_v44 }
 0x285   : > { %9190 = vmatmul.mubr.msk.bf16.gmra.mrb[28].mxu0 %vm273_vm0, %v3508_v51  ;;  %v3798_v51 = vld [vmem:[#allocation2 + $0x110] sm:$0xfe] }
 0x286   : > { %9201 = vmatprep.mubr.msk.bf16.mxu0 %vm273_vm0, %v3833_v18  ;;  %v3876_v18 = vrot.slane %v3798_v51, 1 }
 0x288   : > { %v3878_v28 = vsel %vm1513_vm8, %v3876_v18, %v3877_v5  ;;  %v465_v18 = vld [vmem:[#allocation3 + $0xb8] sm:$0x1] }
 0x289   : > { %v466_v5 = vsel %vm10657_vm6, 0, %v465_v18 }
 0x28a   : > { %467 = vst [vmem:[#allocation3 + $0xb8] sm:$0x1] %v466_v5 }
 0x28d   : > { %9202 = vmatmul.mubr.msk.bf16.vlgmr.msra.gmra.mrb[0].mxu0 %vm273_vm0, %v3836_v52  ;;  %v387_v52 = vld [vmem:[#allocation3 + $0x10] sm:$0x1] }
 0x28e   : > { %9205 = vmatprep.mubr.msk.bf16.mxu0 %vm273_vm0, %v3839_v0  ;;  %v388_v41 = vsel %vm10652_vm3, 0, %v387_v52  ;;  %v10215_v0 = vld [vmem:[#allocation9 + $0x20] sm:$0xff]   ;;  %v471_v52 = vld [vmem:[#allocation3 + $0xd8] sm:$0x1] }
 0x28f   : > { %389 = vst [vmem:[#allocation3 + $0x10] sm:$0x1] %v388_v41  ;;  %9233 = vmatprep.subr.bf16.mxu1 %v10215_v0  ;;  %v424_v41 = vsel %vm10652_vm3, 0, %v423_v34 }
 0x290   : > { %9234 = vmatpush3.bf16.msra.mxu1 %v10215_v0  ;;  %v472_v0 = vsel %vm10657_vm6, 0, %v471_v52  ;;  %425 = vst [vmem:[#allocation3 + $0xd0] sm:$0x1] %v424_v41 }
 0x291   : > { %473 = vst [vmem:[#allocation3 + $0xd8] sm:$0x1] %v472_v0 }
 0x295   : > { %9206 = vmatmul.mubr.msk.bf16.gmra.mrb[4].mxu0 %vm273_vm0, %v3842_v49  ;;  %v393_v49 = vld [vmem:[#allocation3 + $0x30] sm:$0x1] }
 0x296   : > { %9209 = vmatprep.mubr.msk.bf16.mxu0 %vm273_vm0, %v3845_v13  ;;  %v10216_v13 = vld [vmem:[#allocation9 + $0x28] sm:$0xff]   ;;  %v394_v2 = vsel %vm10652_vm3, 0, %v393_v49  ;;  %v477_v49 = vld [vmem:[#allocation3 + $0xf8] sm:$0x1]  ;;  %v4384_v15 = vld [vmem:[#allocation3 + $0x10] sm:$0xff] }
 0x297   : > { %395 = vst [vmem:[#allocation3 + $0x30] sm:$0x1] %v394_v2  ;;  %9235 = vmatprep.subr.bf16.mxu1 %v10216_v13  ;;  %v11610_v2 = vld [vmem:[%s12582_s2] ss:$0 sm:$0xff] }
 0x298   : > { %9236 = vmatpush3.bf16.msra.mxu1 %v10216_v13  ;;  %v478_v13 = vsel %vm10657_vm6, 0, %v477_v49 }
 0x299   : > { %9237 = vmatprep.subr.bf16.mxu1 %v10217_v16  ;;  %479 = vst [vmem:[#allocation3 + $0xf8] sm:$0x1] %v478_v13 }
 0x29c   : > { %9238 = vmatpush3.bf16.msra.mxu1 %v10217_v16 }
 0x29d   : > { %9210 = vmatmul.mubr.msk.bf16.gmra.mrb[8].mxu0 %vm273_vm0, %v3848_v37  ;;  %v4523_v37 = vshll.u32 %v11550_v24, 16  ;;  %9239 = vmatprep.subr.bf16.mxu1 %v10218_v55 }
 0x29e   : > { %9213 = vmatprep.mubr.msk.bf16.mxu0 %vm273_vm0, %v3851_v63  ;;  %v402_v63 = vld [vmem:[#allocation3 + $0x60] sm:$0x1] }
 0x29f   : > { %v403_v39 = vsel %vm10652_vm3, 0, %v402_v63 }
 0x2a0   : > { %404 = vst [vmem:[#allocation3 + $0x60] sm:$0x1] %v403_v39  ;;  %9240 = vmatpush3.bf16.msra.mxu1 %v10218_v55 }
 0x2a1   : > { %9273 = vmatprep.subr.bf16.mxu1 %v11578_v29 }
 0x2a5   : > { %9214 = vmatmul.mubr.msk.bf16.gmra.mrb[12].mxu0 %vm273_vm0, %v3854_v26  ;;  %v4504_v26 = vld [vmem:[#allocation3 + $0x8] sm:$0x1] }
 0x2a6   : > { %9217 = vmatprep.mubr.msk.bf16.mxu0 %vm273_vm0, %v3857_v11  ;;  %v4525_v11 = vrot.slane %v4523_v37, 1  ;;  %v4528_v36 = vshll.u32 %v4504_v26, 16 }
 0x2a8   : > { %v4526_v43 = vor.u32 %v4525_v11, %v4521_v7  ;;  %v4530_v46 = vrot.slane %v4528_v36, 1 }
 0x2ad   : > { %9218 = vmatmul.mubr.msk.bf16.gmra.mrb[16].mxu0 %vm273_vm0, %v3860_v45  ;;  %v4531_v45 = vsel %vm813_vm5, %v4526_v43, %v4530_v46 }
 0x2ae   : > { %9221 = vmatprep.mubr.msk.bf16.mxu0 %vm273_vm0, %v3863_v20  ;;  %v408_v20 = vld [vmem:[#allocation3 + $0x80] sm:$0x1]  ;;  %9241 = vmatprep.mubr.msk.bf16.mxu1 %vm273_vm0, %v4531_v45 }
 0x2af   : > { %v409_v33 = vsel %vm10652_vm3, 0, %v408_v20 }
 0x2b0   : > { %410 = vst [vmem:[#allocation3 + $0x80] sm:$0x1] %v409_v33  ;;  %v4387_v33 = vld [vmem:[#allocation3 + $0x18] sm:$0x1] }
 0x2b5   : > { %9222 = vmatmul.mubr.msk.bf16.gmra.mrb[20].mxu0 %vm273_vm0, %v3866_v10  ;;  %v459_v10 = vld [vmem:[#allocation3 + $0x98] sm:$0x1] }
 0x2b6   : > { %9225 = vmatprep.mubr.msk.bf16.mxu0 %vm273_vm0, %v3869_v32  ;;  %v414_v32 = vld [vmem:[#allocation3 + $0xa0] sm:$0x1]  ;;  %v460_v59 = vsel %vm10657_vm6, 0, %v459_v10 }
 0x2b7   : > { %v415_v9 = vsel %vm10652_vm3, 0, %v414_v32  ;;  %461 = vst [vmem:[#allocation3 + $0x98] sm:$0x1] %v460_v59 }
 0x2b8   : > { %416 = vst [vmem:[#allocation3 + $0xa0] sm:$0x1] %v415_v9 }
 0x2bd   : > { %9226 = vmatmul.mubr.msk.bf16.gmra.mrb[24].mxu0 %vm273_vm0, %v3872_v54  ;;  %v468_v54 = vld [vmem:[#allocation3 + $0xc8] sm:$0x1] }
 0x2be   : > { %9229 = vmatprep.mubr.msk.bf16.mxu0 %vm273_vm0, %v3875_v60  ;;  %v421_v60 = vsel %vm10652_vm3, 0, %v420_v57  ;;  %v469_v51 = vsel %vm10657_vm6, 0, %v468_v54 }
 0x2bf   : > { %422 = vst [vmem:[#allocation3 + $0xc0] sm:$0x1] %v421_v60  ;;  %470 = vst [vmem:[#allocation3 + $0xc8] sm:$0x1] %v469_v51 }
 0x2c5   : > { %9230 = vmatmul.mubr.msk.bf16.gmra.mrb[28].mxu0 %vm273_vm0, %v3878_v28  ;;  %v417_v28 = vld [vmem:[#allocation3 + $0xb0] sm:$0x1] }
 0x2c6   : > { %v418_v17 = vsel %vm10652_vm3, 0, %v417_v28 }
 0x2c7   : > { %419 = vst [vmem:[#allocation3 + $0xb0] sm:$0x1] %v418_v17 }
 0x360   : > { %v9203_v16 = vpop.f32.mrb[0].mxu0 }
 0x361   : > { %v4162_v27 = vadd.f32 %v9203_v16, %v11610_v2  ;;  %v3994_v30 = vpop.f32.mrb[1].mxu0  ;;  %v4399_v16 = vld [vmem:[#allocation3 + $0x38] sm:$0x1] }
 0x362   : > { %v4160_v38 = vadd.f32 %v11610_v2, %v3994_v30  ;;  %v9204_v37 = vpop.f32.mrb[2].mxu0 }
 0x363   : > { %v4163_v63 = vadd.f32 %v9204_v37, %v11610_v2  ;;  %v3997_v12 = vpop.f32.mrb[3].mxu0  ;;  %v4194_v4 = vmax.f32 %v4162_v27, 0.0  ;;  %v4402_v37 = vld [vmem:[#allocation3 + $0x40] sm:$0xff] }
 0x364   : > { %v4161_v39 = vadd.f32 %v11610_v2, %v3997_v12  ;;  %v4192_v55 = vmax.f32 %v4160_v38, 0.0 }
 0x365   : > { %v4195_v3 = vmax.f32 %v4163_v63, 0.0 }
 0x366   : > { %v4193_v7 = vmax.f32 %v4161_v39, 0.0 }
 0x367   : > { %v4225_v42 = vpack.c.bf16 %v4195_v3, %v4194_v4 }
 0x368   : > { %v4224_v26 = vpack.c.bf16 %v4193_v7, %v4192_v55  ;;  %v9207_v11 = vpop.f32.mrb[4].mxu0  ;;  %v4396_v7 = vld [vmem:[#allocation3 + $0x30] sm:$0xff] }
 0x369   : > { %v4248_v36 = vshrl.u32 %v4225_v42, 16  ;;  %v4166_v43 = vadd.f32 %v9207_v11, %v11610_v2  ;;  %v4010_v46 = vpop.f32.mrb[5].mxu0  ;;  %v4251_v31 = vshll.u32 %v4225_v42, 16 }
 0x36a   : > { %v4241_v25 = vshrl.u32 %v4224_v26, 16  ;;  %v4164_v40 = vadd.f32 %v11610_v2, %v4010_v46  ;;  %v9208_v45 = vpop.f32.mrb[6].mxu0  ;;  %v4244_v10 = vshll.u32 %v4224_v26, 16 }
 0x36b   : > { %v4250_v20 = vrot.slane %v4248_v36, 7  ;;  %v4167_v14 = vadd.f32 %v9208_v45, %v11610_v2  ;;  %v4013_v21 = vpop.f32.mrb[7].mxu0  ;;  %v4198_v44 = vmax.f32 %v4166_v43, 0.0 }
 0x36c   : > { %v4243_v23 = vrot.slane %v4241_v25, 7  ;;  %v4165_v32 = vadd.f32 %v11610_v2, %v4013_v21  ;;  %v4196_v51 = vmax.f32 %v4164_v40, 0.0 }
 0x36d   : > { %v4253_v59 = vor.u32 %v4251_v31, %v4250_v20  ;;  %v4394_v9 = vsel %vm10652_vm3, %v4250_v20, %v4393_v62  ;;  %v4199_v57 = vmax.f32 %v4167_v14, 0.0 }
 0x36e   : > { %4395 = vst [vmem:[#allocation3 + $0x28] sm:$0x1] %v4394_v9  ;;  %v4246_v54 = vor.u32 %v4244_v10, %v4243_v23  ;;  %v4388_v60 = vsel %vm10652_vm3, %v4243_v23, %v4387_v33  ;;  %v4197_v18 = vmax.f32 %v4165_v32, 0.0 }
 0x36f   : > { %v11626_v5 = vsel %vm10693_vm7, %v4253_v59, %v4390_v56  ;;  %4389 = vst [vmem:[#allocation3 + $0x18] sm:$0x1] %v4388_v60  ;;  %v4227_v28 = vpack.c.bf16 %v4199_v57, %v4198_v44  ;;  %v4417_v59 = vld [vmem:[#allocation3 + $0x68] sm:$0x1] }
 0x370   : > { %4392 = vst [vmem:[#allocation3 + $0x20] sm:$0xff] %v11626_v5  ;;  %v11631_v17 = vsel %vm10693_vm7, %v4246_v54, %v4384_v15  ;;  %v4226_v58 = vpack.c.bf16 %v4197_v18, %v4196_v51  ;;  %v9211_v19 = vpop.f32.mrb[8].mxu0  ;;  %v4547_v35 = vshll.u32 %v11626_v5, 16  ;;  %v4545_v0 = vshrl.u32 %v11626_v5, 16 }
 0x371   : > { %4386 = vst [vmem:[#allocation3 + $0x10] sm:$0xff] %v11631_v17  ;;  %v4262_v22 = vshrl.u32 %v4227_v28, 16  ;;  %v4265_v34 = vshll.u32 %v4227_v28, 16  ;;  %v4170_v52 = vadd.f32 %v9211_v19, %v11610_v2  ;;  %v4026_v41 = vpop.f32.mrb[9].mxu0  ;;  %v4533_v53 = vshrl.u32 %v11631_v17, 16  ;;  %v10220_v28 = vld [vmem:[#allocation9 + $0x8] sm:$0xff]  }
 0x372   : > { %v4255_v47 = vshrl.u32 %v4226_v58, 16  ;;  %v4168_v6 = vadd.f32 %v11610_v2, %v4026_v41  ;;  %v9212_v8 = vpop.f32.mrb[10].mxu0  ;;  %v4535_v50 = vshll.u32 %v11631_v17, 16  ;;  %v4258_v13 = vshll.u32 %v4226_v58, 16  ;;  %v4411_v19 = vld [vmem:[#allocation3 + $0x58] sm:$0x1] }
 0x373   : > { %v4264_v49 = vrot.slane %v4262_v22, 7  ;;  %v4171_v27 = vadd.f32 %v9212_v8, %v11610_v2  ;;  %v4029_v30 = vpop.f32.mrb[11].mxu0  ;;  %v4549_v38 = vrot.slane %v4547_v35, 1  ;;  %v4202_v12 = vmax.f32 %v4170_v52, 0.0  ;;  %v4414_v41 = vld [vmem:[#allocation3 + $0x60] sm:$0xff] }
 0x374   : > { %v4257_v63 = vrot.slane %v4255_v47, 7  ;;  %v4169_v39 = vadd.f32 %v11610_v2, %v4029_v30  ;;  %v4537_v4 = vrot.slane %v4535_v50, 1  ;;  %v4200_v42 = vmax.f32 %v4168_v6, 0.0  ;;  %v4408_v50 = vld [vmem:[#allocation3 + $0x50] sm:$0xff] }
 0x375   : > { %v4267_v3 = vor.u32 %v4265_v34, %v4264_v49  ;;  %v4406_v55 = vsel %vm10652_vm3, %v4264_v49, %v4405_v61  ;;  %v4203_v26 = vmax.f32 %v4171_v27, 0.0  ;;  %v11644_v11 = vld [vmem:[#allocation3 + $0x28] sm:$0x1]  ;;  %v4550_v25 = vor.u32 %v4549_v38, %v4545_v0 }
 0x376   : > { %4407 = vst [vmem:[#allocation3 + $0x48] sm:$0x1] %v4406_v55  ;;  %v4260_v36 = vor.u32 %v4258_v13, %v4257_v63  ;;  %v4400_v43 = vsel %vm10652_vm3, %v4257_v63, %v4399_v16  ;;  %v4201_v46 = vmax.f32 %v4169_v39, 0.0  ;;  %v11648_v62 = vld [vmem:[#allocation3 + $0x18] sm:$0x1]  ;;  %v4538_v20 = vor.u32 %v4537_v4, %v4533_v53 }
 0x377   : > { %v11652_v40 = vsel %vm10693_vm7, %v4267_v3, %v4402_v37  ;;  %4401 = vst [vmem:[#allocation3 + $0x38] sm:$0x1] %v4400_v43  ;;  %v4229_v45 = vpack.c.bf16 %v4203_v26, %v4202_v12  ;;  %v4540_v31 = vshll.u32 %v11648_v62, 16  ;;  %v4552_v56 = vshll.u32 %v11644_v11, 16  ;;  %v10221_v12 = vld [vmem:[#allocation9 + $0x10] sm:$0xff]  }
 0x378   : > { %4404 = vst [vmem:[#allocation3 + $0x40] sm:$0xff] %v11652_v40  ;;  %v11658_v33 = vsel %vm10693_vm7, %v4260_v36, %v4396_v7  ;;  %v4228_v14 = vpack.c.bf16 %v4201_v46, %v4200_v42  ;;  %v9215_v21 = vpop.f32.mrb[12].mxu0  ;;  %v4569_v23 = vshrl.u32 %v11652_v40, 16  ;;  %v4571_v3 = vshll.u32 %v11652_v40, 16 }
 0x379   : > { %4398 = vst [vmem:[#allocation3 + $0x30] sm:$0xff] %v11658_v33  ;;  %v4276_v10 = vshrl.u32 %v4229_v45, 16  ;;  %v4279_v32 = vshll.u32 %v4229_v45, 16  ;;  %v4174_v9 = vadd.f32 %v9215_v21, %v11610_v2  ;;  %v4042_v15 = vpop.f32.mrb[13].mxu0  ;;  %v4542_v44 = vrot.slane %v4540_v31, 1 }
 0x37a   : > { %v4269_v57 = vshrl.u32 %v4228_v14, 16  ;;  %v4272_v54 = vshll.u32 %v4228_v14, 16  ;;  %v4172_v60 = vadd.f32 %v11610_v2, %v4042_v15  ;;  %v9216_v51 = vpop.f32.mrb[14].mxu0  ;;  %v4554_v18 = vrot.slane %v4552_v56, 1  ;;  %v4423_v56 = vld [vmem:[#allocation3 + $0x78] sm:$0x1] }
 0x37b   : > { %v4278_v58 = vrot.slane %v4276_v10, 7  ;;  %v4206_v35 = vmax.f32 %v4174_v9, 0.0  ;;  %v4175_v22 = vadd.f32 %v9216_v51, %v11610_v2  ;;  %v4045_v34 = vpop.f32.mrb[15].mxu0  ;;  %v4543_v52 = vsel %vm813_vm5, %v4538_v20, %v4542_v44  ;;  %v4426_v51 = vld [vmem:[#allocation3 + $0x80] sm:$0xff] }
 0x37c   : > { %v4271_v0 = vrot.slane %v4269_v57, 7  ;;  %v4204_v61 = vmax.f32 %v4172_v60, 0.0  ;;  %v4173_v47 = vadd.f32 %v11610_v2, %v4045_v34  ;;  %9242 = vmatmul.mubr.msk.bf16.vlgmr.msra.gmra.mrb[0].mxu1 %vm273_vm0, %v4543_v52  ;;  %v4555_v6 = vsel %vm813_vm5, %v4550_v25, %v4554_v18  ;;  %v4429_v25 = vld [vmem:[#allocation3 + $0x88] sm:$0x1]  ;;  %v10222_v60 = vld [vmem:[#allocation9 + $0x18] sm:$0xff]   ;;  %v4420_v34 = vld [vmem:[#allocation3 + $0x70] sm:$0xff] }
 0x37d   : > { %v4281_v8 = vor.u32 %v4279_v32, %v4278_v58  ;;  %v4418_v53 = vsel %vm10652_vm3, %v4278_v58, %v4417_v59  ;;  %v4207_v49 = vmax.f32 %v4175_v22, 0.0  ;;  %9274 = vmatpush3.bf16.msra.mxu1 %v11578_v29  ;;  %9245 = vmatprep.mubr.msk.bf16.mxu1 %vm273_vm0, %v4555_v6  ;;  %v4557_v13 = vshrl.u32 %v11658_v33, 16  ;;  %v11675_v16 = vld [vmem:[#allocation3 + $0x48] sm:$0x1] }
 0x37e   : > { %4419 = vst [vmem:[#allocation3 + $0x68] sm:$0x1] %v4418_v53  ;;  %v4274_v27 = vor.u32 %v4272_v54, %v4271_v0  ;;  %v4412_v30 = vsel %vm10652_vm3, %v4271_v0, %v4411_v19  ;;  %v4205_v38 = vmax.f32 %v4173_v47, 0.0  ;;  %v11679_v37 = vld [vmem:[#allocation3 + $0x38] sm:$0x1]  ;;  %v4559_v63 = vshll.u32 %v11658_v33, 16  ;;  %9275 = vmatprep.subr.bf16.mxu1 %v10220_v28 }
 0x37f   : > { %v11684_v29 = vsel %vm10693_vm7, %v4281_v8, %v4414_v41  ;;  %4413 = vst [vmem:[#allocation3 + $0x58] sm:$0x1] %v4412_v30  ;;  %v4231_v39 = vpack.c.bf16 %v4207_v49, %v4206_v35  ;;  %v4564_v4 = vshll.u32 %v11679_v37, 16  ;;  %v4576_v36 = vshll.u32 %v11675_v16, 16 }
 0x380   : > { %4416 = vst [vmem:[#allocation3 + $0x60] sm:$0xff] %v11684_v29  ;;  %v11691_v55 = vsel %vm10693_vm7, %v4274_v27, %v4408_v50  ;;  %v4230_v7 = vpack.c.bf16 %v4205_v38, %v4204_v61  ;;  %v9219_v42 = vpop.f32.mrb[16].mxu0  ;;  %v4561_v26 = vrot.slane %v4559_v63, 1  ;;  %v4573_v54 = vrot.slane %v4571_v3, 1 }
 0x381   : > { %4410 = vst [vmem:[#allocation3 + $0x50] sm:$0xff] %v11691_v55  ;;  %v4290_v43 = vshrl.u32 %v4231_v39, 16  ;;  %v4293_v46 = vshll.u32 %v4231_v39, 16  ;;  %v4178_v45 = vadd.f32 %v9219_v42, %v11610_v2  ;;  %v4058_v20 = vpop.f32.mrb[17].mxu0  ;;  %v4566_v31 = vrot.slane %v4564_v4, 1  ;;  %9276 = vmatpush3.bf16.msra.mxu1 %v10220_v28 }
 0x382   : > { %v4283_v14 = vshrl.u32 %v4230_v7, 16  ;;  %v4286_v21 = vshll.u32 %v4230_v7, 16  ;;  %v4176_v10 = vadd.f32 %v11610_v2, %v4058_v20  ;;  %v9220_v32 = vpop.f32.mrb[18].mxu0  ;;  %v4562_v59 = vor.u32 %v4561_v26, %v4557_v13  ;;  %9277 = vmatprep.subr.bf16.mxu1 %v10221_v12  ;;  %v4441_v26 = vld [vmem:[#allocation3 + $0xa8] sm:$0x1] }
 0x383   : > { %v4292_v9 = vrot.slane %v4290_v43, 7  ;;  %v4210_v15 = vmax.f32 %v4178_v45, 0.0  ;;  %v4179_v44 = vadd.f32 %v9220_v32, %v11610_v2  ;;  %v4061_v57 = vpop.f32.mrb[19].mxu0  ;;  %v4574_v41 = vor.u32 %v4573_v54, %v4569_v23  ;;  %v11714_v23 = vld [vmem:[#allocation9 + $0x40] sm:$0xff]  }
 0x384   : > { %v4285_v18 = vrot.slane %v4283_v14, 7  ;;  %v4208_v58 = vmax.f32 %v4176_v10, 0.0  ;;  %v4177_v28 = vadd.f32 %v11610_v2, %v4061_v57  ;;  %v4567_v19 = vsel %vm813_vm5, %v4562_v59, %v4566_v31  ;;  %v4435_v31 = vld [vmem:[#allocation3 + $0x98] sm:$0x1]  ;;  %v4438_v10 = vld [vmem:[#allocation3 + $0xa0] sm:$0xff] }
 0x385   : > { %v4295_v35 = vor.u32 %v4293_v46, %v4292_v9  ;;  %v4430_v22 = vsel %vm10652_vm3, %v4292_v9, %v4429_v25  ;;  %v4211_v52 = vmax.f32 %v4179_v44, 0.0  ;;  %9246 = vmatmul.mubr.msk.bf16.gmra.mrb[4].mxu1 %vm273_vm0, %v4567_v19  ;;  %v4578_v6 = vrot.slane %v4576_v36, 1  ;;  %v11731_v44 = vld [vmem:[#allocation3 + $0x68] sm:$0x1] }
 0x386   : > { %4431 = vst [vmem:[#allocation3 + $0x88] sm:$0x1] %v4430_v22  ;;  %v4288_v0 = vor.u32 %v4286_v21, %v4285_v18  ;;  %v4424_v61 = vsel %vm10652_vm3, %v4285_v18, %v4423_v56  ;;  %v4209_v47 = vmax.f32 %v4177_v28, 0.0  ;;  %v11707_v8 = vld [vmem:[#allocation3 + $0x58] sm:$0x1]  ;;  %9278 = vmatpush3.bf16.msra.mxu1 %v10221_v12  ;;  %v4583_v49 = vshll.u32 %v11691_v55, 16 }
 0x387   : > { %v11711_v53 = vsel %vm10693_vm7, %v4295_v35, %v4426_v51  ;;  %4425 = vst [vmem:[#allocation3 + $0x78] sm:$0x1] %v4424_v61  ;;  %v4233_v50 = vpack.c.bf16 %v4211_v52, %v4210_v15  ;;  %9279 = vmatprep.subr.bf16.mxu1 %v10222_v60  ;;  %v4579_v38 = vsel %vm813_vm5, %v4574_v41, %v4578_v6  ;;  %v4588_v63 = vshll.u32 %v11707_v8, 16 }
 0x388   : > { %4428 = vst [vmem:[#allocation3 + $0x80] sm:$0xff] %v11711_v53  ;;  %v11719_v13 = vsel %vm10693_vm7, %v4288_v0, %v4420_v34  ;;  %v4232_v27 = vpack.c.bf16 %v4209_v47, %v4208_v58  ;;  %v9223_v30 = vpop.f32.mrb[20].mxu0  ;;  %9249 = vmatprep.mubr.msk.bf16.mxu1 %vm273_vm0, %v4579_v38  ;;  %v4581_v3 = vshrl.u32 %v11691_v55, 16  ;;  %v4585_v7 = vrot.slane %v4583_v49, 1 }
 0x389   : > { %4422 = vst [vmem:[#allocation3 + $0x70] sm:$0xff] %v11719_v13  ;;  %v4304_v12 = vshrl.u32 %v4233_v50, 16  ;;  %v4182_v39 = vadd.f32 %v9223_v30, %v11610_v2  ;;  %v4074_v4 = vpop.f32.mrb[21].mxu0  ;;  %v4307_v42 = vshll.u32 %v4233_v50, 16  ;;  %v4590_v25 = vrot.slane %v4588_v63, 1 }
 0x38a   : > { %v4297_v36 = vshrl.u32 %v4232_v27, 16  ;;  %v4180_v43 = vadd.f32 %v11610_v2, %v4074_v4  ;;  %v9224_v46 = vpop.f32.mrb[22].mxu0  ;;  %9280 = vmatpush3.bf16.msra.mxu1 %v10222_v60  ;;  %v4300_v20 = vshll.u32 %v4232_v27, 16  ;;  %v4586_v56 = vor.u32 %v4585_v7, %v4581_v3  ;;  %v4432_v60 = vld [vmem:[#allocation3 + $0x90] sm:$0xff]  ;;  %v4453_v27 = vld [vmem:[#allocation3 + $0xc8] sm:$0x1] }
 0x38b   : > { %v4306_v45 = vrot.slane %v4304_v12, 7  ;;  %v4183_v14 = vadd.f32 %v9224_v46, %v11610_v2  ;;  %v4077_v21 = vpop.f32.mrb[23].mxu0  ;;  %9313 = vmatprep.subr.bf16.mxu1 %v11714_v23  ;;  %v4214_v59 = vmax.f32 %v4182_v39, 0.0  ;;  %v4595_v35 = vshll.u32 %v11684_v29, 16  ;;  %v4447_v3 = vld [vmem:[#allocation3 + $0xb8] sm:$0x1] }
 0x38c   : > { %v4299_v32 = vrot.slane %v4297_v36, 7  ;;  %v4212_v9 = vmax.f32 %v4180_v43, 0.0  ;;  %v4181_v15 = vadd.f32 %v11610_v2, %v4077_v21  ;;  %v4591_v18 = vsel %vm813_vm5, %v4586_v56, %v4590_v25 }
 0x38d   : > { %v4309_v57 = vor.u32 %v4307_v42, %v4306_v45  ;;  %v4442_v54 = vsel %vm10652_vm3, %v4306_v45, %v4441_v26  ;;  %v4215_v51 = vmax.f32 %v4183_v14, 0.0  ;;  %9250 = vmatmul.mubr.msk.bf16.gmra.mrb[8].mxu1 %vm273_vm0, %v4591_v18  ;;  %v4593_v52 = vshrl.u32 %v11684_v29, 16 }
 0x38e   : > { %4443 = vst [vmem:[#allocation3 + $0xa8] sm:$0x1] %v4442_v54  ;;  %v4302_v58 = vor.u32 %v4300_v20, %v4299_v32  ;;  %v4436_v28 = vsel %vm10652_vm3, %v4299_v32, %v4435_v31  ;;  %v4213_v19 = vmax.f32 %v4181_v15, 0.0  ;;  %v4600_v41 = vshll.u32 %v11731_v44, 16  ;;  %v11757_v45 = vld [vmem:[#allocation3 + $0x78] sm:$0x1] }
 0x38f   : > { %v11742_v22 = vsel %vm10693_vm7, %v4309_v57, %v4438_v10  ;;  %4437 = vst [vmem:[#allocation3 + $0x98] sm:$0x1] %v4436_v28  ;;  %v4235_v34 = vpack.c.bf16 %v4215_v51, %v4214_v59  ;;  %v4597_v6 = vrot.slane %v4595_v35, 1  ;;  %v4607_v50 = vshll.u32 %v11719_v13, 16  ;;  %v4450_v31 = vld [vmem:[#allocation3 + $0xc0] sm:$0xff] }
 0x390   : > { %4440 = vst [vmem:[#allocation3 + $0xa0] sm:$0xff] %v11742_v22  ;;  %v11749_v0 = vsel %vm10693_vm7, %v4302_v58, %v4432_v60  ;;  %v4234_v61 = vpack.c.bf16 %v4213_v19, %v4212_v9  ;;  %v9227_v47 = vpop.f32.mrb[24].mxu0  ;;  %v4602_v63 = vrot.slane %v4600_v41, 1  ;;  %v4605_v12 = vshrl.u32 %v11719_v13, 16  ;;  %v4444_v9 = vld [vmem:[#allocation3 + $0xb0] sm:$0xff] }
 0x391   : > { %4434 = vst [vmem:[#allocation3 + $0x90] sm:$0xff] %v11749_v0  ;;  %v4318_v49 = vshrl.u32 %v4235_v34, 16  ;;  %v4186_v30 = vadd.f32 %v9227_v47, %v11610_v2  ;;  %v4090_v38 = vpop.f32.mrb[25].mxu0  ;;  %v4321_v39 = vshll.u32 %v4235_v34, 16  ;;  %v4598_v42 = vor.u32 %v4597_v6, %v4593_v52  ;;  %v11764_v54 = vld [vmem:[#allocation3 + $0x88] sm:$0x1] }
 0x392   : > { %v4311_v4 = vshrl.u32 %v4234_v61, 16  ;;  %v4184_v7 = vadd.f32 %v11610_v2, %v4090_v38  ;;  %v9228_v26 = vpop.f32.mrb[26].mxu0  ;;  %v4314_v43 = vshll.u32 %v4234_v61, 16  ;;  %v4609_v20 = vrot.slane %v4607_v50, 1 }
 0x393   : > { %v4320_v36 = vrot.slane %v4318_v49, 7  ;;  %v4187_v46 = vadd.f32 %v9228_v26, %v11610_v2  ;;  %v4093_v25 = vpop.f32.mrb[27].mxu0  ;;  %v4218_v21 = vmax.f32 %v4186_v30, 0.0  ;;  %v4603_v56 = vsel %vm813_vm5, %v4598_v42, %v4602_v63 }
 0x394   : > { %v4313_v14 = vrot.slane %v4311_v4, 7  ;;  %v4185_v10 = vadd.f32 %v11610_v2, %v4093_v25  ;;  %v4216_v15 = vmax.f32 %v4184_v7, 0.0  ;;  %9253 = vmatprep.mubr.msk.bf16.mxu1 %vm273_vm0, %v4603_v56  ;;  %v4612_v58 = vshll.u32 %v11757_v45, 16 }
 0x395   : > { %v4323_v32 = vor.u32 %v4321_v39, %v4320_v36  ;;  %v4454_v59 = vsel %vm10652_vm3, %v4320_v36, %v4453_v27  ;;  %v4219_v57 = vmax.f32 %v4187_v46, 0.0  ;;  %v4610_v35 = vor.u32 %v4609_v20, %v4605_v12  ;;  %v4465_v12 = vld [vmem:[#allocation3 + $0xe8] sm:$0x1]  ;;  %v4459_v36 = vld [vmem:[#allocation3 + $0xd8] sm:$0x1]  ;;  %v4462_v20 = vld [vmem:[#allocation3 + $0xe0] sm:$0xff] }
 0x396   : > { %4455 = vst [vmem:[#allocation3 + $0xc8] sm:$0x1] %v4454_v59  ;;  %v4316_v60 = vor.u32 %v4314_v43, %v4313_v14  ;;  %v4448_v51 = vsel %vm10652_vm3, %v4313_v14, %v4447_v3  ;;  %v4217_v18 = vmax.f32 %v4185_v10, 0.0  ;;  %v4619_v34 = vshll.u32 %v11711_v53, 16  ;;  %v11788_v10 = vld [vmem:[#allocation3 + $0x98] sm:$0x1] }
 0x397   : > { %v11771_v28 = vsel %vm10693_vm7, %v4323_v32, %v4450_v31  ;;  %4449 = vst [vmem:[#allocation3 + $0xb8] sm:$0x1] %v4448_v51  ;;  %v4237_v19 = vpack.c.bf16 %v4219_v57, %v4218_v21  ;;  %v4614_v47 = vrot.slane %v4612_v58, 1  ;;  %v4624_v6 = vshll.u32 %v11764_v54, 16 }
 0x398   : > { %4452 = vst [vmem:[#allocation3 + $0xc0] sm:$0xff] %v11771_v28  ;;  %v11777_v52 = vsel %vm10693_vm7, %v4316_v60, %v4444_v9  ;;  %v4236_v41 = vpack.c.bf16 %v4217_v18, %v4216_v15  ;;  %v9231_v61 = vpop.f32.mrb[28].mxu0  ;;  %v4617_v30 = vshrl.u32 %v11711_v53, 16  ;;  %v4621_v38 = vrot.slane %v4619_v34, 1  ;;  %v4456_v9 = vld [vmem:[#allocation3 + $0xd0] sm:$0xff] }
 0x399   : > { %4446 = vst [vmem:[#allocation3 + $0xb0] sm:$0xff] %v11777_v52  ;;  %v4332_v50 = vshrl.u32 %v4237_v19, 16  ;;  %v4190_v49 = vadd.f32 %v9231_v61, %v11610_v2  ;;  %v4106_v27 = vpop.f32.mrb[29].mxu0  ;;  %v4335_v63 = vshll.u32 %v4237_v19, 16  ;;  %v4615_v4 = vsel %vm813_vm5, %v4610_v35, %v4614_v47 }
 0x39a   : > { %v4325_v39 = vshrl.u32 %v4236_v41, 16  ;;  %v4188_v3 = vadd.f32 %v11610_v2, %v4106_v27  ;;  %v9232_v7 = vpop.f32.mrb[30].mxu0  ;;  %v4328_v26 = vshll.u32 %v4236_v41, 16  ;;  %9254 = vmatmul.mubr.msk.bf16.gmra.mrb[12].mxu1 %vm273_vm0, %v4615_v4  ;;  %v4622_v43 = vor.u32 %v4621_v38, %v4617_v30 }
 0x39b   : > { %v4334_v42 = vrot.slane %v4332_v50, 7  ;;  %v4626_v46 = vrot.slane %v4624_v6, 1  ;;  %v4109_v25 = vpop.f32.mrb[31].mxu0  ;;  %v4222_v14 = vmax.f32 %v4190_v49, 0.0  ;;  %v4191_v21 = vadd.f32 %v9232_v7, %v11610_v2  ;;  %v4471_v7 = vld [vmem:[#allocation3 + $0xf8] sm:$0x1] }
 0x39c   : > { %v4327_v31 = vrot.slane %v4325_v39, 7  ;;  %v4189_v56 = vadd.f32 %v11610_v2, %v4109_v25  ;;  %v4220_v15 = vmax.f32 %v4188_v3, 0.0  ;;  %v11796_v2 = vld [vmem:[#allocation3 + $0xa8] sm:$0x1]  ;;  %v4631_v35 = vshll.u32 %v11749_v0, 16 }
 0x39d   : > { %v4337_v32 = vor.u32 %v4335_v63, %v4334_v42  ;;  %v4466_v59 = vsel %vm10652_vm3, %v4334_v42, %v4465_v12  ;;  %v4627_v57 = vsel %vm813_vm5, %v4622_v43, %v4626_v46  ;;  %v4223_v18 = vmax.f32 %v4191_v21, 0.0  ;;  %v4477_v39 = vld [vmem:[#allocation3 + $0x108] sm:$0x1]  ;;  %v4468_v21 = vld [vmem:[#allocation3 + $0xf0] sm:$0xff] }
 0x39e   : > { %4467 = vst [vmem:[#allocation3 + $0xe8] sm:$0x1] %v4466_v59  ;;  %v4330_v60 = vor.u32 %v4328_v26, %v4327_v31  ;;  %v4460_v51 = vsel %vm10652_vm3, %v4327_v31, %v4459_v36  ;;  %9257 = vmatprep.mubr.msk.bf16.mxu1 %vm273_vm0, %v4627_v57  ;;  %v4221_v58 = vmax.f32 %v4189_v56, 0.0  ;;  %v4636_v34 = vshll.u32 %v11788_v10, 16  ;;  %v11813_v38 = vld [vmem:[#allocation3 + $0xb8] sm:$0x1] }
 0x39f   : > { %v11800_v19 = vsel %vm10693_vm7, %v4337_v32, %v4462_v20  ;;  %4461 = vst [vmem:[#allocation3 + $0xd8] sm:$0x1] %v4460_v51  ;;  %v4239_v61 = vpack.c.bf16 %v4223_v18, %v4222_v14  ;;  %v4643_v6 = vshll.u32 %v11742_v22, 16  ;;  %v4629_v50 = vshrl.u32 %v11749_v0, 16  ;;  %v4474_v14 = vld [vmem:[#allocation3 + $0x100] sm:$0xff] }
 0x3a0   : > { %4464 = vst [vmem:[#allocation3 + $0xe0] sm:$0xff] %v11800_v19  ;;  %v11807_v41 = vsel %vm10693_vm7, %v4330_v60, %v4456_v9  ;;  %v4238_v47 = vpack.c.bf16 %v4221_v58, %v4220_v15  ;;  %v4633_v49 = vrot.slane %v4631_v35, 1  ;;  %v4638_v27 = vrot.slane %v4636_v34, 1  ;;  %v11819_v9 = vld [vmem:[#allocation3 + $0xc8] sm:$0x1] }
 0x3a1   : > { %4458 = vst [vmem:[#allocation3 + $0xd0] sm:$0xff] %v11807_v41  ;;  %v4648_v30 = vshll.u32 %v11796_v2, 16  ;;  %v4346_v63 = vshrl.u32 %v4239_v61, 16  ;;  %v4349_v12 = vshll.u32 %v4239_v61, 16  ;;  %v4641_v3 = vshrl.u32 %v11742_v22, 16 }
 0x3a2   : > { %v4339_v4 = vshrl.u32 %v4238_v47, 16  ;;  %v4634_v42 = vor.u32 %v4633_v49, %v4629_v50  ;;  %v4645_v26 = vrot.slane %v4643_v6, 1  ;;  %v4655_v43 = vshll.u32 %v11777_v52, 16 }
 0x3a3   : > { %v4650_v36 = vrot.slane %v4648_v30, 1  ;;  %v4348_v46 = vrot.slane %v4346_v63, 7  ;;  %v4342_v20 = vshll.u32 %v4238_v47, 16  ;;  %v4660_v31 = vshll.u32 %v11813_v38, 16 }
 0x3a4   : > { %v4341_v25 = vrot.slane %v4339_v4, 7  ;;  %v4639_v56 = vsel %vm813_vm5, %v4634_v42, %v4638_v27  ;;  %v4646_v32 = vor.u32 %v4645_v26, %v4641_v3  ;;  %v4657_v59 = vrot.slane %v4655_v43, 1 }
 0x3a5   : > { %v4667_v15 = vshll.u32 %v11771_v28, 16  ;;  %v4351_v57 = vor.u32 %v4349_v12, %v4348_v46  ;;  %v4478_v60 = vsel %vm10652_vm3, %v4348_v46, %v4477_v39  ;;  %9258 = vmatmul.mubr.msk.bf16.gmra.mrb[16].mxu1 %vm273_vm0, %v4639_v56  ;;  %v4653_v35 = vshrl.u32 %v11777_v52, 16  ;;  %v11847_v39 = vld [vmem:[#allocation3 + $0xe8] sm:$0x1] }
 0x3a6   : > { %v4344_v51 = vor.u32 %v4342_v20, %v4341_v25  ;;  %v4472_v18 = vsel %vm10652_vm3, %v4341_v25, %v4471_v7  ;;  %4479 = vst [vmem:[#allocation3 + $0x108] sm:$0x1] %v4478_v60  ;;  %v4651_v58 = vsel %vm813_vm5, %v4646_v32, %v4650_v36  ;;  %v4662_v34 = vrot.slane %v4660_v31, 1  ;;  %v11839_v50 = vld [vmem:[#allocation3 + $0xd8] sm:$0x1] }
 0x3a7   : > { %4473 = vst [vmem:[#allocation3 + $0xf8] sm:$0x1] %v4472_v18  ;;  %v11831_v61 = vsel %vm10693_vm7, %v4351_v57, %v4474_v14  ;;  %9261 = vmatprep.mubr.msk.bf16.mxu1 %vm273_vm0, %v4651_v58  ;;  %v4669_v1 = vrot.slane %v4667_v15, 1  ;;  %v4672_v6 = vshll.u32 %v11819_v9, 16  ;;  %v4658_v49 = vor.u32 %v4657_v59, %v4653_v35  ;;  %v10224_v35 = vld [vmem:[#allocation9 + $0x48] sm:$0xff]  }
 0x3a8   : > { %v11835_v47 = vsel %vm10693_vm7, %v4344_v51, %v4468_v21  ;;  %4476 = vst [vmem:[#allocation3 + $0x100] sm:$0xff] %v11831_v61  ;;  %v4679_v27 = vshll.u32 %v11807_v41, 16  ;;  %v4665_v30 = vshrl.u32 %v11771_v28, 16  ;;  %v4684_v12 = vshll.u32 %v11839_v50, 16 }
 0x3a9   : > { %4470 = vst [vmem:[#allocation3 + $0xf0] sm:$0xff] %v11835_v47  ;;  %v4674_v63 = vrot.slane %v4672_v6, 1  ;;  %v4663_v48 = vsel %vm813_vm5, %v4658_v49, %v4662_v34  ;;  %v4691_v3 = vshll.u32 %v11800_v19, 16  ;;  %v4696_v26 = vshll.u32 %v11847_v39, 16  ;;  %v10225_v34 = vld [vmem:[#allocation9 + $0x50] sm:$0xff]  }
 0x3aa   : > { %v4670_v4 = vor.u32 %v4669_v1, %v4665_v30  ;;  %v4681_v7 = vrot.slane %v4679_v27, 1  ;;  %v4677_v36 = vshrl.u32 %v11807_v41, 16  ;;  %v4686_v43 = vrot.slane %v4684_v12, 1  ;;  %v10226_v1 = vld [vmem:[#allocation9 + $0x58] sm:$0xff]   ;;  %v10228_v27 = vld [vmem:[#allocation9 + $0x68] sm:$0xff]  }
 0x3ab   : > { %v4693_v46 = vrot.slane %v4691_v3, 1  ;;  %v4703_v31 = vshll.u32 %v11835_v47, 16  ;;  %v4689_v14 = vshrl.u32 %v11800_v19, 16  ;;  %v4698_v21 = vrot.slane %v4696_v26, 1  ;;  %v5175_v12 = vld [vmem:[#allocation3 + $0x40] sm:$0xfe] }
 0x3ac   : > { %v4675_v42 = vsel %vm813_vm5, %v4670_v4, %v4674_v63  ;;  %v11857_v20 = vor.u32 %v4681_v7, %v4677_v36  ;;  %v4701_v60 = vshrl.u32 %v11835_v47, 16  ;;  %v5223_v6 = vrot.slane %v11648_v62, 1  ;;  %v10229_v4 = vld [vmem:[#allocation9 + $0x70] sm:$0xff]  }
 0x3ad   : > { %9262 = vmatmul.mubr.msk.bf16.gmra.mrb[20].mxu1 %vm273_vm0, %v4663_v48  ;;  %v11864_v59 = vor.u32 %v4693_v46, %v4689_v14  ;;  %v4705_v15 = vrot.slane %v4703_v31, 1  ;;  %v5226_v49 = vrot.slane %v11644_v11, 1  ;;  %v5174_v48 = vld [vmem:[#allocation3 + $0x30] sm:$0xfe]  ;;  %v5231_v7 = vrot.slane %v5175_v12, 1  ;;  %v10231_v31 = vld [vmem:[#allocation9 + $0x80] sm:$0xff]  }
 0x3ae   : > { %9265 = vmatprep.mubr.msk.bf16.mxu1 %vm273_vm0, %v4675_v42  ;;  %v11855_v25 = vld [vmem:[#allocation3 + $0xf8] sm:$0x1]  ;;  %v4687_v56 = vsel %vm813_vm5, %v11857_v20, %v4686_v43  ;;  %v5228_v3 = vrot.slane %v5174_v48, 1  ;;  %v5229_v62 = vrot.slane %v11679_v37, 1  ;;  %v5232_v11 = vrot.slane %v11675_v16, 1 }
 0x3af   : > { %v4708_v32 = vshll.u32 %v11855_v25, 16  ;;  %v4699_v57 = vsel %vm813_vm5, %v11864_v59, %v4698_v21  ;;  %v11871_v18 = vor.u32 %v4705_v15, %v4701_v60  ;;  %v10230_v42 = vld [vmem:[#allocation9 + $0x78] sm:$0xff]   ;;  %v5176_v43 = vld [vmem:[#allocation3 + $0x50] sm:$0xfe]  ;;  %v5177_v46 = vld [vmem:[#allocation3 + $0x60] sm:$0xfe] }
 0x3b0   : > { %v5230_v26 = vsel %vm1513_vm8, %v5228_v3, %v5229_v62  ;;  %v5233_v36 = vsel %vm1513_vm8, %v5231_v7, %v5232_v11  ;;  %v5234_v14 = vrot.slane %v5176_v43, 1  ;;  %v5237_v37 = vrot.slane %v5177_v46, 1  ;;  %v5178_v15 = vld [vmem:[#allocation3 + $0x70] sm:$0xfe]  ;;  %v10235_v43 = vld [vmem:[#allocation9 + $0xa0] sm:$0xff]  }
 0x3b1   : > { %v4710_v51 = vrot.slane %v4708_v32, 1  ;;  %v5235_v21 = vrot.slane %v11707_v8, 1  ;;  %v5238_v16 = vrot.slane %v11731_v44, 1  ;;  %v5240_v60 = vrot.slane %v5178_v15, 1  ;;  %v5186_v12 = vld [vmem:[#allocation3 + $0xf0] sm:$0xfe] }
 0x3b2   : > { %v5244_v8 = vrot.slane %v11764_v54, 1  ;;  %v5262_v48 = vrot.slane %v11847_v39, 1  ;;  %v5265_v3 = vrot.slane %v11855_v25, 1  ;;  %v5541_v62 = vld [vmem:[#allocation3 + $0x10] sm:$0xff]  ;;  %v11957_v39 = vld [vmem:[#allocation3 + $0x20] sm:$0xff] }
 0x3b3   : > { %v4711_v58 = vsel %vm813_vm5, %v11871_v18, %v4710_v51  ;;  %v5239_v32 = vsel %vm1513_vm8, %v5237_v37, %v5238_v16  ;;  %v11961_v11 = vld [vmem:[#allocation3 + $0x30] sm:$0xff]  ;;  %v11973_v46 = vld [vmem:[#allocation3 + $0x60] sm:$0xff]  ;;  %v5866_v37 = vshll.u32 %v5541_v62, 16 }
 0x3b4   : > { %v10233_v25 = vld [vmem:[#allocation9 + $0x90] sm:$0xff]  }
 0x3b5   : > { %9266 = vmatmul.mubr.msk.bf16.gmra.mrb[24].mxu1 %vm273_vm0, %v4687_v56  ;;  %v5236_v56 = vsel %vm1513_vm8, %v5234_v14, %v5235_v21  ;;  %v11981_v14 = vld [vmem:[#allocation3 + $0x80] sm:$0xff]  ;;  %v11995_v21 = vld [vmem:[#allocation3 + $0x18] sm:$0x1]  ;;  %v5868_v16 = vrot.slane %v5866_v37, 1 }
 0x3b6   : > { %9269 = vmatprep.mubr.msk.bf16.mxu1 %vm273_vm0, %v4699_v57  ;;  %v5179_v57 = vld [vmem:[#allocation3 + $0x80] sm:$0xfe] }
 0x3b7   : > { %v5243_v51 = vrot.slane %v5179_v57, 1  ;;  %v12006_v57 = vld [vmem:[#allocation3 + $0x38] sm:$0x1] }
 0x3b9   : > { %v5245_v44 = vsel %vm1513_vm8, %v5243_v51, %v5244_v8  ;;  %v5895_v8 = vshll.u32 %v12006_v57, 16 }
 0x3bd   : > { %9270 = vmatmul.mubr.msk.bf16.gmra.mrb[28].mxu1 %vm273_vm0, %v4711_v58  ;;  %v5241_v58 = vrot.slane %v11757_v45, 1 }
 0x3be   : > { %9281 = vmatprep.mubr.msk.bf16.mxu1 %vm273_vm0, %v11550_v24  ;;  %v10227_v24 = vld [vmem:[#allocation9 + $0x60] sm:$0xff]  }
 0x3c5   : > { %9282 = vmatmul.mubr.msk.bf16.vlgmr.msra.gmra.mrb[0].mxu1 %vm273_vm0, %v11631_v17  ;;  %v10256_v17 = vld [vmem:[#allocation3 + $0x8] sm:$0x1] }
 0x3c6   : > { %9314 = vmatpush3.bf16.msra.mxu1 %v11714_v23  ;;  %9285 = vmatprep.mubr.msk.bf16.mxu1 %vm273_vm0, %v11626_v5  ;;  %v5171_v5 = vld [vmem:[#allocation3] sm:$0xfe] }
 0x3c7   : > { %9315 = vmatprep.subr.bf16.mxu1 %v10224_v35 }
 0x3ca   : > { %9316 = vmatpush3.bf16.msra.mxu1 %v10224_v35  ;;  %v5242_v35 = vsel %vm1513_vm8, %v5240_v60, %v5241_v58  ;;  %v5876_v60 = vshrl.u32 %v11957_v39, 16  ;;  %v5888_v58 = vshrl.u32 %v11961_v11, 16 }
 0x3cb   : > { %9317 = vmatprep.subr.bf16.mxu1 %v10225_v34 }
 0x3cd   : > { %9286 = vmatmul.mubr.msk.bf16.gmra.mrb[4].mxu1 %vm273_vm0, %v11658_v33  ;;  %v5219_v33 = vrot.slane %v5171_v5, 1 }
 0x3ce   : > { %9289 = vmatprep.mubr.msk.bf16.mxu1 %vm273_vm0, %v11652_v40  ;;  %9318 = vmatpush3.bf16.msra.mxu1 %v10225_v34  ;;  %v5220_v40 = vrot.slane %v10256_v17, 1  ;;  %v5180_v34 = vld [vmem:[#allocation3 + $0x90] sm:$0xfe]  ;;  %v5247_v17 = vrot.slane %v11788_v10, 1 }
 0x3cf   : > { %9319 = vmatprep.subr.bf16.mxu1 %v10226_v1 }
 0x3d2   : > { %9320 = vmatpush3.bf16.msra.mxu1 %v10226_v1  ;;  %v5181_v1 = vld [vmem:[#allocation3 + $0xa0] sm:$0xfe] }
 0x3d3   : > { %9353 = vmatprep.subr.bf16.mxu1 %v10227_v24  ;;  %v5249_v5 = vrot.slane %v5181_v1, 1 }
 0x3d5   : > { %9290 = vmatmul.mubr.msk.bf16.gmra.mrb[8].mxu1 %vm273_vm0, %v11691_v55  ;;  %v5172_v55 = vld [vmem:[#allocation3 + $0x10] sm:$0xfe] }
 0x3d6   : > { %9293 = vmatprep.mubr.msk.bf16.mxu1 %vm273_vm0, %v11684_v29  ;;  %v5221_v29 = vsel %vm1513_vm8, %v5219_v33, %v5220_v40  ;;  %v5222_v23 = vrot.slane %v5172_v55, 1  ;;  %v5250_v40 = vrot.slane %v11796_v2, 1  ;;  %v5182_v33 = vld [vmem:[#allocation3 + $0xb0] sm:$0xfe] }
 0x3d7   : > { %v5252_v55 = vrot.slane %v5182_v33, 1  ;;  %v12026_v33 = vld [vmem:[#allocation3 + $0x58] sm:$0x1] }
 0x3d8   : > { %v5224_v30 = vsel %vm1513_vm8, %v5222_v23, %v5223_v6  ;;  %v5251_v54 = vsel %vm1513_vm8, %v5249_v5, %v5250_v40  ;;  %v5253_v23 = vrot.slane %v11813_v38, 1  ;;  %v5184_v6 = vld [vmem:[#allocation3 + $0xd0] sm:$0xfe]  ;;  %v5897_v5 = vrot.slane %v5895_v8, 1  ;;  %v10236_v40 = vld [vmem:[#allocation9 + $0xa8] sm:$0xff]   ;;  %v12076_v8 = vld [vmem:[#allocation3 + $0xa0] sm:$0xff] }
 0x3da   : > { %v5254_v10 = vsel %vm1513_vm8, %v5252_v55, %v5253_v23 }
 0x3dd   : > { %9294 = vmatmul.mubr.msk.bf16.gmra.mrb[12].mxu1 %vm273_vm0, %v11719_v13 }
 0x3de   : > { %9297 = vmatprep.mubr.msk.bf16.mxu1 %vm273_vm0, %v11711_v53  ;;  %v5173_v53 = vld [vmem:[#allocation3 + $0x20] sm:$0xfe] }
 0x3df   : > { %v5225_v13 = vrot.slane %v5173_v53, 1 }
 0x3e1   : > { %v5227_v63 = vsel %vm1513_vm8, %v5225_v13, %v5226_v49  ;;  %v5256_v13 = vrot.slane %v11819_v9, 1  ;;  %v5185_v49 = vld [vmem:[#allocation3 + $0xe0] sm:$0xfe] }
 0x3e5   : > { %9298 = vmatmul.mubr.msk.bf16.gmra.mrb[16].mxu1 %vm273_vm0, %v11749_v0 }
 0x3e6   : > { %9301 = vmatprep.mubr.msk.bf16.mxu1 %vm273_vm0, %v11742_v22 }
 0x3ed   : > { %9302 = vmatmul.mubr.msk.bf16.gmra.mrb[20].mxu1 %vm273_vm0, %v11777_v52 }
 0x3ee   : > { %9305 = vmatprep.mubr.msk.bf16.mxu1 %vm273_vm0, %v11771_v28 }
 0x3f5   : > { %9306 = vmatmul.mubr.msk.bf16.gmra.mrb[24].mxu1 %vm273_vm0, %v11807_v41 }
 0x3f6   : > { %9309 = vmatprep.mubr.msk.bf16.mxu1 %vm273_vm0, %v11800_v19 }
 0x3fd   : > { %9310 = vmatmul.mubr.msk.bf16.gmra.mrb[28].mxu1 %vm273_vm0, %v11835_v47 }
 0x3fe   : > { %9321 = vmatprep.mubr.msk.bf16.mxu1 %vm273_vm0, %v5221_v29  ;;  %v5183_v29 = vld [vmem:[#allocation3 + $0xc0] sm:$0xfe] }
 0x3ff   : > { %v5255_v53 = vrot.slane %v5183_v29, 1 }
 0x401   : > { %v5257_v2 = vsel %vm1513_vm8, %v5255_v53, %v5256_v13 }
 0x405   : > { %9322 = vmatmul.mubr.msk.bf16.vlgmr.msra.gmra.mrb[0].mxu1 %vm273_vm0, %v5224_v30  ;;  %v5261_v30 = vrot.slane %v5185_v49, 1  ;;  %v5926_v49 = vshll.u32 %v11973_v46, 16 }
 0x406   : > { %9354 = vmatpush3.bf16.msra.mxu1 %v10227_v24  ;;  %9325 = vmatprep.mubr.msk.bf16.mxu1 %vm273_vm0, %v5227_v63  ;;  %v5246_v24 = vrot.slane %v5180_v34, 1  ;;  %v5259_v63 = vrot.slane %v11839_v50, 1  ;;  %v10232_v50 = vld [vmem:[#allocation9 + $0x88] sm:$0xff]  }
 0x407   : > { %9355 = vmatprep.subr.bf16.mxu1 %v10228_v27  ;;  %v5263_v9 = vsel %vm1513_vm8, %v5261_v30, %v5262_v48 }
 0x408   : > { %v5248_v45 = vsel %vm1513_vm8, %v5246_v24, %v5247_v17  ;;  %v12022_v17 = vld [vmem:[#allocation3 + $0x48] sm:$0x1] }
 0x409   : > { %v5907_v23 = vshll.u32 %v12022_v17, 16 }
 0x40a   : > { %9356 = vmatpush3.bf16.msra.mxu1 %v10228_v27  ;;  %v5258_v27 = vrot.slane %v5184_v6, 1 }
 0x40b   : > { %9357 = vmatprep.subr.bf16.mxu1 %v10229_v4 }
 0x40c   : > { %v5260_v38 = vsel %vm1513_vm8, %v5258_v27, %v5259_v63  ;;  %v5909_v63 = vrot.slane %v5907_v23, 1 }
 0x40d   : > { %9326 = vmatmul.mubr.msk.bf16.gmra.mrb[4].mxu1 %vm273_vm0, %v5230_v26  ;;  %v11965_v26 = vld [vmem:[#allocation3 + $0x40] sm:$0xff] }
 0x40e   : > { %9329 = vmatprep.mubr.msk.bf16.mxu1 %vm273_vm0, %v5233_v36  ;;  %9358 = vmatpush3.bf16.msra.mxu1 %v10229_v4  ;;  %v5264_v4 = vrot.slane %v5186_v12, 1  ;;  %v11969_v36 = vld [vmem:[#allocation3 + $0x50] sm:$0xff]  ;;  %v5900_v53 = vshrl.u32 %v11965_v26, 16 }
 0x40f   : > { %9359 = vmatprep.subr.bf16.mxu1 %v10230_v42  ;;  %v5914_v1 = vshll.u32 %v11969_v36, 16  ;;  %v5912_v13 = vshrl.u32 %v11969_v36, 16 }
 0x410   : > { %v5266_v7 = vsel %vm1513_vm8, %v5264_v4, %v5265_v3  ;;  %v5928_v4 = vrot.slane %v5926_v49, 1  ;;  %v12046_v3 = vld [vmem:[#allocation3 + $0x78] sm:$0x1] }
 0x411   : > { %v5916_v55 = vrot.slane %v5914_v1, 1  ;;  %v5943_v37 = vshll.u32 %v12046_v3, 16  ;;  %v12095_v49 = vld [vmem:[#allocation3 + $0xb8] sm:$0x1] }
 0x412   : > { %9360 = vmatpush3.bf16.msra.mxu1 %v10230_v42  ;;  %v10234_v42 = vld [vmem:[#allocation9 + $0x98] sm:$0xff]  }
 0x413   : > { %9393 = vmatprep.subr.bf16.mxu1 %v10231_v31  ;;  %v12039_v27 = vor.u32 %v5916_v55, %v5912_v13  ;;  %v12091_v13 = vld [vmem:[#allocation3 + $0xa8] sm:$0x1] }
 0x415   : > { %9330 = vmatmul.mubr.msk.bf16.gmra.mrb[8].mxu1 %vm273_vm0, %v5236_v56 }
 0x416   : > { %9333 = vmatprep.mubr.msk.bf16.mxu1 %vm273_vm0, %v5239_v32 }
 0x41d   : > { %9334 = vmatmul.mubr.msk.bf16.gmra.mrb[12].mxu1 %vm273_vm0, %v5242_v35 }
 0x41e   : > { %9337 = vmatprep.mubr.msk.bf16.mxu1 %vm273_vm0, %v5245_v44  ;;  %v5902_v44 = vshll.u32 %v11965_v26, 16 }
 0x425   : > { %9338 = vmatmul.mubr.msk.bf16.gmra.mrb[16].mxu1 %vm273_vm0, %v5248_v45 }
 0x426   : > { %9341 = vmatprep.mubr.msk.bf16.mxu1 %vm273_vm0, %v5251_v54  ;;  %v5904_v54 = vrot.slane %v5902_v44, 1  ;;  %v5948_v44 = vshrl.u32 %v11981_v14, 16 }
 0x428   : > { %v12036_v6 = vor.u32 %v5904_v54, %v5900_v53  ;;  %v5974_v54 = vshll.u32 %v12076_v8, 16 }
 0x42a   : > { %v5910_v12 = vsel %vm813_vm5, %v12036_v6, %v5909_v63 }
 0x42d   : > { %9342 = vmatmul.mubr.msk.bf16.gmra.mrb[20].mxu1 %vm273_vm0, %v5254_v10  ;;  %v5919_v10 = vshll.u32 %v12026_v33, 16 }
 0x42e   : > { %9345 = vmatprep.mubr.msk.bf16.mxu1 %vm273_vm0, %v5257_v2  ;;  %v10237_v2 = vld [vmem:[#allocation9 + $0xb0] sm:$0xff]  }
 0x42f   : > { %v5921_v48 = vrot.slane %v5919_v10, 1 }
 0x435   : > { %9346 = vmatmul.mubr.msk.bf16.gmra.mrb[24].mxu1 %vm273_vm0, %v5260_v38  ;;  %v12042_v38 = vld [vmem:[#allocation3 + $0x68] sm:$0x1] }
 0x436   : > { %9349 = vmatprep.mubr.msk.bf16.mxu1 %vm273_vm0, %v5263_v9  ;;  %v10238_v9 = vld [vmem:[#allocation9 + $0xb8] sm:$0xff]  }
 0x43d   : > { %9350 = vmatmul.mubr.msk.bf16.gmra.mrb[28].mxu1 %vm273_vm0, %v5266_v7  ;;  %v5922_v7 = vsel %vm813_vm5, %v12039_v27, %v5921_v48  ;;  %v12100_v48 = vld [vmem:[#allocation3 + $0xc0] sm:$0xff] }
 0x43e   : > { %9361 = vmatprep.mubr.msk.bf16.mxu1 %vm273_vm0, %v5541_v62 }
 0x445   : > { %9362 = vmatmul.mubr.msk.bf16.vlgmr.msra.gmra.mrb[0].mxu1 %vm273_vm0, %v11957_v39 }
 0x446   : > { %9394 = vmatpush3.bf16.msra.mxu1 %v10231_v31  ;;  %9365 = vmatprep.mubr.msk.bf16.mxu1 %vm273_vm0, %v11961_v11  ;;  %v11977_v31 = vld [vmem:[#allocation3 + $0x70] sm:$0xff] }
 0x447   : > { %9395 = vmatprep.subr.bf16.mxu1 %v10232_v50  ;;  %v5938_v30 = vshll.u32 %v11977_v31, 16 }
 0x44a   : > { %9396 = vmatpush3.bf16.msra.mxu1 %v10232_v50  ;;  %v5924_v50 = vshrl.u32 %v11973_v46, 16 }
 0x44b   : > { %9397 = vmatprep.subr.bf16.mxu1 %v10233_v25 }
 0x44d   : > { %9366 = vmatmul.mubr.msk.bf16.gmra.mrb[4].mxu1 %vm273_vm0, %v11965_v26 }
 0x44e   : > { %9369 = vmatprep.mubr.msk.bf16.mxu1 %vm273_vm0, %v11969_v36  ;;  %9398 = vmatpush3.bf16.msra.mxu1 %v10233_v25  ;;  %v5931_v25 = vshll.u32 %v12042_v38, 16 }
 0x44f   : > { %9399 = vmatprep.subr.bf16.mxu1 %v10234_v42 }
 0x452   : > { %9400 = vmatpush3.bf16.msra.mxu1 %v10234_v42  ;;  %v12054_v42 = vld [vmem:[#allocation3 + $0x90] sm:$0xff] }
 0x453   : > { %9433 = vmatprep.subr.bf16.mxu1 %v10235_v43 }
 0x455   : > { %9370 = vmatmul.mubr.msk.bf16.gmra.mrb[8].mxu1 %vm273_vm0, %v11973_v46 }
 0x456   : > { %9373 = vmatprep.mubr.msk.bf16.mxu1 %vm273_vm0, %v11977_v31 }
 0x45d   : > { %9374 = vmatmul.mubr.msk.bf16.gmra.mrb[12].mxu1 %vm273_vm0, %v11981_v14 }
 0x45e   : > { %9377 = vmatprep.mubr.msk.bf16.mxu1 %vm273_vm0, %v11749_v0  ;;  %v5871_v0 = vshll.u32 %v11995_v21, 16 }
 0x460   : > { %v5873_v32 = vrot.slane %v5871_v0, 1  ;;  %v5950_v0 = vshll.u32 %v11981_v14, 16 }
 0x465   : > { %9378 = vmatmul.mubr.msk.bf16.gmra.mrb[16].mxu1 %vm273_vm0, %v11742_v22  ;;  %v5864_v22 = vshrl.u32 %v5541_v62, 16  ;;  %v5940_v62 = vrot.slane %v5938_v30, 1 }
 0x466   : > { %9381 = vmatprep.mubr.msk.bf16.mxu1 %vm273_vm0, %v11777_v52  ;;  %v5878_v52 = vshll.u32 %v11957_v39, 16 }
 0x467   : > { %v5869_v56 = vor.u32 %v5868_v16, %v5864_v22  ;;  %v12058_v16 = vld [vmem:[#allocation9 + $0xc0] sm:$0xff]   ;;  %v12060_v22 = vor.u32 %v5928_v4, %v5924_v50  ;;  %v5998_v50 = vshll.u32 %v12100_v48, 16 }
 0x468   : > { %v5880_v15 = vrot.slane %v5878_v52, 1 }
 0x46a   : > { %v12016_v35 = vor.u32 %v5880_v15, %v5876_v60  ;;  %v12066_v15 = vld [vmem:[#allocation3 + $0x88] sm:$0x1]  ;;  %v12071_v60 = vld [vmem:[#allocation3 + $0x98] sm:$0x1] }
 0x46b   : > { %v5955_v1 = vshll.u32 %v12066_v15, 16 }
 0x46d   : > { %9382 = vmatmul.mubr.msk.bf16.gmra.mrb[20].mxu1 %vm273_vm0, %v11771_v28  ;;  %v5890_v28 = vshll.u32 %v11961_v11, 16  ;;  %v5957_v53 = vrot.slane %v5955_v1, 1 }
 0x46e   : > { %9385 = vmatprep.mubr.msk.bf16.mxu1 %vm273_vm0, %v11807_v41  ;;  %v12004_v41 = vld [vmem:[#allocation3 + $0x28] sm:$0x1] }
 0x46f   : > { %v5883_v51 = vshll.u32 %v12004_v41, 16 }
 0x471   : > { %v5885_v24 = vrot.slane %v5883_v51, 1 }
 0x473   : > { %v5886_v45 = vsel %vm813_vm5, %v12016_v35, %v5885_v24  ;;  %v12081_v24 = vld [vmem:[#allocation3 + $0xb0] sm:$0xff] }
 0x474   : > { %v5986_v55 = vshll.u32 %v12081_v24, 16  ;;  %v5984_v4 = vshrl.u32 %v12081_v24, 16 }
 0x475   : > { %9386 = vmatmul.mubr.msk.bf16.gmra.mrb[24].mxu1 %vm273_vm0, %v11800_v19  ;;  %v5874_v19 = vsel %vm813_vm5, %v5869_v56, %v5873_v32  ;;  %v5962_v56 = vshll.u32 %v12054_v42, 16  ;;  %v5945_v32 = vrot.slane %v5943_v37, 1  ;;  %v12112_v37 = vld [vmem:[#allocation3 + $0xd8] sm:$0x1] }
 0x476   : > { %9389 = vmatprep.mubr.msk.bf16.mxu1 %vm273_vm0, %v11835_v47  ;;  %v5892_v47 = vrot.slane %v5890_v28, 1  ;;  %v5933_v28 = vrot.slane %v5931_v25, 1  ;;  %v5988_v63 = vrot.slane %v5986_v55, 1 }
 0x478   : > { %v12019_v34 = vor.u32 %v5892_v47, %v5888_v58  ;;  %v5952_v47 = vrot.slane %v5950_v0, 1  ;;  %v5964_v58 = vrot.slane %v5962_v56, 1  ;;  %v12110_v25 = vor.u32 %v5988_v63, %v5984_v4  ;;  %v12114_v56 = vld [vmem:[#allocation3 + $0xc8] sm:$0x1] }
 0x479   : > { %v12139_v63 = vld [vmem:[#allocation3 + $0x108] sm:$0x1] }
 0x47a   : > { %v5898_v29 = vsel %vm813_vm5, %v12019_v34, %v5897_v5  ;;  %v5960_v5 = vshrl.u32 %v12054_v42, 16  ;;  %v6051_v4 = vshll.u32 %v12139_v63, 16 }
 0x47d   : > { %9390 = vmatmul.mubr.msk.bf16.gmra.mrb[28].mxu1 %vm273_vm0, %v11831_v61 }
 0x47e   : > { %9401 = vmatprep.mubr.msk.bf16.mxu1 %vm273_vm0, %v5874_v19  ;;  %v5934_v19 = vsel %vm813_vm5, %v12060_v22, %v5933_v28 }
 0x485   : > { %9402 = vmatmul.mubr.msk.bf16.vlgmr.msra.gmra.mrb[0].mxu1 %vm273_vm0, %v5886_v45  ;;  %v12085_v45 = vor.u32 %v5952_v47, %v5948_v44  ;;  %v6015_v47 = vshll.u32 %v12112_v37, 16 }
 0x486   : > { %9434 = vmatpush3.bf16.msra.mxu1 %v10235_v43  ;;  %9405 = vmatprep.mubr.msk.bf16.mxu1 %vm273_vm0, %v5898_v29  ;;  %v5936_v43 = vshrl.u32 %v11977_v31, 16  ;;  %v12088_v29 = vor.u32 %v5964_v58, %v5960_v5  ;;  %v6003_v58 = vshll.u32 %v12114_v56, 16  ;;  %v12127_v5 = vld [vmem:[#allocation3 + $0xe8] sm:$0x1] }
 0x487   : > { %9435 = vmatprep.subr.bf16.mxu1 %v10236_v40  ;;  %v5958_v10 = vsel %vm813_vm5, %v12085_v45, %v5957_v53  ;;  %v6017_v1 = vrot.slane %v6015_v47, 1  ;;  %v6027_v53 = vshll.u32 %v12127_v5, 16 }
 0x488   : > { %v12063_v52 = vor.u32 %v5940_v62, %v5936_v43 }
 0x48a   : > { %9436 = vmatpush3.bf16.msra.mxu1 %v10236_v40  ;;  %v5946_v51 = vsel %vm813_vm5, %v12063_v52, %v5945_v32  ;;  %v5967_v40 = vshll.u32 %v12071_v60, 16  ;;  %v6000_v32 = vrot.slane %v5998_v50, 1  ;;  %v6329_v50 = vld [vmem:[#allocation3 + $0x10] sm:$0xfe] }
 0x48b   : > { %9437 = vmatprep.subr.bf16.mxu1 %v10237_v2 }
 0x48c   : > { %v5969_v23 = vrot.slane %v5967_v40, 1  ;;  %v6005_v40 = vrot.slane %v6003_v58, 1 }
 0x48d   : > { %9406 = vmatmul.mubr.msk.bf16.gmra.mrb[4].mxu1 %vm273_vm0, %v5910_v12  ;;  %v5979_v12 = vshll.u32 %v12091_v13, 16 }
 0x48e   : > { %9409 = vmatprep.mubr.msk.bf16.mxu1 %vm273_vm0, %v5922_v7  ;;  %9438 = vmatpush3.bf16.msra.mxu1 %v10237_v2  ;;  %v5976_v2 = vrot.slane %v5974_v54, 1  ;;  %v5970_v30 = vsel %vm813_vm5, %v12088_v29, %v5969_v23  ;;  %v5991_v7 = vshll.u32 %v12095_v49, 16  ;;  %v12129_v54 = vld [vmem:[#allocation3 + $0xf8] sm:$0x1]  ;;  %v6018_v23 = vsel %vm813_vm5, %v11857_v20, %v6017_v1 }
 0x48f   : > { %9439 = vmatprep.subr.bf16.mxu1 %v10238_v9  ;;  %v5981_v43 = vrot.slane %v5979_v12, 1 }
 0x490   : > { %v5993_v0 = vrot.slane %v5991_v7, 1 }
 0x492   : > { %9440 = vmatpush3.bf16.msra.mxu1 %v10238_v9  ;;  %v5972_v9 = vshrl.u32 %v12076_v8, 16 }
 0x493   : > { %9473 = vmatprep.subr.bf16.mxu1 %v12058_v16 }
 0x494   : > { %v12107_v62 = vor.u32 %v5976_v2, %v5972_v9  ;;  %v6029_v2 = vrot.slane %v6027_v53, 1  ;;  %v6046_v9 = vshll.u32 %v11831_v61, 16 }
 0x495   : > { %9410 = vmatmul.mubr.msk.bf16.gmra.mrb[8].mxu1 %vm273_vm0, %v5934_v19  ;;  %v5994_v19 = vsel %vm813_vm5, %v12110_v25, %v5993_v0  ;;  %v6053_v0 = vrot.slane %v6051_v4, 1 }
 0x496   : > { %9413 = vmatprep.mubr.msk.bf16.mxu1 %vm273_vm0, %v5946_v51  ;;  %v5982_v28 = vsel %vm813_vm5, %v12107_v62, %v5981_v43  ;;  %v5996_v51 = vshrl.u32 %v12100_v48, 16  ;;  %v6030_v12 = vsel %vm813_vm5, %v11864_v59, %v6029_v2  ;;  %v6048_v7 = vrot.slane %v6046_v9, 1  ;;  %v10241_v2 = vld [vmem:[#allocation9 + $0xd0] sm:$0xff]  }
 0x497   : > { %v6044_v43 = vshrl.u32 %v11831_v61, 16  ;;  %v6384_v61 = vrot.slane %v12006_v57, 1  ;;  %v6390_v57 = vrot.slane %v12026_v33, 1  ;;  %v6396_v33 = vrot.slane %v12046_v3, 1 }
 0x498   : > { %v12125_v44 = vor.u32 %v6000_v32, %v5996_v51  ;;  %v6330_v51 = vld [vmem:[#allocation3 + $0x20] sm:$0xfe] }
 0x499   : > { %v6049_v32 = vor.u32 %v6048_v7, %v6044_v43  ;;  %v6380_v58 = vrot.slane %v6330_v51, 1  ;;  %v6335_v7 = vld [vmem:[#allocation3 + $0x70] sm:$0xfe] }
 0x49a   : > { %v6006_v55 = vsel %vm813_vm5, %v12125_v44, %v6005_v40  ;;  %v6381_v40 = vrot.slane %v12004_v41, 1  ;;  %v6387_v41 = vrot.slane %v12022_v17, 1  ;;  %v6395_v17 = vrot.slane %v6335_v7, 1 }
 0x49b   : > { %v6054_v59 = vsel %vm813_vm5, %v6049_v32, %v6053_v0  ;;  %v6393_v0 = vrot.slane %v12042_v38, 1  ;;  %v6402_v38 = vrot.slane %v12071_v60, 1  ;;  %v6420_v7 = vrot.slane %v12129_v54, 1 }
 0x49c   : > { %v6382_v53 = vsel %vm1513_vm8, %v6380_v58, %v6381_v40  ;;  %v6397_v32 = vsel %vm1513_vm8, %v6395_v17, %v6396_v33  ;;  %v6339_v40 = vld [vmem:[#allocation3 + $0xb0] sm:$0xfe] }
 0x49d   : > { %9414 = vmatmul.mubr.msk.bf16.gmra.mrb[12].mxu1 %vm273_vm0, %v5958_v10  ;;  %v6039_v10 = vshll.u32 %v12129_v54, 16  ;;  %v10245_v54 = vld [vmem:[#allocation9 + $0xf0] sm:$0xff]  }
 0x49e   : > { %9417 = vmatprep.mubr.msk.bf16.mxu1 %vm273_vm0, %v5970_v30 }
 0x49f   : > { %v6041_v30 = vrot.slane %v6039_v10, 1  ;;  %v6333_v10 = vld [vmem:[#allocation3 + $0x50] sm:$0xfe] }
 0x4a0   : > { %v6389_v9 = vrot.slane %v6333_v10, 1  ;;  %v6341_v10 = vld [vmem:[#allocation3 + $0xd0] sm:$0xfe] }
 0x4a1   : > { %v6042_v20 = vsel %vm813_vm5, %v11871_v18, %v6041_v30  ;;  %v6331_v18 = vld [vmem:[#allocation3 + $0x30] sm:$0xfe] }
 0x4a2   : > { %v6383_v1 = vrot.slane %v6331_v18, 1  ;;  %v6399_v18 = vrot.slane %v12066_v15, 1 }
 0x4a5   : > { %9418 = vmatmul.mubr.msk.bf16.gmra.mrb[16].mxu1 %vm273_vm0, %v5982_v28  ;;  %v6377_v28 = vrot.slane %v6329_v50, 1  ;;  %v10243_v50 = vld [vmem:[#allocation9 + $0xe0] sm:$0xff]  }
 0x4a6   : > { %9421 = vmatprep.mubr.msk.bf16.mxu1 %vm273_vm0, %v5994_v19  ;;  %v6378_v19 = vrot.slane %v11995_v21, 1  ;;  %v6385_v21 = vsel %vm1513_vm8, %v6383_v1, %v6384_v61  ;;  %v6338_v1 = vld [vmem:[#allocation3 + $0xa0] sm:$0xfe] }
 0x4a7   : > { %v6404_v61 = vrot.slane %v6338_v1, 1  ;;  %v10249_v1 = vld [vmem:[#allocation9 + $0x110] sm:$0xff]  }
 0x4a8   : > { %v6379_v47 = vsel %vm1513_vm8, %v6377_v28, %v6378_v19  ;;  %v6336_v19 = vld [vmem:[#allocation3 + $0x80] sm:$0xfe] }
 0x4ad   : > { %9422 = vmatmul.mubr.msk.bf16.gmra.mrb[20].mxu1 %vm273_vm0, %v6006_v55  ;;  %v10240_v55 = vld [vmem:[#allocation9 + $0xc8] sm:$0xff]  }
 0x4ae   : > { %9425 = vmatprep.mubr.msk.bf16.mxu1 %vm273_vm0, %v6018_v23  ;;  %v6332_v23 = vld [vmem:[#allocation3 + $0x40] sm:$0xfe] }
 0x4af   : > { %v6386_v30 = vrot.slane %v6332_v23, 1  ;;  %v6340_v23 = vld [vmem:[#allocation3 + $0xc0] sm:$0xfe] }
 0x4b1   : > { %v6388_v4 = vsel %vm1513_vm8, %v6386_v30, %v6387_v41  ;;  %v6413_v30 = vrot.slane %v6341_v10, 1  ;;  %v6414_v41 = vrot.slane %v12112_v37, 1 }
 0x4b5   : > { %9426 = vmatmul.mubr.msk.bf16.gmra.mrb[24].mxu1 %vm273_vm0, %v6030_v12  ;;  %v10242_v12 = vld [vmem:[#allocation9 + $0xd8] sm:$0xff]  }
 0x4b6   : > { %9429 = vmatprep.mubr.msk.bf16.mxu1 %vm273_vm0, %v6042_v20  ;;  %v6334_v20 = vld [vmem:[#allocation3 + $0x60] sm:$0xfe] }
 0x4b7   : > { %v6392_v43 = vrot.slane %v6334_v20, 1  ;;  %v6417_v20 = vrot.slane %v12127_v5, 1  ;;  %v10244_v5 = vld [vmem:[#allocation9 + $0xe8] sm:$0xff]  }
 0x4b9   : > { %v6394_v28 = vsel %vm1513_vm8, %v6392_v43, %v6393_v0  ;;  %v6344_v43 = vld [vmem:[#allocation3 + $0x100] sm:$0xfe]  ;;  %v6423_v0 = vrot.slane %v12139_v63, 1  ;;  %v10246_v63 = vld [vmem:[#allocation9 + $0xf8] sm:$0xff]  }
 0x4ba   : > { %v6422_v17 = vrot.slane %v6344_v43, 1 }
 0x4bc   : > { %v6424_v33 = vsel %vm1513_vm8, %v6422_v17, %v6423_v0  ;;  %v12309_v0 = vld [vmem:[#allocation3 + $0xe8] sm:$0x1] }
 0x4bd   : > { %9430 = vmatmul.mubr.msk.bf16.gmra.mrb[28].mxu1 %vm273_vm0, %v6054_v59  ;;  %v6337_v59 = vld [vmem:[#allocation3 + $0x90] sm:$0xfe] }
 0x4be   : > { %9441 = vmatprep.mubr.msk.bf16.mxu1 %vm273_vm0, %v6379_v47  ;;  %v6398_v47 = vrot.slane %v6336_v19, 1  ;;  %v6401_v51 = vrot.slane %v6337_v59, 1 }
 0x4c0   : > { %v6400_v58 = vsel %vm1513_vm8, %v6398_v47, %v6399_v18  ;;  %v6403_v3 = vsel %vm1513_vm8, %v6401_v51, %v6402_v38  ;;  %v12255_v47 = vld [vmem:[#allocation3 + $0x58] sm:$0x1]  ;;  %v10248_v51 = vld [vmem:[#allocation9 + $0x108] sm:$0xff]  }
 0x4c1   : > { %v12259_v38 = vld [vmem:[#allocation3 + $0x68] sm:$0x1] }
 0x4c5   : > { %9442 = vmatmul.mubr.msk.bf16.vlgmr.msra.gmra.mrb[0].mxu1 %vm273_vm0, %v6382_v53  ;;  %v6405_v53 = vrot.slane %v12091_v13, 1 }
 0x4c6   : > { %9474 = vmatpush3.bf16.msra.mxu1 %v12058_v16  ;;  %9445 = vmatprep.mubr.msk.bf16.mxu1 %vm273_vm0, %v6385_v21  ;;  %v6391_v16 = vsel %vm1513_vm8, %v6389_v9, %v6390_v57  ;;  %v6408_v21 = vrot.slane %v12095_v49, 1  ;;  %v6411_v9 = vrot.slane %v12114_v56, 1  ;;  %v6415_v49 = vsel %vm1513_vm8, %v6413_v30, %v6414_v41  ;;  %v6342_v57 = vld [vmem:[#allocation3 + $0xe0] sm:$0xfe]  ;;  %v12283_v30 = vld [vmem:[#allocation3 + $0xa8] sm:$0x1] }
 0x4c7   : > { %9475 = vmatprep.subr.bf16.mxu1 %v10240_v55  ;;  %v6406_v15 = vsel %vm1513_vm8, %v6404_v61, %v6405_v53  ;;  %v7126_v41 = vshll.u32 %v12283_v30, 16 }
 0x4ca   : > { %9476 = vmatpush3.bf16.msra.mxu1 %v10240_v55  ;;  %v6407_v55 = vrot.slane %v6339_v40, 1 }
 0x4cb   : > { %9477 = vmatprep.subr.bf16.mxu1 %v10241_v2 }
 0x4cc   : > { %v6409_v60 = vsel %vm1513_vm8, %v6407_v55, %v6408_v21  ;;  %v10250_v55 = vld [vmem:[#allocation9 + $0x118] sm:$0xff]  }
 0x4cd   : > { %9446 = vmatmul.mubr.msk.bf16.gmra.mrb[4].mxu1 %vm273_vm0, %v6388_v4  ;;  %v6416_v4 = vrot.slane %v6342_v57, 1  ;;  %v12291_v57 = vld [vmem:[#allocation3 + $0xb8] sm:$0x1] }
 0x4ce   : > { %9449 = vmatprep.mubr.msk.bf16.mxu1 %vm273_vm0, %v6391_v16  ;;  %9478 = vmatpush3.bf16.msra.mxu1 %v10241_v2  ;;  %v6410_v2 = vrot.slane %v6340_v23, 1 }
 0x4cf   : > { %9479 = vmatprep.subr.bf16.mxu1 %v10242_v12  ;;  %v6418_v56 = vsel %vm1513_vm8, %v6416_v4, %v6417_v20  ;;  %v7138_v4 = vshll.u32 %v12291_v57, 16 }
 0x4d0   : > { %v6412_v13 = vsel %vm1513_vm8, %v6410_v2, %v6411_v9  ;;  %v12279_v2 = vld [vmem:[#allocation3 + $0x98] sm:$0x1] }
 0x4d1   : > { %v7114_v9 = vshll.u32 %v12279_v2, 16 }
 0x4d2   : > { %9480 = vmatpush3.bf16.msra.mxu1 %v10242_v12  ;;  %v6343_v12 = vld [vmem:[#allocation3 + $0xf0] sm:$0xfe] }
 0x4d3   : > { %9513 = vmatprep.subr.bf16.mxu1 %v10243_v50  ;;  %v6419_v16 = vrot.slane %v6343_v12, 1  ;;  %v12295_v12 = vld [vmem:[#allocation3 + $0xc8] sm:$0x1] }
 0x4d5   : > { %9450 = vmatmul.mubr.msk.bf16.gmra.mrb[8].mxu1 %vm273_vm0, %v6394_v28  ;;  %v6421_v37 = vsel %vm1513_vm8, %v6419_v16, %v6420_v7  ;;  %v7150_v16 = vshll.u32 %v12295_v12, 16 }
 0x4d6   : > { %9453 = vmatprep.mubr.msk.bf16.mxu1 %vm273_vm0, %v6397_v32 }
 0x4dd   : > { %9454 = vmatmul.mubr.msk.bf16.gmra.mrb[12].mxu1 %vm273_vm0, %v6400_v58  ;;  %v7066_v58 = vshll.u32 %v12255_v47, 16 }
 0x4de   : > { %9457 = vmatprep.mubr.msk.bf16.mxu1 %vm273_vm0, %v6403_v3  ;;  %v7078_v3 = vshll.u32 %v12259_v38, 16 }
 0x4df   : > { %v7068_v40 = vrot.slane %v7066_v58, 1 }
 0x4e0   : > { %v7080_v61 = vrot.slane %v7078_v3, 1 }
 0x4e1   : > { %v7069_v53 = vsel %vm813_vm5, %v12039_v27, %v7068_v40  ;;  %v12334_v40 = vld [vmem:[#allocation3 + $0x118] sm:$0x1] }
 0x4e2   : > { %v7081_v21 = vsel %vm813_vm5, %v12060_v22, %v7080_v61 }
 0x4e5   : > { %9458 = vmatmul.mubr.msk.bf16.gmra.mrb[16].mxu1 %vm273_vm0, %v6406_v15 }
 0x4e6   : > { %9461 = vmatprep.mubr.msk.bf16.mxu1 %vm273_vm0, %v6409_v60 }
 0x4ed   : > { %9462 = vmatmul.mubr.msk.bf16.gmra.mrb[20].mxu1 %vm273_vm0, %v6412_v13  ;;  %v7116_v13 = vrot.slane %v7114_v9, 1 }
 0x4ee   : > { %9465 = vmatprep.mubr.msk.bf16.mxu1 %vm273_vm0, %v6415_v49  ;;  %v7128_v49 = vrot.slane %v7126_v41, 1 }
 0x4f5   : > { %9466 = vmatmul.mubr.msk.bf16.gmra.mrb[24].mxu1 %vm273_vm0, %v6418_v56  ;;  %v7140_v56 = vrot.slane %v7138_v4, 1 }
 0x4f6   : > { %9469 = vmatprep.mubr.msk.bf16.mxu1 %vm273_vm0, %v6421_v37  ;;  %v7152_v37 = vrot.slane %v7150_v16, 1 }
 0x4f7   : > { %v7141_v43 = vsel %vm813_vm5, %v12110_v25, %v7140_v56  ;;  %v7491_v56 = vld [vmem:[#allocation3 + $0x50] sm:$0xfe] }
 0x4fd   : > { %9470 = vmatmul.mubr.msk.bf16.gmra.mrb[28].mxu1 %vm273_vm0, %v6424_v33 }
 0x4fe   : > { %9481 = vmatprep.mubr.msk.bf16.mxu1 %vm273_vm0, %v11957_v39  ;;  %v10247_v39 = vld [vmem:[#allocation9 + $0x100] sm:$0xff]  }
 0x505   : > { %9482 = vmatmul.mubr.msk.bf16.vlgmr.msra.gmra.mrb[0].mxu1 %vm273_vm0, %v11961_v11  ;;  %v12223_v11 = vld [vmem:[#allocation3 + $0xd0] sm:$0xff] }
 0x506   : > { %9514 = vmatpush3.bf16.msra.mxu1 %v10243_v50  ;;  %9485 = vmatprep.mubr.msk.bf16.mxu1 %vm273_vm0, %v11965_v26  ;;  %v12227_v26 = vld [vmem:[#allocation3 + $0xe0] sm:$0xff]  ;;  %v7157_v20 = vshll.u32 %v12223_v11, 16 }
 0x507   : > { %9515 = vmatprep.subr.bf16.mxu1 %v10244_v5  ;;  %v7169_v7 = vshll.u32 %v12227_v26, 16 }
 0x508   : > { %v7159_v17 = vrot.slane %v7157_v20, 1 }
 0x509   : > { %v7171_v33 = vrot.slane %v7169_v7, 1 }
 0x50a   : > { %9516 = vmatpush3.bf16.msra.mxu1 %v10244_v5  ;;  %v7155_v5 = vshrl.u32 %v12223_v11, 16 }
 0x50b   : > { %9517 = vmatprep.subr.bf16.mxu1 %v10245_v54 }
 0x50c   : > { %v7160_v25 = vor.u32 %v7159_v17, %v7155_v5  ;;  %v7493_v5 = vld [vmem:[#allocation3 + $0x70] sm:$0xfe] }
 0x50d   : > { %9486 = vmatmul.mubr.msk.bf16.gmra.mrb[4].mxu1 %vm273_vm0, %v11969_v36  ;;  %v12231_v36 = vld [vmem:[#allocation3 + $0xf0] sm:$0xff] }
 0x50e   : > { %9489 = vmatprep.mubr.msk.bf16.mxu1 %vm273_vm0, %v11973_v46  ;;  %9518 = vmatpush3.bf16.msra.mxu1 %v10245_v54  ;;  %v12233_v46 = vld [vmem:[#allocation3 + $0x28] sm:$0x1] }
 0x50f   : > { %9519 = vmatprep.subr.bf16.mxu1 %v10246_v63 }
 0x512   : > { %9520 = vmatpush3.bf16.msra.mxu1 %v10246_v63  ;;  %v7167_v63 = vshrl.u32 %v12227_v26, 16 }
 0x513   : > { %9553 = vmatprep.subr.bf16.mxu1 %v10247_v39 }
 0x515   : > { %9490 = vmatmul.mubr.msk.bf16.gmra.mrb[8].mxu1 %vm273_vm0, %v11977_v31  ;;  %v12237_v31 = vld [vmem:[#allocation3 + $0x100] sm:$0xff] }
 0x516   : > { %9493 = vmatprep.mubr.msk.bf16.mxu1 %vm273_vm0, %v11981_v14  ;;  %v7030_v14 = vshll.u32 %v12233_v46, 16  ;;  %v7191_v3 = vshrl.u32 %v12237_v31, 16 }
 0x51d   : > { %9494 = vmatmul.mubr.msk.bf16.gmra.mrb[12].mxu1 %vm273_vm0, %v12054_v42  ;;  %v12242_v42 = vld [vmem:[#allocation3 + $0x110] sm:$0xff] }
 0x51e   : > { %9497 = vmatprep.mubr.msk.bf16.mxu1 %vm273_vm0, %v12076_v8  ;;  %v7032_v8 = vrot.slane %v7030_v14, 1  ;;  %v7181_v14 = vshll.u32 %v12231_v36, 16  ;;  %v7205_v58 = vshll.u32 %v12242_v42, 16 }
 0x520   : > { %v7033_v50 = vsel %vm813_vm5, %v12016_v35, %v7032_v8  ;;  %v7172_v8 = vor.u32 %v7171_v33, %v7167_v63  ;;  %v7549_v33 = vrot.slane %v12259_v38, 1  ;;  %v7551_v63 = vrot.slane %v7493_v5, 1 }
 0x525   : > { %9498 = vmatmul.mubr.msk.bf16.gmra.mrb[16].mxu1 %vm273_vm0, %v12081_v24  ;;  %v12244_v24 = vld [vmem:[#allocation3 + $0x38] sm:$0x1] }
 0x526   : > { %9501 = vmatprep.mubr.msk.bf16.mxu1 %vm273_vm0, %v12100_v48  ;;  %v12246_v48 = vld [vmem:[#allocation3 + $0x48] sm:$0x1]  ;;  %v7042_v28 = vshll.u32 %v12244_v24, 16  ;;  %v7540_v16 = vrot.slane %v12244_v24, 1 }
 0x527   : > { %v7054_v32 = vshll.u32 %v12246_v48, 16  ;;  %v7543_v20 = vrot.slane %v12246_v48, 1 }
 0x528   : > { %v7044_v19 = vrot.slane %v7042_v28, 1 }
 0x529   : > { %v7056_v59 = vrot.slane %v7054_v32, 1 }
 0x52a   : > { %v7045_v18 = vsel %vm813_vm5, %v12019_v34, %v7044_v19  ;;  %v12267_v34 = vld [vmem:[#allocation3 + $0x78] sm:$0x1] }
 0x52b   : > { %v7057_v35 = vsel %vm813_vm5, %v12036_v6, %v7056_v59  ;;  %v12271_v6 = vld [vmem:[#allocation3 + $0x88] sm:$0x1]  ;;  %v7090_v15 = vshll.u32 %v12267_v34, 16  ;;  %v7183_v59 = vrot.slane %v7181_v14, 1 }
 0x52c   : > { %v7102_v60 = vshll.u32 %v12271_v6, 16  ;;  %v7555_v14 = vrot.slane %v12271_v6, 1 }
 0x52d   : > { %9502 = vmatmul.mubr.msk.bf16.gmra.mrb[20].mxu1 %vm273_vm0, %v12223_v11  ;;  %v7092_v23 = vrot.slane %v7090_v15, 1  ;;  %v12324_v11 = vld [vmem:[#allocation3 + $0x108] sm:$0x1]  ;;  %v7207_v15 = vrot.slane %v7205_v58, 1  ;;  %v7564_v58 = vrot.slane %v12291_v57, 1 }
 0x52e   : > { %9505 = vmatprep.mubr.msk.bf16.mxu1 %vm273_vm0, %v12227_v26  ;;  %v7104_v10 = vrot.slane %v7102_v60, 1  ;;  %v7210_v60 = vshll.u32 %v12334_v40, 16 }
 0x52f   : > { %v7093_v27 = vsel %vm813_vm5, %v12063_v52, %v7092_v23  ;;  %v7117_v52 = vsel %vm813_vm5, %v12088_v29, %v7116_v13  ;;  %v12305_v29 = vld [vmem:[#allocation3 + $0xd8] sm:$0x1] }
 0x530   : > { %v7105_v22 = vsel %vm813_vm5, %v12085_v45, %v7104_v10  ;;  %v7129_v45 = vsel %vm813_vm5, %v12107_v62, %v7128_v49  ;;  %v7153_v62 = vsel %vm813_vm5, %v12125_v44, %v7152_v37  ;;  %v7162_v54 = vshll.u32 %v12305_v29, 16  ;;  %v12321_v44 = vld [vmem:[#allocation3 + $0xf8] sm:$0x1]  ;;  %v7489_v49 = vld [vmem:[#allocation3 + $0x30] sm:$0xfe] }
 0x531   : > { %v7492_v37 = vld [vmem:[#allocation3 + $0x60] sm:$0xfe] }
 0x532   : > { %v7164_v28 = vrot.slane %v7162_v54, 1  ;;  %v7548_v17 = vrot.slane %v7492_v37, 1  ;;  %v7494_v54 = vld [vmem:[#allocation3 + $0x80] sm:$0xfe] }
 0x534   : > { %v7165_v19 = vsel %vm813_vm5, %v7160_v25, %v7164_v28  ;;  %v7550_v48 = vsel %vm1513_vm8, %v7548_v17, %v7549_v33  ;;  %v7552_v25 = vrot.slane %v12267_v34, 1 }
 0x535   : > { %9506 = vmatmul.mubr.msk.bf16.gmra.mrb[24].mxu1 %vm273_vm0, %v12231_v36 }
 0x536   : > { %9509 = vmatprep.mubr.msk.bf16.mxu1 %vm273_vm0, %v12237_v31 }
 0x53d   : > { %9510 = vmatmul.mubr.msk.bf16.gmra.mrb[28].mxu1 %vm273_vm0, %v12242_v42 }
 0x53e   : > { %9521 = vmatprep.mubr.msk.bf16.mxu1 %vm273_vm0, %v7033_v50  ;;  %v7193_v50 = vshll.u32 %v12237_v31, 16 }
 0x545   : > { %9522 = vmatmul.mubr.msk.bf16.vlgmr.msra.gmra.mrb[0].mxu1 %vm273_vm0, %v7045_v18  ;;  %v7179_v18 = vshrl.u32 %v12231_v36, 16 }
 0x546   : > { %9554 = vmatpush3.bf16.msra.mxu1 %v10247_v39  ;;  %9525 = vmatprep.mubr.msk.bf16.mxu1 %vm273_vm0, %v7057_v35  ;;  %v7174_v39 = vshll.u32 %v12309_v0, 16  ;;  %v7186_v35 = vshll.u32 %v12321_v44, 16 }
 0x547   : > { %9555 = vmatprep.subr.bf16.mxu1 %v10248_v51  ;;  %v7184_v61 = vor.u32 %v7183_v59, %v7179_v18  ;;  %v7561_v59 = vrot.slane %v12283_v30, 1 }
 0x548   : > { %v7176_v32 = vrot.slane %v7174_v39, 1  ;;  %v7554_v39 = vrot.slane %v7494_v54, 1 }
 0x54a   : > { %9556 = vmatpush3.bf16.msra.mxu1 %v10248_v51  ;;  %v7177_v26 = vsel %vm813_vm5, %v7172_v8, %v7176_v32  ;;  %v7195_v51 = vrot.slane %v7193_v50, 1  ;;  %v7556_v38 = vsel %vm1513_vm8, %v7554_v39, %v7555_v14  ;;  %v7495_v8 = vld [vmem:[#allocation3 + $0x90] sm:$0xfe]  ;;  %v7496_v50 = vld [vmem:[#allocation3 + $0xa0] sm:$0xfe] }
 0x54b   : > { %9557 = vmatprep.subr.bf16.mxu1 %v10249_v1  ;;  %v7557_v28 = vrot.slane %v7495_v8, 1  ;;  %v7560_v32 = vrot.slane %v7496_v50, 1  ;;  %v7901_v14 = vld [vmem:[%s10634_s6 + $0x20] sm:$0xff]  ;;  %v7904_v8 = vld [vmem:[%s10634_s6 + $0x38] sm:$0xff] }
 0x54d   : > { %9526 = vmatmul.mubr.msk.bf16.gmra.mrb[4].mxu1 %vm273_vm0, %v7069_v53  ;;  %v7188_v53 = vrot.slane %v7186_v35, 1  ;;  %v7562_v6 = vsel %vm1513_vm8, %v7560_v32, %v7561_v59 }
 0x54e   : > { %9529 = vmatprep.mubr.msk.bf16.mxu1 %vm273_vm0, %v7081_v21  ;;  %9558 = vmatpush3.bf16.msra.mxu1 %v10249_v1  ;;  %v7198_v1 = vshll.u32 %v12324_v11, 16  ;;  %v7203_v21 = vshrl.u32 %v12242_v42, 16  ;;  %v7537_v42 = vrot.slane %v12233_v46, 1 }
 0x54f   : > { %9559 = vmatprep.subr.bf16.mxu1 %v10250_v55  ;;  %v7189_v36 = vsel %vm813_vm5, %v7184_v61, %v7188_v53  ;;  %v7500_v61 = vld [vmem:[#allocation3 + $0xe0] sm:$0xfe] }
 0x550   : > { %v7200_v23 = vrot.slane %v7198_v1, 1  ;;  %v7208_v31 = vor.u32 %v7207_v15, %v7203_v21  ;;  %v7499_v1 = vld [vmem:[#allocation3 + $0xd0] sm:$0xfe]  ;;  %v7572_v53 = vrot.slane %v7500_v61, 1  ;;  %v7570_v21 = vrot.slane %v12305_v29, 1  ;;  %v7905_v61 = vld [vmem:[%s10634_s6 + $0x40] sm:$0xff] }
 0x551   : > { %v7573_v15 = vrot.slane %v12309_v0, 1  ;;  %v7579_v29 = vrot.slane %v12324_v11, 1 }
 0x552   : > { %9560 = vmatpush3.bf16.msra.mxu1 %v10250_v55  ;;  %v7196_v55 = vor.u32 %v7195_v51, %v7191_v3  ;;  %v7498_v51 = vld [vmem:[#allocation3 + $0xc0] sm:$0xfe]  ;;  %v7567_v3 = vrot.slane %v12295_v12, 1 }
 0x553   : > { %v7566_v35 = vrot.slane %v7498_v51, 1  ;;  %v7574_v12 = vsel %vm1513_vm8, %v7572_v53, %v7573_v15 }
 0x554   : > { %v7201_v10 = vsel %vm813_vm5, %v7196_v55, %v7200_v23  ;;  %v7569_v55 = vrot.slane %v7499_v1, 1  ;;  %v7502_v23 = vld [vmem:[#allocation3 + $0x100] sm:$0xfe] }
 0x555   : > { %9530 = vmatmul.mubr.msk.bf16.gmra.mrb[8].mxu1 %vm273_vm0, %v7093_v27  ;;  %v7212_v27 = vrot.slane %v7210_v60, 1  ;;  %v7568_v30 = vsel %vm1513_vm8, %v7566_v35, %v7567_v3  ;;  %v7501_v60 = vld [vmem:[#allocation3 + $0xf0] sm:$0xfe] }
 0x556   : > { %9533 = vmatprep.mubr.msk.bf16.mxu1 %vm273_vm0, %v7105_v22  ;;  %v7488_v22 = vld [vmem:[#allocation3 + $0x20] sm:$0xfe]  ;;  %v7571_v57 = vsel %vm1513_vm8, %v7569_v55, %v7570_v21  ;;  %v7908_v21 = vld [vmem:[%s10634_s6 + $0x58] sm:$0xff] }
 0x557   : > { %v7536_v9 = vrot.slane %v7488_v22, 1  ;;  %v7213_v41 = vsel %vm813_vm5, %v7208_v31, %v7212_v27  ;;  %v7576_v31 = vrot.slane %v12321_v44, 1  ;;  %v7503_v27 = vld [vmem:[#allocation3 + $0x110] sm:$0xfe]  ;;  %v12395_v44 = vld [vmem:[%s12584_s4] ss:$0 sm:$0xff] }
 0x559   : > { %v7538_v13 = vsel %vm1513_vm8, %v7536_v9, %v7537_v42  ;;  %v7581_v9 = vrot.slane %v7503_v27, 1 }
 0x55d   : > { %9534 = vmatmul.mubr.msk.bf16.gmra.mrb[12].mxu1 %vm273_vm0, %v7117_v52  ;;  %v7490_v52 = vld [vmem:[#allocation3 + $0x40] sm:$0xfe] }
 0x55e   : > { %9537 = vmatprep.mubr.msk.bf16.mxu1 %vm273_vm0, %v7129_v45  ;;  %v7539_v45 = vrot.slane %v7489_v49, 1  ;;  %v7542_v4 = vrot.slane %v7490_v52, 1 }
 0x560   : > { %v7541_v7 = vsel %vm1513_vm8, %v7539_v45, %v7540_v16  ;;  %v7544_v46 = vsel %vm1513_vm8, %v7542_v4, %v7543_v20  ;;  %v7897_v45 = vld [vmem:[%s10634_s6] sm:$0xff] }
 0x565   : > { %9538 = vmatmul.mubr.msk.bf16.gmra.mrb[16].mxu1 %vm273_vm0, %v7141_v43  ;;  %v7545_v43 = vrot.slane %v7491_v56, 1  ;;  %v7898_v56 = vld [vmem:[%s10634_s6 + $0x8] sm:$0xff] }
 0x566   : > { %9541 = vmatprep.mubr.msk.bf16.mxu1 %vm273_vm0, %v7153_v62  ;;  %v7546_v62 = vrot.slane %v12255_v47, 1  ;;  %v7553_v47 = vsel %vm1513_vm8, %v7551_v63, %v7552_v25  ;;  %v7903_v63 = vld [vmem:[%s10634_s6 + $0x30] sm:$0xff] }
 0x568   : > { %v7547_v24 = vsel %vm1513_vm8, %v7545_v43, %v7546_v62 }
 0x56d   : > { %9542 = vmatmul.mubr.msk.bf16.gmra.mrb[20].mxu1 %vm273_vm0, %v7165_v19  ;;  %v7558_v19 = vrot.slane %v12279_v2, 1 }
 0x56e   : > { %9545 = vmatprep.mubr.msk.bf16.mxu1 %vm273_vm0, %v7177_v26  ;;  %v7497_v26 = vld [vmem:[#allocation3 + $0xb0] sm:$0xfe] }
 0x56f   : > { %v7559_v34 = vsel %vm1513_vm8, %v7557_v28, %v7558_v19  ;;  %v7563_v18 = vrot.slane %v7497_v26, 1  ;;  %v7902_v19 = vld [vmem:[%s10634_s6 + $0x28] sm:$0xff] }
 0x571   : > { %v7565_v2 = vsel %vm1513_vm8, %v7563_v18, %v7564_v58 }
 0x575   : > { %9546 = vmatmul.mubr.msk.bf16.gmra.mrb[24].mxu1 %vm273_vm0, %v7189_v36  ;;  %v7575_v36 = vrot.slane %v7501_v60, 1  ;;  %v7906_v60 = vld [vmem:[%s10634_s6 + $0x48] sm:$0xff] }
 0x576   : > { %9549 = vmatprep.mubr.msk.bf16.mxu1 %vm273_vm0, %v7201_v10  ;;  %v7578_v10 = vrot.slane %v7502_v23, 1 }
 0x577   : > { %v7577_v0 = vsel %vm1513_vm8, %v7575_v36, %v7576_v31 }
 0x578   : > { %v7580_v22 = vsel %vm1513_vm8, %v7578_v10, %v7579_v29 }
 0x57d   : > { %9550 = vmatmul.mubr.msk.bf16.gmra.mrb[28].mxu1 %vm273_vm0, %v7213_v41  ;;  %v7582_v41 = vrot.slane %v12334_v40, 1  ;;  %v7900_v40 = vld [vmem:[%s10634_s6 + $0x18] sm:$0xff] }
 0x57e   : > { %9561 = vmatprep.mubr.msk.bf16.mxu1 %vm273_vm0, %v7538_v13  ;;  %v7899_v13 = vld [vmem:[%s10634_s6 + $0x10] sm:$0xff] }
 0x57f   : > { %v7583_v42 = vsel %vm1513_vm8, %v7581_v9, %v7582_v41  ;;  %v7911_v41 = vld [vmem:[%s10634_s6 + $0x70] sm:$0xff] }
 0x585   : > { %9562 = vmatmul.mubr.msk.bf16.vlgmr.msra.gmra.mrb[0].mxu1 %vm273_vm0, %v7541_v7 }
 0x586   : > { %9565 = vmatprep.mubr.msk.bf16.mxu1 %vm273_vm0, %v7544_v46 }
 0x58d   : > { %9566 = vmatmul.mubr.msk.bf16.gmra.mrb[4].mxu1 %vm273_vm0, %v7547_v24 }
 0x58e   : > { %9569 = vmatprep.mubr.msk.bf16.mxu1 %vm273_vm0, %v7550_v48 }
 0x595   : > { %9570 = vmatmul.mubr.msk.bf16.gmra.mrb[8].mxu1 %vm273_vm0, %v7553_v47 }
 0x596   : > { %9573 = vmatprep.mubr.msk.bf16.mxu1 %vm273_vm0, %v7556_v38 }
 0x59d   : > { %9574 = vmatmul.mubr.msk.bf16.gmra.mrb[12].mxu1 %vm273_vm0, %v7559_v34 }
 0x59e   : > { %9577 = vmatprep.mubr.msk.bf16.mxu1 %vm273_vm0, %v7562_v6 }
 0x5a5   : > { %9578 = vmatmul.mubr.msk.bf16.gmra.mrb[16].mxu1 %vm273_vm0, %v7565_v2  ;;  %v7907_v2 = vld [vmem:[%s10634_s6 + $0x50] sm:$0xff] }
 0x5a6   : > { %9581 = vmatprep.mubr.msk.bf16.mxu1 %vm273_vm0, %v7568_v30 }
 0x5ad   : > { %9582 = vmatmul.mubr.msk.bf16.gmra.mrb[20].mxu1 %vm273_vm0, %v7571_v57 }
 0x5ae   : > { %9585 = vmatprep.mubr.msk.bf16.mxu1 %vm273_vm0, %v7574_v12 }
 0x5b5   : > { %9586 = vmatmul.mubr.msk.bf16.gmra.mrb[24].mxu1 %vm273_vm0, %v7577_v0 }
 0x5b6   : > { %9589 = vmatprep.mubr.msk.bf16.mxu1 %vm273_vm0, %v7580_v22 }
 0x5bd   : > { %9590 = vmatmul.mubr.msk.bf16.gmra.mrb[28].mxu1 %vm273_vm0, %v7583_v42 }
 0x658   : > { %v9563_v11 = vpop.f32.mrb[0].mxu1 }
 0x659   : > { %v7867_v49 = vadd.f32 %v9563_v11, %v12395_v44  ;;  %v7699_v52 = vpop.f32.mrb[1].mxu1 }
 0x65a   : > { %v7865_v4 = vadd.f32 %v12395_v44, %v7699_v52  ;;  %v9564_v16 = vpop.f32.mrb[2].mxu1 }
 0x65b   : > { %v7931_v20 = vadd.f32 %v7899_v13, %v7867_v49  ;;  %v7868_v7 = vadd.f32 %v9564_v16, %v12395_v44  ;;  %v7702_v46 = vpop.f32.mrb[3].mxu1  ;;  %v7909_v13 = vld [vmem:[%s10634_s6 + $0x60] sm:$0xff] }
 0x65c   : > { %v7929_v37 = vadd.f32 %v7897_v45, %v7865_v4  ;;  %v7866_v43 = vadd.f32 %v12395_v44, %v7702_v46  ;;  %v7912_v45 = vld [vmem:[%s10634_s6 + $0x78] sm:$0xff] }
 0x65d   : > { %v7963_v17 = vmax.f32 %v7931_v20, 0.0  ;;  %v7932_v62 = vadd.f32 %v7900_v40, %v7868_v7  ;;  %v7910_v20 = vld [vmem:[%s10634_s6 + $0x68] sm:$0xff] }
 0x65e   : > { %v7961_v33 = vmax.f32 %v7929_v37, 0.0  ;;  %v7930_v24 = vadd.f32 %v7898_v56, %v7866_v43 }
 0x65f   : > { %7995 = vst.msk [vmem:[%s12407_s11 + $0x10] sm:$0xff] %vm273_vm0, %v7963_v17  ;;  %v7964_v48 = vmax.f32 %v7932_v62, 0.0 }
 0x660   : > { %7993 = vst.msk [vmem:[%s12407_s11] sm:$0xff] %vm273_vm0, %v7961_v33  ;;  %v7962_v5 = vmax.f32 %v7930_v24, 0.0  ;;  %v9567_v54 = vpop.f32.mrb[4].mxu1 }
 0x661   : > { %7996 = vst.msk [vmem:[%s12407_s11 + $0x18] sm:$0xff] %vm273_vm0, %v7964_v48  ;;  %v7871_v39 = vadd.f32 %v9567_v54, %v12395_v44  ;;  %v7715_v25 = vpop.f32.mrb[5].mxu1  ;;  %v7915_v48 = vld [vmem:[%s10634_s6 + $0x90] sm:$0xff] }
 0x662   : > { %7994 = vst.msk [vmem:[%s12407_s11 + $0x8] sm:$0xff] %vm273_vm0, %v7962_v5  ;;  %v7869_v47 = vadd.f32 %v12395_v44, %v7715_v25  ;;  %v9568_v38 = vpop.f32.mrb[6].mxu1 }
 0x663   : > { %v7935_v50 = vadd.f32 %v7903_v63, %v7871_v39  ;;  %v7872_v28 = vadd.f32 %v9568_v38, %v12395_v44  ;;  %v7718_v32 = vpop.f32.mrb[7].mxu1  ;;  %v7913_v63 = vld [vmem:[%s10634_s6 + $0x80] sm:$0xff] }
 0x664   : > { %v7933_v59 = vadd.f32 %v7901_v14, %v7869_v47  ;;  %v7870_v34 = vadd.f32 %v12395_v44, %v7718_v32  ;;  %v7916_v14 = vld [vmem:[%s10634_s6 + $0x98] sm:$0xff] }
 0x665   : > { %v7967_v6 = vmax.f32 %v7935_v50, 0.0  ;;  %v7936_v26 = vadd.f32 %v7904_v8, %v7872_v28  ;;  %v7914_v50 = vld [vmem:[%s10634_s6 + $0x88] sm:$0xff] }
 0x666   : > { %v7965_v51 = vmax.f32 %v7933_v59, 0.0  ;;  %v7934_v18 = vadd.f32 %v7902_v19, %v7870_v34 }
 0x667   : > { %7999 = vst.msk [vmem:[%s12407_s11 + $0x30] sm:$0xff] %vm273_vm0, %v7967_v6  ;;  %v7968_v35 = vmax.f32 %v7936_v26, 0.0 }
 0x668   : > { %7997 = vst.msk [vmem:[%s12407_s11 + $0x20] sm:$0xff] %vm273_vm0, %v7965_v51  ;;  %v7966_v58 = vmax.f32 %v7934_v18, 0.0  ;;  %v9571_v3 = vpop.f32.mrb[8].mxu1 }
 0x669   : > { %8000 = vst.msk [vmem:[%s12407_s11 + $0x38] sm:$0xff] %vm273_vm0, %v7968_v35  ;;  %v7875_v30 = vadd.f32 %v9571_v3, %v12395_v44  ;;  %v7731_v1 = vpop.f32.mrb[9].mxu1  ;;  %v7919_v35 = vld [vmem:[%s10634_s6 + $0xb0] sm:$0xff] }
 0x66a   : > { %7998 = vst.msk [vmem:[%s12407_s11 + $0x28] sm:$0xff] %vm273_vm0, %v7966_v58  ;;  %v7873_v55 = vadd.f32 %v12395_v44, %v7731_v1  ;;  %v9572_v53 = vpop.f32.mrb[10].mxu1 }
 0x66b   : > { %v7939_v15 = vadd.f32 %v7907_v2, %v7875_v30  ;;  %v7876_v57 = vadd.f32 %v9572_v53, %v12395_v44  ;;  %v7734_v12 = vpop.f32.mrb[11].mxu1  ;;  %v7917_v2 = vld [vmem:[%s10634_s6 + $0xa0] sm:$0xff] }
 0x66c   : > { %v7937_v23 = vadd.f32 %v7905_v61, %v7873_v55  ;;  %v7874_v36 = vadd.f32 %v12395_v44, %v7734_v12  ;;  %v7920_v61 = vld [vmem:[%s10634_s6 + $0xb8] sm:$0xff] }
 0x66d   : > { %v7971_v10 = vmax.f32 %v7939_v15, 0.0  ;;  %v7940_v31 = vadd.f32 %v7908_v21, %v7876_v57  ;;  %v7918_v15 = vld [vmem:[%s10634_s6 + $0xa8] sm:$0xff] }
 0x66e   : > { %v7969_v29 = vmax.f32 %v7937_v23, 0.0  ;;  %v7938_v27 = vadd.f32 %v7906_v60, %v7874_v36 }
 0x66f   : > { %8003 = vst.msk [vmem:[%s12407_s11 + $0x50] sm:$0xff] %vm273_vm0, %v7971_v10  ;;  %v7972_v0 = vmax.f32 %v7940_v31, 0.0 }
 0x670   : > { %8001 = vst.msk [vmem:[%s12407_s11 + $0x40] sm:$0xff] %vm273_vm0, %v7969_v29  ;;  %v7970_v22 = vmax.f32 %v7938_v27, 0.0  ;;  %v9575_v9 = vpop.f32.mrb[12].mxu1 }
 0x671   : > { %8004 = vst.msk [vmem:[%s12407_s11 + $0x58] sm:$0xff] %vm273_vm0, %v7972_v0  ;;  %v7879_v42 = vadd.f32 %v9575_v9, %v12395_v44  ;;  %v7747_v11 = vpop.f32.mrb[13].mxu1  ;;  %v7923_v0 = vld [vmem:[%s10634_s6 + $0xd0] sm:$0xff] }
 0x672   : > { %8002 = vst.msk [vmem:[%s12407_s11 + $0x48] sm:$0xff] %vm273_vm0, %v7970_v22  ;;  %v7877_v49 = vadd.f32 %v12395_v44, %v7747_v11  ;;  %v9576_v52 = vpop.f32.mrb[14].mxu1 }
 0x673   : > { %v7943_v4 = vadd.f32 %v7911_v41, %v7879_v42  ;;  %v7880_v16 = vadd.f32 %v9576_v52, %v12395_v44  ;;  %v7750_v40 = vpop.f32.mrb[15].mxu1  ;;  %v7921_v41 = vld [vmem:[%s10634_s6 + $0xc0] sm:$0xff] }
 0x674   : > { %v7941_v7 = vadd.f32 %v7909_v13, %v7877_v49  ;;  %v7878_v46 = vadd.f32 %v12395_v44, %v7750_v40  ;;  %v7924_v13 = vld [vmem:[%s10634_s6 + $0xd8] sm:$0xff] }
 0x675   : > { %v7975_v56 = vmax.f32 %v7943_v4, 0.0  ;;  %v7944_v37 = vadd.f32 %v7912_v45, %v7880_v16  ;;  %v7922_v4 = vld [vmem:[%s10634_s6 + $0xc8] sm:$0xff] }
 0x676   : > { %v7973_v43 = vmax.f32 %v7941_v7, 0.0  ;;  %v7942_v17 = vadd.f32 %v7910_v20, %v7878_v46 }
 0x677   : > { %8007 = vst.msk [vmem:[%s12407_s11 + $0x70] sm:$0xff] %vm273_vm0, %v7975_v56  ;;  %v7976_v62 = vmax.f32 %v7944_v37, 0.0 }
 0x678   : > { %8005 = vst.msk [vmem:[%s12407_s11 + $0x60] sm:$0xff] %vm273_vm0, %v7973_v43  ;;  %v7974_v33 = vmax.f32 %v7942_v17, 0.0  ;;  %v9579_v24 = vpop.f32.mrb[16].mxu1 }
 0x679   : > { %8008 = vst.msk [vmem:[%s12407_s11 + $0x78] sm:$0xff] %vm273_vm0, %v7976_v62  ;;  %v7883_v5 = vadd.f32 %v9579_v24, %v12395_v44  ;;  %v7763_v54 = vpop.f32.mrb[17].mxu1  ;;  %v7927_v62 = vld [vmem:[%s10634_s6 + $0xf0] sm:$0xff] }
 0x67a   : > { %8006 = vst.msk [vmem:[%s12407_s11 + $0x68] sm:$0xff] %vm273_vm0, %v7974_v33  ;;  %v7881_v39 = vadd.f32 %v12395_v44, %v7763_v54  ;;  %v9580_v25 = vpop.f32.mrb[18].mxu1 }
 0x67b   : > { %v7947_v47 = vadd.f32 %v7915_v48, %v7883_v5  ;;  %v7884_v38 = vadd.f32 %v9580_v25, %v12395_v44  ;;  %v7766_v8 = vpop.f32.mrb[19].mxu1  ;;  %v7925_v48 = vld [vmem:[%s10634_s6 + $0xe0] sm:$0xff] }
 0x67c   : > { %v7945_v28 = vadd.f32 %v7913_v63, %v7881_v39  ;;  %v7882_v32 = vadd.f32 %v12395_v44, %v7766_v8  ;;  %v7928_v63 = vld [vmem:[%s10634_s6 + $0xf8] sm:$0xff] }
 0x67d   : > { %v7979_v19 = vmax.f32 %v7947_v47, 0.0  ;;  %v7948_v59 = vadd.f32 %v7916_v14, %v7884_v38  ;;  %v7926_v47 = vld [vmem:[%s10634_s6 + $0xe8] sm:$0xff] }
 0x67e   : > { %v7977_v34 = vmax.f32 %v7945_v28, 0.0  ;;  %v7946_v6 = vadd.f32 %v7914_v50, %v7882_v32 }
 0x67f   : > { %8011 = vst.msk [vmem:[%s12407_s11 + $0x90] sm:$0xff] %vm273_vm0, %v7979_v19  ;;  %v7980_v26 = vmax.f32 %v7948_v59, 0.0 }
 0x680   : > { %8009 = vst.msk [vmem:[%s12407_s11 + $0x80] sm:$0xff] %vm273_vm0, %v7977_v34  ;;  %v7978_v51 = vmax.f32 %v7946_v6, 0.0  ;;  %v9583_v18 = vpop.f32.mrb[20].mxu1 }
 0x681   : > { %8012 = vst.msk [vmem:[%s12407_s11 + $0x98] sm:$0xff] %vm273_vm0, %v7980_v26  ;;  %v7887_v58 = vadd.f32 %v9583_v18, %v12395_v44  ;;  %v7779_v3 = vpop.f32.mrb[21].mxu1 }
 0x682   : > { %8010 = vst.msk [vmem:[%s12407_s11 + $0x88] sm:$0xff] %vm273_vm0, %v7978_v51  ;;  %v7885_v30 = vadd.f32 %v12395_v44, %v7779_v3  ;;  %v9584_v1 = vpop.f32.mrb[22].mxu1 }
 0x683   : > { %v7951_v55 = vadd.f32 %v7919_v35, %v7887_v58  ;;  %v7888_v53 = vadd.f32 %v9584_v1, %v12395_v44  ;;  %v7782_v21 = vpop.f32.mrb[23].mxu1 }
 0x684   : > { %v7949_v57 = vadd.f32 %v7917_v2, %v7885_v30  ;;  %v7886_v12 = vadd.f32 %v12395_v44, %v7782_v21 }
 0x685   : > { %v7983_v60 = vmax.f32 %v7951_v55, 0.0  ;;  %v7952_v23 = vadd.f32 %v7920_v61, %v7888_v53 }
 0x686   : > { %v7981_v36 = vmax.f32 %v7949_v57, 0.0  ;;  %v7950_v10 = vadd.f32 %v7918_v15, %v7886_v12 }
 0x687   : > { %8015 = vst.msk [vmem:[%s12407_s11 + $0xb0] sm:$0xff] %vm273_vm0, %v7983_v60  ;;  %v7984_v31 = vmax.f32 %v7952_v23, 0.0 }
 0x688   : > { %8013 = vst.msk [vmem:[%s12407_s11 + $0xa0] sm:$0xff] %vm273_vm0, %v7981_v36  ;;  %v7982_v29 = vmax.f32 %v7950_v10, 0.0  ;;  %v9587_v27 = vpop.f32.mrb[24].mxu1 }
 0x689   : > { %8016 = vst.msk [vmem:[%s12407_s11 + $0xb8] sm:$0xff] %vm273_vm0, %v7984_v31  ;;  %v7891_v22 = vadd.f32 %v9587_v27, %v12395_v44  ;;  %v7795_v9 = vpop.f32.mrb[25].mxu1 }
 0x68a   : > { %8014 = vst.msk [vmem:[%s12407_s11 + $0xa8] sm:$0xff] %vm273_vm0, %v7982_v29  ;;  %v7889_v42 = vadd.f32 %v12395_v44, %v7795_v9  ;;  %v9588_v11 = vpop.f32.mrb[26].mxu1 }
 0x68b   : > { %v7955_v49 = vadd.f32 %v7923_v0, %v7891_v22  ;;  %v7892_v52 = vadd.f32 %v9588_v11, %v12395_v44  ;;  %v7798_v45 = vpop.f32.mrb[27].mxu1 }
 0x68c   : > { %v7953_v16 = vadd.f32 %v7921_v41, %v7889_v42  ;;  %v7890_v40 = vadd.f32 %v12395_v44, %v7798_v45 }
 0x68d   : > { %v7987_v20 = vmax.f32 %v7955_v49, 0.0  ;;  %v7956_v7 = vadd.f32 %v7924_v13, %v7892_v52 }
 0x68e   : > { %v7985_v46 = vmax.f32 %v7953_v16, 0.0  ;;  %v7954_v56 = vadd.f32 %v7922_v4, %v7890_v40 }
 0x68f   : > { %8019 = vst.msk [vmem:[%s12407_s11 + $0xd0] sm:$0xff] %vm273_vm0, %v7987_v20  ;;  %v7988_v37 = vmax.f32 %v7956_v7, 0.0 }
 0x690   : > { %8017 = vst.msk [vmem:[%s12407_s11 + $0xc0] sm:$0xff] %vm273_vm0, %v7985_v46  ;;  %v7986_v43 = vmax.f32 %v7954_v56, 0.0  ;;  %v9591_v17 = vpop.f32.mrb[28].mxu1 }
 0x691   : > { %8020 = vst.msk [vmem:[%s12407_s11 + $0xd8] sm:$0xff] %vm273_vm0, %v7988_v37  ;;  %v7895_v33 = vadd.f32 %v9591_v17, %v12395_v44  ;;  %v7811_v24 = vpop.f32.mrb[29].mxu1 }
 0x692   : > { %8018 = vst.msk [vmem:[%s12407_s11 + $0xc8] sm:$0xff] %vm273_vm0, %v7986_v43  ;;  %v7893_v5 = vadd.f32 %v12395_v44, %v7811_v24  ;;  %v9592_v54 = vpop.f32.mrb[30].mxu1 }
 0x693   : > { %v7959_v39 = vadd.f32 %v7927_v62, %v7895_v33  ;;  %v7896_v25 = vadd.f32 %v9592_v54, %v12395_v44  ;;  %v7814_v14 = vpop.f32.mrb[31].mxu1 }
 0x694   : > { %v7957_v38 = vadd.f32 %v7925_v48, %v7893_v5  ;;  %v7894_v8 = vadd.f32 %v12395_v44, %v7814_v14 }
 0x695   : > { %v7991_v50 = vmax.f32 %v7959_v39, 0.0  ;;  %v7960_v28 = vadd.f32 %v7928_v63, %v7896_v25 }
 0x696   : > { %v7989_v32 = vmax.f32 %v7957_v38, 0.0  ;;  %v7958_v19 = vadd.f32 %v7926_v47, %v7894_v8 }
 0x697   : > { %8023 = vst.msk [vmem:[%s12407_s11 + $0xf0] sm:$0xff] %vm273_vm0, %v7991_v50  ;;  %v7992_v59 = vmax.f32 %v7960_v28, 0.0 }
 0x698   : > { %8021 = vst.msk [vmem:[%s12407_s11 + $0xe0] sm:$0xff] %vm273_vm0, %v7989_v32  ;;  %v7990_v44 = vmax.f32 %v7958_v19, 0.0 }
 0x699   : > { %8024 = vst.msk [vmem:[%s12407_s11 + $0xf8] sm:$0xff] %vm273_vm0, %v7992_v59 }
 0x69a   : > { %8022 = vst.msk [vmem:[%s12407_s11 + $0xe8] sm:$0xff] %vm273_vm0, %v7990_v44 }
 0x69b   : > { %10356 = shalt.err (!%p10353_p2)
}
 0x69c   : > { %s10357_s6 = scalar_lea.hbm %s12528_s9, 4096  ;;  %s10361_s8 = scalar_lea.hbm %s12585_s5, 8192 }
 0x69d   : > { %p10358_p13 = scmp.ne.s32.totalorder %s12528_s9, %s10357_s6  ;;  %p10362_p4 = scmp.lt.u32.totalorder %s12528_s9, %s12585_s5 }
 0x69e   : > { %p10363_p5 = scmp.lt.u32.totalorder %s10361_s8, %s10357_s6  ;;  %p10365_p11 = scmp.lt.u32.totalorder %s10357_s6, %s12528_s9 }
 0x69f   : > { %p10359_p6 = pnand %p10358_p13, %p12605_p0 }
 0x6a0   : > { %p10364_p8 = por %p10363_p5, %p10362_p4 }
 0x6a1   : > { %p10360_p10 = pneg %p10359_p6 }
 0x6a2   : > { %p10366_p1 = por %p10365_p11, %p10364_p8 }
 0x6a4   : > { %p10367_p3 = pnand %p10366_p1, %p10360_p10 }
 0x6a6   : > { %10370 = shalt.err (!%p10367_p3)
}
 0x6a7   : > { %s10424_s28 = smov 128   ;;  %s10425_s15 = smov 8  }
 0x6a8   : > { %10115 = dma.vmem_to_hbm [thread:$0]  (%p12605_p0), %s12530_s30, 4096, %s12528_s9, %s8026_s22, %s10424_s28, %s10424_s28, %s10425_s15  }
 0x6a9 PF: > { %s8054_s16 = sand.u32 1, %s10401_s18   ;;  %p12606_p7 = scmp.ne.s32.totalorder %s12590_s25, 0 }
 0x6aa   : > { %p12607_p9 = scmp.ge.s32.totalorder %s10413_s21, 2  ;;  %s8055_s12 = scalar_lea.sflag [#allocation6], %s8054_s16 }
 0x6ac   : > { %p10129_p12 = pnand %p12607_p9, %p12606_p7 }
 0x6ae   : > { %10396 = dma.done.wait (!%p10129_p12), %s8055_s12, 4096  }
 0x6af   : > { %10398 = vsyncadd (!%p10129_p12), %s8055_s12, 4294963200  ;;  %p19_p2 = scmp.ge.s32.totalorder %s10566_s14, 4   ;;  %s12608_s18 = smov %s10405_s19 }
 0x6b0   : > { %s12609_s19 = smov %s10409_s20  ;;  %s12610_s20 = smov %s10582_s27 }
 0x6b1   : > { %s12611_s21 = smov %s10566_s14  ;;  %21 = sbr.rel (!%p19_p2) target bundleno = 6 (0x6), region = 115 }
 0x6b8   :  { %8060 = vsyncpa [#allocation5], 1 }
 0x6b9   :  { %8062 = vsyncpa [#allocation5 + $0x1], 1 }
 0x6ba   :  { %8063 = vsyncpa [#allocation8], 1 }
 0x6bb   :  { %8064 = vsyncpa [#allocation6], 1 }
 0x6bc   :  { %8066 = vsyncpa [#allocation6 + $0x1], 1 }

</bundles_post_ra>
